<compile_context>
chip_gen: v6e
topology: v6e:2x2x1
jax: 0.10.0
libtpu: 0.0.40
codegen_flags: <defaults>
</compile_context>

<pallas_src>
import math

import jax
import jax.numpy as jnp
from jax.experimental import pallas as pl
from jax.experimental.pallas import tpu as pltpu


def double_conv_forward(x, conv1_w, bn1, conv2_w, bn2, *, eps=1e-5,
                        compute_dtype=jnp.bfloat16):
    """DoubleConv forward (module defaults), eval-mode BatchNorm.

    x:        (B, Cin, H, W)  NCHW, like the PyTorch module
    conv1_w:  (Cout, Cin, 3, 3)     conv2_w: (Cout, Cout, 3, 3)
    bn1, bn2: tuples (gamma, beta, running_mean, running_var), each (Cout,)
    returns   (B, Cout, H//2, W//2) float32
    """
    B, Cin, H, W = x.shape
    Cout = conv1_w.shape[0]
    Hh, Wh = H // 2, W // 2
    Hq, Wq = H + 2, W + 2            # conv-padded "pseudo grid" (row width Wq)
    Mq = Hq * Wq                     # conv1 pseudo rows (incl. zero border)
    M2 = H * Wq - 2                  # conv2 pseudo rows; max tap window ends at Mq
    K1 = 9 * Cin
    Kp = ((K1 + 127) // 128) * 128   # conv1 contraction, zero-padded lane-dense

    # ---- wrapper-side operand prep (layout only, no compute hoisted) -------
    x_nhwc = jnp.transpose(x, (0, 2, 3, 1)).astype(compute_dtype)
    # 2-px apron: conv1 is evaluated at every (H+2)x(W+2) pseudo position; the
    # border rows are garbage but get masked to exact zeros in-kernel so they
    # double as conv2's zero padding.
    xpp = jnp.pad(x_nhwc, ((0, 0), (2, 2), (2, 2), (0, 0)))
    patches = jnp.concatenate(
        [xpp[:, dy:dy + Hq, dx:dx + Wq, :]
         for dy in range(3) for dx in range(3)], axis=-1)      # (B,Hq,Wq,9*Cin)
    im2col = patches.reshape(B, Mq, K1)
    if Kp != K1:
        im2col = jnp.pad(im2col, ((0, 0), (0, 0), (0, Kp - K1)))
    im2col = im2col.astype(compute_dtype)

    # Conv weights -> tap-major 2-D matmul operands (row = k*Cin_prev + c).
    w1 = jnp.transpose(conv1_w, (2, 3, 1, 0)).reshape(K1, Cout)
    if Kp != K1:
        w1 = jnp.pad(w1, ((0, Kp - K1), (0, 0)))
    w1 = w1.astype(compute_dtype)
    w2 = jnp.transpose(conv2_w, (2, 3, 1, 0)).reshape(9 * Cout, Cout)
    w2 = w2.astype(compute_dtype)

    def fold_bn(bn):
        gamma, beta, mean, var = [p.astype(jnp.float32) for p in bn]
        scale = gamma / jnp.sqrt(var + eps)
        shift = beta - mean * scale
        return scale.reshape(1, Cout), shift.reshape(1, Cout)

    s1, b1 = fold_bn(bn1)
    s2, b2 = fold_bn(bn2)

    # 0/1 interior mask over the pseudo grid (zeroes conv1's garbage border).
    jq = jnp.arange(Mq, dtype=jnp.int32)
    yq, xq = jq // Wq, jq % Wq
    mask = (((yq >= 1) & (yq <= H) & (xq >= 1) & (xq <= W))
            .astype(jnp.float32).reshape(Mq, 1))

    # 2x2 average pool as one matmul over the M2 pseudo rows; the wrap/junk
    # columns (x >= 2*Wh) get zero weight.  0.0 / 0.25 are exact in bf16.
    j2 = jnp.arange(M2, dtype=jnp.int32)
    y2, x2 = j2 // Wq, j2 % Wq
    oy = jnp.arange(Hh * Wh, dtype=jnp.int32) // Wh
    ox = jnp.arange(Hh * Wh, dtype=jnp.int32) % Wh
    pool_mat = (((oy[:, None] == y2[None, :] // 2) &
                 (ox[:, None] == x2[None, :] // 2) &
                 (y2[None, :] < 2 * Hh) & (x2[None, :] < 2 * Wh))
                .astype(jnp.float32) * 0.25).astype(compute_dtype)

    def kernel(x_ref, w1_ref, s1_ref, b1_ref, w2_ref, s2_ref, b2_ref,
               mask_ref, pool_ref, o_ref, hbuf_ref):
        # ---- conv1: ONE im2col matmul (Mq, Kp) @ (Kp, Cout), f32 accum ------
        acc1 = jnp.dot(x_ref[0], w1_ref[...],
                       preferred_element_type=jnp.float32)         # (Mq, Cout)
        # BN1 (folded) + ReLU, then zero the 1-px border -> conv2's padding.
        h = mask_ref[...] * jnp.maximum(acc1 * s1_ref[...] + b1_ref[...], 0.0)
        hbuf_ref[...] = h.astype(hbuf_ref.dtype)                   # one store

        # ---- conv2: 9 taps = contiguous row windows of the flat buffer ------
        # Value-level (MRB-friendly) accumulation; taps paired to K = 2*Cout
        # for v6e/v7x's 256-deep MXUs (K = Cout already ideal on v5e).
        def win(k):
            dy, dx = divmod(k, 3)
            return hbuf_ref[pl.ds(dy * Wq + dx, M2), :]            # (M2, Cout)

        acc2 = jnp.dot(win(8), w2_ref[pl.ds(8 * Cout, Cout), :],
                       preferred_element_type=jnp.float32)         # (M2, Cout)
        for p in range(4):
            lhs = jnp.concatenate([win(2 * p), win(2 * p + 1)], axis=-1)
            acc2 = acc2 + jnp.dot(
                lhs, w2_ref[pl.ds(2 * p * Cout, 2 * Cout), :],
                preferred_element_type=jnp.float32)

        # ---- BN2 + ReLU, then 2x2 average pool as one bf16 MXU matmul -------
        y = jnp.maximum(acc2 * s2_ref[...] + b2_ref[...], 0.0)
        o_ref[0] = jnp.dot(pool_ref[...], y.astype(pool_ref.dtype),
                           preferred_element_type=jnp.float32
                           ).astype(o_ref.dtype)

    flops = int(2 * B * (Mq * Kp * Cout + M2 * 9 * Cout * Cout
                         + Hh * Wh * M2 * Cout))
    bytes_accessed = int(
        im2col.size * im2col.dtype.itemsize
        + w1.size * w1.dtype.itemsize + w2.size * w2.dtype.itemsize
        + mask.size * 4 + pool_mat.size * pool_mat.dtype.itemsize
        + 4 * Cout * 4 + B * Hh * Wh * Cout * 4)

    out = pl.pallas_call(
        kernel,
        out_shape=jax.ShapeDtypeStruct((B, Hh * Wh, Cout), jnp.float32),
        grid_spec=pltpu.PrefetchScalarGridSpec(
            num_scalar_prefetch=0,
            # One image per step keeps grid >= 2 so both v7x TensorCores stay
            # busy at B=2; for large B, block several images per step instead.
            grid=(B,),
            in_specs=[
                pl.BlockSpec((1, Mq, Kp), lambda b: (b, 0, 0)),
                # Grid-invariant operands: constant block index -> fetched once
                # and kept VMEM-resident across the whole grid.  (Single-
                # buffering them via pipeline_mode=pl.Buffered(1) only matters
                # when Cout/H/W scale; left default here.)
                pl.BlockSpec((Kp, Cout), lambda b: (0, 0)),
                pl.BlockSpec((1, Cout), lambda b: (0, 0)),
                pl.BlockSpec((1, Cout), lambda b: (0, 0)),
                pl.BlockSpec((9 * Cout, Cout), lambda b: (0, 0)),
                pl.BlockSpec((1, Cout), lambda b: (0, 0)),
                pl.BlockSpec((1, Cout), lambda b: (0, 0)),
                pl.BlockSpec((Mq, 1), lambda b: (0, 0)),
                pl.BlockSpec((Hh * Wh, M2), lambda b: (0, 0)),
            ],
            out_specs=pl.BlockSpec((1, Hh * Wh, Cout), lambda b: (b, 0, 0)),
            scratch_shapes=[
                # flat zero-bordered conv1 activation, row width W+2 (bf16)
                pltpu.VMEM((Mq, Cout), compute_dtype),
            ],
        ),
        compiler_params=pltpu.CompilerParams(
            # batch axis is embarrassingly parallel -> shards across v7x's 2 TCs
            dimension_semantics=("parallel",),
            # explicit budget, safe on v5e/v6e/v7x; working set here is < 2 MiB.
            # TODO(synk): for large H/W/Cout add a spatial tile grid axis and
            #             re-derive this against v7x's 64 MiB physical VMEM.
            vmem_limit_bytes=32 * 1024 * 1024,
        ),
        cost_estimate=pl.CostEstimate(
            flops=flops, transcendentals=0, bytes_accessed=bytes_accessed),
    )(im2col, w1, s1, b1, w2, s2, b2, mask, pool_mat)

    out = out.reshape(B, Hh, Wh, Cout)
    return jnp.transpose(out, (0, 3, 1, 2))  # back to NCHW


def reference_double_conv(x, conv1_w, bn1, conv2_w, bn2, *, eps=1e-5):
    """Pure-XLA f32 reference (eval-mode BN, AvgPool2d(2))."""
    def conv3x3(inp, w):
        return jax.lax.conv_general_dilated(
            inp.astype(jnp.float32), w.astype(jnp.float32),
            window_strides=(1, 1), padding=((1, 1), (1, 1)),
            dimension_numbers=("NCHW", "OIHW", "NCHW"),
            precision=jax.lax.Precision.HIGHEST)

    def bn_relu(inp, bn):
        gamma, beta, mean, var = [p.astype(jnp.float32) for p in bn]
        out = (inp - mean[None, :, None, None]) / jnp.sqrt(
            var + eps)[None, :, None, None]
        out = out * gamma[None, :, None, None] + beta[None, :, None, None]
        return jnp.maximum(out, 0.0)

    h = bn_relu(conv3x3(x, conv1_w), bn1)
    y = bn_relu(conv3x3(h, conv2_w), bn2)
    B, C, H, W = y.shape
    y = y[:, :, :(H // 2) * 2, :(W // 2) * 2]
    return y.reshape(B, C, H // 2, 2, W // 2, 2).mean(axis=(3, 5))


if __name__ == "__main__":
    # Module config: in_channels=4, out_channels=128 (lane-dense), 16x16 input.
    B, Cin, H, W = 2, 4, 16, 16
    Cout = 128

    key = jax.random.PRNGKey(0)
    keys = jax.random.split(key, 11)

    x = jax.random.normal(keys[0], (B, Cin, H, W), dtype=jnp.float32)
    lim1 = 1.0 / math.sqrt(Cin * 9)
    lim2 = 1.0 / math.sqrt(Cout * 9)
    conv1_w = jax.random.uniform(keys[1], (Cout, Cin, 3, 3),
                                 minval=-lim1, maxval=lim1, dtype=jnp.float32)
    conv2_w = jax.random.uniform(keys[2], (Cout, Cout, 3, 3),
                                 minval=-lim2, maxval=lim2, dtype=jnp.float32)

    bn1 = (jax.random.uniform(keys[3], (Cout,), minval=0.5, maxval=1.5,
                              dtype=jnp.float32),
           0.1 * jax.random.normal(keys[4], (Cout,), dtype=jnp.float32),
           0.1 * jax.random.normal(keys[5], (Cout,), dtype=jnp.float32),
           jax.random.uniform(keys[6], (Cout,), minval=0.5, maxval=1.5,
                              dtype=jnp.float32))
    bn2 = (jax.random.uniform(keys[7], (Cout,), minval=0.5, maxval=1.5,
                              dtype=jnp.float32),
           0.1 * jax.random.normal(keys[8], (Cout,), dtype=jnp.float32),
           0.1 * jax.random.normal(keys[9], (Cout,), dtype=jnp.float32),
           jax.random.uniform(keys[10], (Cout,), minval=0.5, maxval=1.5,
                              dtype=jnp.float32))

    # bf16 model data (the kernel's MXU operand dtype); BN params stay f32.
    x_bf16 = x.astype(jnp.bfloat16)
    w1_bf16 = conv1_w.astype(jnp.bfloat16)
    w2_bf16 = conv2_w.astype(jnp.bfloat16)

    out = double_conv_forward(x_bf16, w1_bf16, bn1, w2_bf16, bn2)
    out = jax.block_until_ready(out)

    ref = reference_double_conv(x_bf16, w1_bf16, bn1, w2_bf16, bn2)
    assert out.shape == (B, Cout, H // 2, W // 2)
    max_err = float(jnp.max(jnp.abs(out - ref)))
    # Tolerance accounts for bf16 MXU operands throughout (inter-conv
    # activation staging and the bf16 pool matmul) vs the f32 reference.
    assert jnp.allclose(out, ref, atol=2e-2, rtol=1e-2), (
        f"mismatch vs reference (max abs err {max_err})")
    print("KERNEL_OK")
</pallas_src>

<mosaic_0001>
module attributes {stable_mosaic.version = 11 : i64} {
  func.func @kernel(%arg0: i32, %arg1: memref<1x324x128xbf16, #tpu.memory_space<vmem>>, %arg2: memref<128x128xbf16, #tpu.memory_space<vmem>>, %arg3: memref<1x128xf32, #tpu.memory_space<vmem>>, %arg4: memref<1x128xf32, #tpu.memory_space<vmem>>, %arg5: memref<1152x128xbf16, #tpu.memory_space<vmem>>, %arg6: memref<1x128xf32, #tpu.memory_space<vmem>>, %arg7: memref<1x128xf32, #tpu.memory_space<vmem>>, %arg8: memref<324x1xf32, #tpu.memory_space<vmem>>, %arg9: memref<64x286xbf16, #tpu.memory_space<vmem>>, %arg10: memref<1x64x128xf32, #tpu.memory_space<vmem>>, %arg11: memref<324x128xbf16, #tpu.memory_space<vmem>>) attributes {dimension_semantics = [#tpu.dimension_semantics<parallel>], iteration_bounds = array<i64: 2>, scalar_prefetch = 0 : i64, scratch_operands = 1 : i64, tpu.core_type = #tpu.core_type<tc>, window_params = [{transform_indices = @transform_0, window_bounds = array<i64: 1, 324, 128>}, {pipeline_mode = #tpu.pipeline_mode<synchronous>, transform_indices = @transform_1, window_bounds = array<i64: 128, 128>}, {pipeline_mode = #tpu.pipeline_mode<synchronous>, transform_indices = @transform_2, window_bounds = array<i64: 1, 128>}, {pipeline_mode = #tpu.pipeline_mode<synchronous>, transform_indices = @transform_3, window_bounds = array<i64: 1, 128>}, {pipeline_mode = #tpu.pipeline_mode<synchronous>, transform_indices = @transform_4, window_bounds = array<i64: 1152, 128>}, {pipeline_mode = #tpu.pipeline_mode<synchronous>, transform_indices = @transform_5, window_bounds = array<i64: 1, 128>}, {pipeline_mode = #tpu.pipeline_mode<synchronous>, transform_indices = @transform_6, window_bounds = array<i64: 1, 128>}, {pipeline_mode = #tpu.pipeline_mode<synchronous>, transform_indices = @transform_7, window_bounds = array<i64: 324, 1>}, {pipeline_mode = #tpu.pipeline_mode<synchronous>, transform_indices = @transform_8, window_bounds = array<i64: 64, 286>}, {transform_indices = @transform_9, window_bounds = array<i64: 1, 64, 128>}]} {
    %c0 = arith.constant 0 : index
    %c0_0 = arith.constant 0 : index
    %c0_1 = arith.constant 0 : index
    %0 = vector.load %arg1[%c0, %c0_0, %c0_1] : memref<1x324x128xbf16, #tpu.memory_space<vmem>>, vector<1x324x128xbf16>
    %1 = vector.shape_cast %0 : vector<1x324x128xbf16> to vector<324x128xbf16>
    %c0_2 = arith.constant 0 : index
    %c0_3 = arith.constant 0 : index
    %2 = vector.load %arg2[%c0_2, %c0_3] : memref<128x128xbf16, #tpu.memory_space<vmem>>, vector<128x128xbf16>
    %cst = arith.constant dense<0.000000e+00> : vector<324x128xf32>
    %3 = tpu.matmul %1, %2, %cst {dimension_numbers = #tpu.dot_dimension_numbers<[1], [0], [0], [1], [0, 0, 1, 1], [], []>} : vector<324x128xbf16>, vector<128x128xbf16>, vector<324x128xf32> -> vector<324x128xf32>
    %c0_4 = arith.constant 0 : index
    %c0_5 = arith.constant 0 : index
    %4 = vector.load %arg8[%c0_4, %c0_5] : memref<324x1xf32, #tpu.memory_space<vmem>>, vector<324x1xf32>
    %c0_6 = arith.constant 0 : index
    %c0_7 = arith.constant 0 : index
    %5 = vector.load %arg3[%c0_6, %c0_7] : memref<1x128xf32, #tpu.memory_space<vmem>>, vector<1x128xf32>
    %6 = vector.broadcast %5 : vector<1x128xf32> to vector<324x128xf32>
    %7 = arith.mulf %3, %6 : vector<324x128xf32>
    %c0_8 = arith.constant 0 : index
    %c0_9 = arith.constant 0 : index
    %8 = vector.load %arg4[%c0_8, %c0_9] : memref<1x128xf32, #tpu.memory_space<vmem>>, vector<1x128xf32>
    %9 = vector.broadcast %8 : vector<1x128xf32> to vector<324x128xf32>
    %10 = arith.addf %7, %9 : vector<324x128xf32>
    %cst_10 = arith.constant 0.000000e+00 : f32
    %11 = vector.broadcast %cst_10 : f32 to vector<324x128xf32>
    %12 = arith.maximumf %10, %11 : vector<324x128xf32>
    %13 = vector.broadcast %4 : vector<324x1xf32> to vector<324x128xf32>
    %14 = arith.mulf %13, %12 : vector<324x128xf32>
    %15 = arith.truncf %14 : vector<324x128xf32> to vector<324x128xbf16>
    %c0_11 = arith.constant 0 : index
    %c0_12 = arith.constant 0 : index
    %16 = vector.load %arg11[%c0_11, %c0_12] : memref<324x128xbf16, #tpu.memory_space<vmem>>, vector<324x128xbf16>
    tpu.vector_store %arg11[%c0_11, %c0_12], %15 {strides = array<i32>} : memref<324x128xbf16, #tpu.memory_space<vmem>>, vector<324x128xbf16>,
    %c38 = arith.constant 38 : index
    %c0_13 = arith.constant 0 : index
    %17 = vector.load %arg11[%c38, %c0_13] : memref<324x128xbf16, #tpu.memory_space<vmem>>, vector<286x128xbf16>
    %c1024 = arith.constant 1024 : index
    %c0_14 = arith.constant 0 : index
    %18 = vector.load %arg5[%c1024, %c0_14] : memref<1152x128xbf16, #tpu.memory_space<vmem>>, vector<128x128xbf16>
    %cst_15 = arith.constant dense<0.000000e+00> : vector<286x128xf32>
    %19 = tpu.matmul %17, %18, %cst_15 {dimension_numbers = #tpu.dot_dimension_numbers<[1], [0], [0], [1], [0, 0, 1, 1], [], []>} : vector<286x128xbf16>, vector<128x128xbf16>, vector<286x128xf32> -> vector<286x128xf32>
    %c0_16 = arith.constant 0 : index
    %c0_17 = arith.constant 0 : index
    %20 = vector.load %arg11[%c0_16, %c0_17] : memref<324x128xbf16, #tpu.memory_space<vmem>>, vector<286x128xbf16>
    %c1 = arith.constant 1 : index
    %c0_18 = arith.constant 0 : index
    %21 = vector.load %arg11[%c1, %c0_18] : memref<324x128xbf16, #tpu.memory_space<vmem>>, vector<286x128xbf16>
    %22 = tpu.concatenate %20, %21 in 1 : vector<286x128xbf16>, vector<286x128xbf16> -> vector<286x256xbf16>
    %c0_19 = arith.constant 0 : index
    %c0_20 = arith.constant 0 : index
    %23 = vector.load %arg5[%c0_19, %c0_20] : memref<1152x128xbf16, #tpu.memory_space<vmem>>, vector<256x128xbf16>
    %cst_21 = arith.constant dense<0.000000e+00> : vector<286x128xf32>
    %24 = tpu.matmul %22, %23, %cst_21 {dimension_numbers = #tpu.dot_dimension_numbers<[1], [0], [0], [1], [0, 0, 1, 1], [], []>} : vector<286x256xbf16>, vector<256x128xbf16>, vector<286x128xf32> -> vector<286x128xf32>
    %25 = arith.addf %19, %24 : vector<286x128xf32>
    %c2 = arith.constant 2 : index
    %c0_22 = arith.constant 0 : index
    %26 = vector.load %arg11[%c2, %c0_22] : memref<324x128xbf16, #tpu.memory_space<vmem>>, vector<286x128xbf16>
    %c18 = arith.constant 18 : index
    %c0_23 = arith.constant 0 : index
    %27 = vector.load %arg11[%c18, %c0_23] : memref<324x128xbf16, #tpu.memory_space<vmem>>, vector<286x128xbf16>
    %28 = tpu.concatenate %26, %27 in 1 : vector<286x128xbf16>, vector<286x128xbf16> -> vector<286x256xbf16>
    %c256 = arith.constant 256 : index
    %c0_24 = arith.constant 0 : index
    %29 = vector.load %arg5[%c256, %c0_24] : memref<1152x128xbf16, #tpu.memory_space<vmem>>, vector<256x128xbf16>
    %cst_25 = arith.constant dense<0.000000e+00> : vector<286x128xf32>
    %30 = tpu.matmul %28, %29, %cst_25 {dimension_numbers = #tpu.dot_dimension_numbers<[1], [0], [0], [1], [0, 0, 1, 1], [], []>} : vector<286x256xbf16>, vector<256x128xbf16>, vector<286x128xf32> -> vector<286x128xf32>
    %31 = arith.addf %25, %30 : vector<286x128xf32>
    %c19 = arith.constant 19 : index
    %c0_26 = arith.constant 0 : index
    %32 = vector.load %arg11[%c19, %c0_26] : memref<324x128xbf16, #tpu.memory_space<vmem>>, vector<286x128xbf16>
    %c20 = arith.constant 20 : index
    %c0_27 = arith.constant 0 : index
    %33 = vector.load %arg11[%c20, %c0_27] : memref<324x128xbf16, #tpu.memory_space<vmem>>, vector<286x128xbf16>
    %34 = tpu.concatenate %32, %33 in 1 : vector<286x128xbf16>, vector<286x128xbf16> -> vector<286x256xbf16>
    %c512 = arith.constant 512 : index
    %c0_28 = arith.constant 0 : index
    %35 = vector.load %arg5[%c512, %c0_28] : memref<1152x128xbf16, #tpu.memory_space<vmem>>, vector<256x128xbf16>
    %cst_29 = arith.constant dense<0.000000e+00> : vector<286x128xf32>
    %36 = tpu.matmul %34, %35, %cst_29 {dimension_numbers = #tpu.dot_dimension_numbers<[1], [0], [0], [1], [0, 0, 1, 1], [], []>} : vector<286x256xbf16>, vector<256x128xbf16>, vector<286x128xf32> -> vector<286x128xf32>
    %37 = arith.addf %31, %36 : vector<286x128xf32>
    %c36 = arith.constant 36 : index
    %c0_30 = arith.constant 0 : index
    %38 = vector.load %arg11[%c36, %c0_30] : memref<324x128xbf16, #tpu.memory_space<vmem>>, vector<286x128xbf16>
    %c37 = arith.constant 37 : index
    %c0_31 = arith.constant 0 : index
    %39 = vector.load %arg11[%c37, %c0_31] : memref<324x128xbf16, #tpu.memory_space<vmem>>, vector<286x128xbf16>
    %40 = tpu.concatenate %38, %39 in 1 : vector<286x128xbf16>, vector<286x128xbf16> -> vector<286x256xbf16>
    %c768 = arith.constant 768 : index
    %c0_32 = arith.constant 0 : index
    %41 = vector.load %arg5[%c768, %c0_32] : memref<1152x128xbf16, #tpu.memory_space<vmem>>, vector<256x128xbf16>
    %cst_33 = arith.constant dense<0.000000e+00> : vector<286x128xf32>
    %42 = tpu.matmul %40, %41, %cst_33 {dimension_numbers = #tpu.dot_dimension_numbers<[1], [0], [0], [1], [0, 0, 1, 1], [], []>} : vector<286x256xbf16>, vector<256x128xbf16>, vector<286x128xf32> -> vector<286x128xf32>
    %43 = arith.addf %37, %42 : vector<286x128xf32>
    %c0_34 = arith.constant 0 : index
    %c0_35 = arith.constant 0 : index
    %44 = vector.load %arg6[%c0_34, %c0_35] : memref<1x128xf32, #tpu.memory_space<vmem>>, vector<1x128xf32>
    %45 = vector.broadcast %44 : vector<1x128xf32> to vector<286x128xf32>
    %46 = arith.mulf %43, %45 : vector<286x128xf32>
    %c0_36 = arith.constant 0 : index
    %c0_37 = arith.constant 0 : index
    %47 = vector.load %arg7[%c0_36, %c0_37] : memref<1x128xf32, #tpu.memory_space<vmem>>, vector<1x128xf32>
    %48 = vector.broadcast %47 : vector<1x128xf32> to vector<286x128xf32>
    %49 = arith.addf %46, %48 : vector<286x128xf32>
    %cst_38 = arith.constant 0.000000e+00 : f32
    %50 = vector.broadcast %cst_38 : f32 to vector<286x128xf32>
    %51 = arith.maximumf %49, %50 : vector<286x128xf32>
    %c0_39 = arith.constant 0 : index
    %c0_40 = arith.constant 0 : index
    %52 = vector.load %arg9[%c0_39, %c0_40] : memref<64x286xbf16, #tpu.memory_space<vmem>>, vector<64x286xbf16>
    %53 = arith.truncf %51 : vector<286x128xf32> to vector<286x128xbf16>
    %cst_41 = arith.constant dense<0.000000e+00> : vector<64x128xf32>
    %54 = tpu.matmul %52, %53, %cst_41 {dimension_numbers = #tpu.dot_dimension_numbers<[1], [0], [0], [1], [0, 0, 1, 1], [], []>} : vector<64x286xbf16>, vector<286x128xbf16>, vector<64x128xf32> -> vector<64x128xf32>
    %c0_42 = arith.constant 0 : index
    %c0_43 = arith.constant 0 : index
    %c0_44 = arith.constant 0 : index
    %55 = vector.load %arg10[%c0_42, %c0_43, %c0_44] : memref<1x64x128xf32, #tpu.memory_space<vmem>>, vector<1x64x128xf32>
    %56 = vector.shape_cast %55 : vector<1x64x128xf32> to vector<64x128xf32>
    %57 = vector.shape_cast %54 : vector<64x128xf32> to vector<1x64x128xf32>
    tpu.vector_store %arg10[%c0_42, %c0_43, %c0_44], %57 {strides = array<i32>} : memref<1x64x128xf32, #tpu.memory_space<vmem>>, vector<1x64x128xf32>,
    return
  }
  func.func @transform_0(%arg0: i32) -> (i32, i32, i32) {
    %c0_i32 = arith.constant 0 : i32
    %c0_i32_0 = arith.constant 0 : i32
    %c0_i32_1 = arith.constant 0 : i32
    return %arg0, %c0_i32, %c0_i32_0 : i32, i32, i32
  }
  func.func @transform_1(%arg0: i32) -> (i32, i32) {
    %c0_i32 = arith.constant 0 : i32
    %c0_i32_0 = arith.constant 0 : i32
    %c0_i32_1 = arith.constant 0 : i32
    return %c0_i32, %c0_i32_0 : i32, i32
  }
  func.func @transform_2(%arg0: i32) -> (i32, i32) {
    %c0_i32 = arith.constant 0 : i32
    %c0_i32_0 = arith.constant 0 : i32
    %c0_i32_1 = arith.constant 0 : i32
    return %c0_i32, %c0_i32_0 : i32, i32
  }
  func.func @transform_3(%arg0: i32) -> (i32, i32) {
    %c0_i32 = arith.constant 0 : i32
    %c0_i32_0 = arith.constant 0 : i32
    %c0_i32_1 = arith.constant 0 : i32
    return %c0_i32, %c0_i32_0 : i32, i32
  }
  func.func @transform_4(%arg0: i32) -> (i32, i32) {
    %c0_i32 = arith.constant 0 : i32
    %c0_i32_0 = arith.constant 0 : i32
    %c0_i32_1 = arith.constant 0 : i32
    return %c0_i32, %c0_i32_0 : i32, i32
  }
  func.func @transform_5(%arg0: i32) -> (i32, i32) {
    %c0_i32 = arith.constant 0 : i32
    %c0_i32_0 = arith.constant 0 : i32
    %c0_i32_1 = arith.constant 0 : i32
    return %c0_i32, %c0_i32_0 : i32, i32
  }
  func.func @transform_6(%arg0: i32) -> (i32, i32) {
    %c0_i32 = arith.constant 0 : i32
    %c0_i32_0 = arith.constant 0 : i32
    %c0_i32_1 = arith.constant 0 : i32
    return %c0_i32, %c0_i32_0 : i32, i32
  }
  func.func @transform_7(%arg0: i32) -> (i32, i32) {
    %c0_i32 = arith.constant 0 : i32
    %c0_i32_0 = arith.constant 0 : i32
    %c0_i32_1 = arith.constant 0 : i32
    return %c0_i32, %c0_i32_0 : i32, i32
  }
  func.func @transform_8(%arg0: i32) -> (i32, i32) {
    %c0_i32 = arith.constant 0 : i32
    %c0_i32_0 = arith.constant 0 : i32
    %c0_i32_1 = arith.constant 0 : i32
    return %c0_i32, %c0_i32_0 : i32, i32
  }
  func.func @transform_9(%arg0: i32) -> (i32, i32, i32) {
    %c0_i32 = arith.constant 0 : i32
    %c0_i32_0 = arith.constant 0 : i32
    %c0_i32_1 = arith.constant 0 : i32
    return %arg0, %c0_i32, %c0_i32_0 : i32, i32, i32
  }
}

</mosaic_0001>

<bundles_post_ra>
// kernel: tpu_custom_call.1
= control target key start
LH: loop header
LB: loop body
LE: loop exit
PB: predicated region body
PF: predicated region fallthrough
CT: control target
= control target key end

     0   :  { %14 = vsyncpa [#allocation4], 0  ;;  %s7719_s0 = inlined_call_operand.vmem [shape: bf16[2,324,128], index: 0, kind: input, shape index: {}]   ;;  %s7720_s1 = inlined_call_operand.vmem [shape: bf16[128,128], index: 1, kind: input, shape index: {}]   ;;  %s7721_s2 = inlined_call_operand.vmem [shape: f32[1,128], index: 2, kind: input, shape index: {}]   ;;  %s7722_s3 = inlined_call_operand.vmem [shape: f32[1,128], index: 3, kind: input, shape index: {}]   ;;  %s7723_s4 = inlined_call_operand.vmem [shape: bf16[1152,128], index: 4, kind: input, shape index: {}]   ;;  %s7724_s5 = inlined_call_operand.vmem [shape: f32[1,128], index: 5, kind: input, shape index: {}]   ;;  %s7725_s6 = inlined_call_operand.vmem [shape: f32[1,128], index: 6, kind: input, shape index: {}]   ;;  %s7726_s7 = inlined_call_operand.vmem [shape: f32[324,1], index: 7, kind: input, shape index: {}]   ;;  %s7727_s8 = inlined_call_operand.vmem [shape: bf16[64,286], index: 8, kind: input, shape index: {}]   ;;  %s7728_s9 = inlined_call_operand.hbm [shape: f32[2,64,128], index: 9, kind: output, shape index: {}]  }
   0x1   :  { %16 = vsyncpa [#allocation4 + $0x1], 0  ;;  %s5778_s30 = smov 0   ;;  %s5780_s10 = smov 0  }
   0x2   :  { %s5782_s11 = smov 0   ;;  %s5784_s12 = smov 0  }
   0x3 LB: > { %s5799_s13 = sadd.s32 4294967295, %s5720_s12   ;;  %s4748_s14 = sadd.s32 4294967294, %s5720_s12   ;;  %s5720_s12 = sphi %s5784_s12, %s7845_s12   ;;  %s5716_s11 = sphi %s5782_s11, %s7844_s11   ;;  %s5712_s10 = sphi %s5780_s10, %s7843_s10   ;;  %s5708_s30 = sphi %s5778_s30, %s7842_s30  }
   0x4   : > { %s5803_s15 = sadd.s32 1, %s5720_s12   ;;  %s223_s16 = sadd.s32 1, %s5716_s11 }
   0x5   : > { %s220_s17 = ssub.s32 %s5720_s12, %s5803_s15  ;;  %p233_p0 = scmp.ne.s32.totalorder %s5716_s11, %s5712_s10 }
   0x6   : > { %p221_p1 = scmp.eq.s32.totalorder %s220_s17, 0  ;;  %p234_p2 = scmp.eq.s32.totalorder %s5799_s13, 1 }
   0x7   : > { %p239_p3 = scmp.ne.s32.totalorder %s5712_s10, %s5708_s30  ;;  %p240_p4 = scmp.eq.s32.totalorder %s4748_s14, 1 }
   0x8   : > { %s5814_s18 = scalar_select %p221_p1, %s5716_s11, %s223_s16  }
   0x9   : > { %p5816_p5 = por %p234_p2, %p233_p0  ;;  %p5820_p6 = por %p240_p4, %p239_p3 }
   0xa   : > { %p4751_p7 = scmp.ge.s32.totalorder %s5720_s12, 1  ;;  %p290_p8 = scmp.lt.s32.totalorder %s5720_s12, 3 }
   0xc   : > { %p291_p9 = pnand %p4751_p7, %p290_p8 }
   0xe   : > { %294 = sbr.rel (%p291_p9) target bundleno = 1185 (0x4a1), region = 56 }
  0x13   : > { %v5459_v0 = vld [vmem:[%s7720_s1 + $0x38] sm:$0xff]   ;;  %v5722_v1 = vmov 0.0   ;;  %v5460_v2 = vld [vmem:[%s7720_s1 + $0x30] sm:$0xff]   ;;  %vm5723_vm0 = vmmov 0   ;;  %v5724_v3 = vmov 0   ;;  %p326_p10 = scmp.lt.s32.totalorder %s5799_s13, 1 }
  0x14   : > { %5247 = vmatprep.subr.bf16.mxu0 %v5722_v1  ;;  %5263 = vmatprep.mubr.msk.bf16.mxu0 %vm5723_vm0, %v5722_v1  ;;  %v5461_v4 = vld [vmem:[%s7720_s1 + $0x28] sm:$0xff]   ;;  %v761_v5 = vld [vmem:[%s7726_s7] sm:$0xff]  ;;  %v763_v6 = vld [vmem:[%s7726_s7 + $0x10] sm:$0xff]  ;;  %vm1561_vm1 = vsmask.f32 7424  ;;  %vm2487_vm2 = vcmask 1046528  }
  0x15   : > { %5248 = vmatpush3.bf16.msra.mxu0 %v5459_v0  ;;  %5457 = vset.pattern.permute.xlu0 %v5724_v3  ;;  %s327_s25 = scalar_select %p326_p10, %s5799_s13, 1  ;;  %v5462_v7 = vld [vmem:[%s7720_s1 + $0x20] sm:$0xff]   ;;  %v762_v8 = vld [vmem:[%s7726_s7 + $0x8] sm:$0xff]  ;;  %v764_v9 = vld [vmem:[%s7726_s7 + $0x18] sm:$0xff]  ;;  %vm2044_vm3 = vcmask 1044480   ;;  %vm3881_vm5 = vcmask 1045504  }
  0x16   : > { %5249 = vmatprep.subr.bf16.mxu0 %v5722_v1  ;;  %5458 = vset.pattern.permute.xlu1 %v5724_v3  ;;  %v5463_v10 = vld [vmem:[%s7720_s1 + $0x18] sm:$0xff]   ;;  %v765_v11 = vld [vmem:[%s7726_s7 + $0x20] sm:$0xff]  ;;  %v766_v12 = vld [vmem:[%s7726_s7 + $0x28] sm:$0xff]  ;;  %vm3219_vm4 = vsmask.f32 6400  ;;  %vm4517_vm6 = vcmask 244736  }
  0x17   : > { %1851 = vmatprep.subr.bf16.mxu1 %v5724_v3  ;;  %s5412_s28 = smul.u32 164, %s327_s25  ;;  %941 = vperm.xlu0 %5457, %v761_v5   ;;  %v5464_v13 = vld [vmem:[%s7720_s1 + $0x10] sm:$0xff]   ;;  %v768_v15 = vld [vmem:[%s7726_s7 + $0x38] sm:$0xff]  ;;  %v5465_v16 = vld [vmem:[%s7720_s1 + $0x8] sm:$0xff]   ;;  %s323_s29 = sand.u32 1, %s5712_s10  }
  0x18   : > { %951 = vperm.xlu1 %5458, %v763_v6   ;;  %v767_v14 = vld [vmem:[%s7726_s7 + $0x30] sm:$0xff]  ;;  %v769_v17 = vld [vmem:[%s7726_s7 + $0x40] sm:$0xff]  ;;  %v770_v18 = vld [vmem:[%s7726_s7 + $0x48] sm:$0xff]  ;;  %s4752_s14 = sshll.u32 %s323_s29, 6  ;;  %s5026_s17 = sshll.u32 %s5799_s13, 10 }
  0x19   : > { %5250 = vmatpush3.bf16.msra.mxu0 %v5460_v2  ;;  %s5857_s26 = scalar_lea.vmem %s7719_s0, %s5412_s28  ;;  %v5466_v19 = vld [vmem:[%s7720_s1] sm:$0xff]   ;;  %v771_v20 = vld [vmem:[%s7726_s7 + $0x50] sm:$0xff]  ;;  %v772_v21 = vld [vmem:[%s7726_s7 + $0x58] sm:$0xff]  ;;  %s325_s16 = scalar_lea.vmem [#allocation3], %s4752_s14 }
  0x1a   : > { %5251 = vmatprep.subr.bf16.mxu0 %v5722_v1  ;;  %v5467_v22 = vld [vmem:[%s5857_s26] sm:$0xff]   ;;  %v774_v24 = vld [vmem:[%s7726_s7 + $0x68] sm:$0xff]  ;;  %v775_v25 = vld [vmem:[%s7726_s7 + $0x70] sm:$0xff]  ;;  %s7673_s22 = scalar_lea.hbm %s7728_s9, %s5026_s17  ;;  %s7679_s13 = scalar_lea.sflag [#allocation4], %s323_s29 }
  0x1b   : > { %946 = vperm.xlu0 %5457, %v762_v8   ;;  %v773_v23 = vld [vmem:[%s7726_s7 + $0x60] sm:$0xff]  ;;  %v776_v26 = vld [vmem:[%s7726_s7 + $0x78] sm:$0xff]  ;;  %v5468_v27 = vld [vmem:[%s5857_s26 + $0x8] sm:$0xff]   ;;  %s5725_s24 = smov [#allocation3]  }
  0x1c   : > { %956 = vperm.xlu1 %5458, %v764_v9   ;;  %v777_v28 = vld [vmem:[%s7726_s7 + $0x80] sm:$0xff]  ;;  %v778_v29 = vld [vmem:[%s7726_s7 + $0x88] sm:$0xff]  ;;  %v779_v30 = vld [vmem:[%s7726_s7 + $0x90] sm:$0xff]  ;;  %s5664_s27 = sshll.u32 %s5725_s24, 4  ;;  %s5665_s27 = int_to_ptr.vmem [resolvable:$false] %s5664_s27 }
  0x1d   : > { %5252 = vmatpush3.bf16.msra.mxu0 %v5461_v4  ;;  %v780_v31 = vld [vmem:[%s7726_s7 + $0x98] sm:$0xff]  ;;  %v5469_v32 = vld [vmem:[%s5857_s26 + $0x10] sm:$0xff]   ;;  %v781_v33 = vld [vmem:[%s7726_s7 + $0xa0] sm:$0xff]  ;;  %s5666_s25 = scalar_lea.vmem %s5665_s27, 2048 }
  0x1e   : > { %5253 = vmatprep.subr.bf16.mxu0 %v5722_v1  ;;  %v782_v34 = vld [vmem:[%s7726_s7 + $0xa8] sm:$0xff]  ;;  %v783_v35 = vld [vmem:[%s7726_s7 + $0xb0] sm:$0xff]  ;;  %v784_v36 = vld [vmem:[%s7726_s7 + $0xb8] sm:$0xff] }
  0x1f   : > { %961 = vperm.xlu0 %5457, %v765_v11   ;;  %v5470_v37 = vld [vmem:[%s5857_s26 + $0x18] sm:$0xff]   ;;  %v785_v38 = vld [vmem:[%s7726_s7 + $0xc0] sm:$0xff]  ;;  %v786_v39 = vld [vmem:[%s7726_s7 + $0xc8] sm:$0xff] }
  0x20   : > { %966 = vperm.xlu1 %5458, %v766_v12   ;;  %v787_v40 = vld [vmem:[%s7726_s7 + $0xd0] sm:$0xff]  ;;  %v788_v41 = vld [vmem:[%s7726_s7 + $0xd8] sm:$0xff]  ;;  %v5471_v42 = vld [vmem:[%s5857_s26 + $0x20] sm:$0xff]  }
  0x21   : > { %5254 = vmatpush3.bf16.msra.mxu0 %v5462_v7  ;;  %v789_v43 = vld [vmem:[%s7726_s7 + $0xe0] sm:$0xff]  ;;  %v790_v44 = vld [vmem:[%s7726_s7 + $0xe8] sm:$0xff]  ;;  %v5488_v45 = vld [vmem:[%s7723_s4 + $0x38] sm:$0xff]  }
  0x22   : > { %5255 = vmatprep.subr.bf16.mxu0 %v5722_v1  ;;  %v791_v46 = vld [vmem:[%s7726_s7 + $0xf0] sm:$0xff]  ;;  %v792_v47 = vld [vmem:[%s7726_s7 + $0xf8] sm:$0xff]  ;;  %v5472_v49 = vld [vmem:[%s5857_s26 + $0x28] sm:$0xff]   ;;  %1852 = vmatpush1.bf16.msra.mxu1 %v5488_v45 }
  0x23   : > { %971 = vperm.xlu0 %5457, %v767_v14   ;;  %v5489_v48 = vld [vmem:[%s7723_s4 + $0x30] sm:$0xff]   ;;  %v793_v50 = vld [vmem:[%s7726_s7 + $0x100] sm:$0xff]  ;;  %1853 = vmatprep.subr.bf16.mxu1 %v5724_v3  ;;  %v794_v51 = vld [vmem:[%s7726_s7 + $0x108] sm:$0xff] }
  0x24   : > { %976 = vperm.xlu1 %5458, %v768_v15   ;;  %v5490_v52 = vld [vmem:[%s7723_s4 + $0x28] sm:$0xff]   ;;  %v795_v53 = vld [vmem:[%s7726_s7 + $0x110] sm:$0xff]  ;;  %v796_v54 = vld [vmem:[%s7726_s7 + $0x118] sm:$0xff] }
  0x25   : > { %5256 = vmatpush3.bf16.msra.mxu0 %v5463_v10  ;;  %v5491_v55 = vld [vmem:[%s7723_s4 + $0x20] sm:$0xff]   ;;  %v5473_v56 = vld [vmem:[%s5857_s26 + $0x30] sm:$0xff]   ;;  %v798_v58 = vld [vmem:[%s7726_s7 + $0x128] sm:$0xff] }
  0x26   : > { %5257 = vmatprep.subr.bf16.mxu0 %v5722_v1  ;;  %1854 = vmatpush1.bf16.msra.mxu1 %v5489_v48  ;;  %v797_v57 = vld [vmem:[%s7726_s7 + $0x120] sm:$0xff]  ;;  %v5492_v59 = vld [vmem:[%s7723_s4 + $0x18] sm:$0xff]   ;;  %v799_v60 = vld [vmem:[%s7726_s7 + $0x130] sm:$0xff] }
  0x27   : > { %981 = vperm.xlu0 %5457, %v769_v17   ;;  %1855 = vmatprep.subr.bf16.mxu1 %v5724_v3  ;;  %v800_v61 = vld [vmem:[%s7726_s7 + $0x138] sm:$0xff]  ;;  %v5493_v62 = vld [vmem:[%s7723_s4 + $0x10] sm:$0xff]   ;;  %v801_v0 = vld [vmem:[%s7726_s7 + $0x140] sm:$0xf] }
  0x28   : > { %986 = vperm.xlu1 %5458, %v770_v18   ;;  %v5474_v63 = vld [vmem:[%s5857_s26 + $0x38] sm:$0xff]   ;;  %v5494_v2 = vld [vmem:[%s7723_s4 + $0x8] sm:$0xff]   ;;  %v5475_v4 = vld [vmem:[%s5857_s26 + $0x40] sm:$0xff]  }
  0x29   : > { %5258 = vmatpush3.bf16.msra.mxu0 %v5464_v13  ;;  %v5495_v5 = vld [vmem:[%s7723_s4] sm:$0xff]   ;;  %v5476_v6 = vld [vmem:[%s5857_s26 + $0x48] sm:$0xff]   ;;  %v5496_v7 = vld [vmem:[%s7723_s4 + $0x78] sm:$0xff]  }
  0x2a   : > { %5259 = vmatprep.subr.bf16.mxu0 %v5722_v1  ;;  %1856 = vmatpush1.bf16.msra.mxu1 %v5490_v52  ;;  %v5497_v8 = vld [vmem:[%s7723_s4 + $0x70] sm:$0xff]   ;;  %v5498_v10 = vld [vmem:[%s7723_s4 + $0x68] sm:$0xff]   ;;  %v5499_v11 = vld [vmem:[%s7723_s4 + $0x60] sm:$0xff]  }
  0x2b   : > { %991 = vperm.xlu0 %5457, %v771_v20   ;;  %1857 = vmatprep.subr.bf16.mxu1 %v5724_v3  ;;  %v5477_v9 = vld [vmem:[%s5857_s26 + $0x50] sm:$0xff]   ;;  %v5478_v12 = vld [vmem:[%s5857_s26 + $0x58] sm:$0xff]   ;;  %v5503_v17 = vld [vmem:[%s7723_s4 + $0x48] sm:$0xff]  }
  0x2c   : > { %996 = vperm.xlu1 %5458, %v772_v21   ;;  %v5500_v13 = vld [vmem:[%s7723_s4 + $0x58] sm:$0xff]   ;;  %v5501_v14 = vld [vmem:[%s7723_s4 + $0x50] sm:$0xff]   ;;  %v5506_v20 = vld [vmem:[%s7723_s4 + $0x228] sm:$0xff]  }
  0x2d   : > { %5260 = vmatpush3.bf16.msra.mxu0 %v5465_v16  ;;  %v5502_v15 = vld [vmem:[%s7723_s4 + $0x238] sm:$0xff]   ;;  %v5479_v16 = vld [vmem:[%s5857_s26 + $0x60] sm:$0xff]   ;;  %v5504_v18 = vld [vmem:[%s7723_s4 + $0x230] sm:$0xff]  }
  0x2e   : > { %5261 = vmatprep.subr.bf16.mxu0 %v5722_v1  ;;  %1858 = vmatpush1.bf16.msra.mxu1 %v5491_v55  ;;  %v5480_v21 = vld [vmem:[%s5857_s26 + $0x68] sm:$0xff]  }
  0x2f   : > { %1001 = vperm.xlu0 %5457, %v773_v23   ;;  %1859 = vmatprep.subr.bf16.mxu1 %v5724_v3  ;;  %v5510_v23 = vld [vmem:[%s7723_s4 + $0x218] sm:$0xff]  }
  0x30   : > { %1006 = vperm.xlu1 %5458, %v774_v24   ;;  %v5481_v24 = vld [vmem:[%s5857_s26 + $0x70] sm:$0xff]  }
  0x31   : > { %5262 = vmatpush3.bf16.msra.mxu0 %v5466_v19  ;;  %v5505_v19 = vld [vmem:[%s7723_s4 + $0x40] sm:$0xff]  }
  0x32   : > { %1860 = vmatpush1.bf16.msra.mxu1 %v5492_v59  ;;  %5347 = vmatprep.subr.bf16.mxu0 %v5502_v15 }
  0x33   : > { %1011 = vperm.xlu0 %5457, %v775_v25   ;;  %1861 = vmatprep.subr.bf16.mxu1 %v5724_v3  ;;  %v5512_v25 = vld [vmem:[%s7723_s4 + $0x210] sm:$0xff]  }
  0x34   : > { %5264 = vmatmul.mubr.bf16.vlgmr.msra.gmra.mxu0 %v5467_v22  ;;  %1016 = vperm.xlu1 %5458, %v776_v26   ;;  %v5509_v22 = vld [vmem:[%s7723_s4 + $0x220] sm:$0xff]   ;;  %v5513_v26 = vld [vmem:[%s7723_s4 + $0x208] sm:$0xff]  }
  0x35   : > { %5267 = vmatprep.mubr.msk.bf16.mxu0 %vm5723_vm0, %v5722_v1  ;;  %5348 = vmatpush3.bf16.msra.mxu0 %v5502_v15 }
  0x36   : > { %1862 = vmatpush1.bf16.msra.mxu1 %v5493_v62  ;;  %5349 = vmatprep.subr.bf16.mxu0 %v5504_v18 }
  0x37   : > { %1021 = vperm.xlu0 %5457, %v777_v28   ;;  %1863 = vmatprep.subr.bf16.mxu1 %v5724_v3  ;;  %v5516_v28 = vld [vmem:[%s7723_s4 + $0x200] sm:$0xff]  }
  0x38   : > { %1026 = vperm.xlu1 %5458, %v778_v29   ;;  %v5483_v29 = vld [vmem:[%s5857_s26 + $0x80] sm:$0xff]  }
  0x39   : > { %5350 = vmatpush3.bf16.msra.mxu0 %v5504_v18 }
  0x3a   : > { %1864 = vmatpush1.bf16.msra.mxu1 %v5494_v2  ;;  %5351 = vmatprep.subr.bf16.mxu0 %v5506_v20 }
  0x3b   : > { %1031 = vperm.xlu0 %5457, %v779_v30   ;;  %1865 = vmatprep.subr.bf16.mxu1 %v5724_v3  ;;  %v5484_v30 = vld [vmem:[%s5857_s26 + $0x88] sm:$0xff]  }
  0x3c   : > { %5268 = vmatmul.mubr.bf16.gmra.mxu0 %v5468_v27  ;;  %1036 = vperm.xlu1 %5458, %v780_v31   ;;  %v5482_v27 = vld [vmem:[%s5857_s26 + $0x78] sm:$0xff]   ;;  %v5485_v31 = vld [vmem:[%s5857_s26 + $0x90] sm:$0xff]  }
  0x3d   : > { %5271 = vmatprep.mubr.msk.bf16.mxu0 %vm5723_vm0, %v5722_v1  ;;  %5352 = vmatpush3.bf16.msra.mxu0 %v5506_v20 }
  0x3e   : > { %1866 = vmatpush1.bf16.msra.mxu1 %v5495_v5  ;;  %5353 = vmatprep.subr.bf16.mxu0 %v5509_v22 }
  0x3f   : > { %1041 = vperm.xlu0 %5457, %v781_v33   ;;  %1867 = vmatprep.subr.bf16.mxu1 %v5724_v3  ;;  %v5487_v33 = vld [vmem:[%s5857_s26 + $0xa0] ss:$0 sps:$4 sm:$0x33]  }
  0x40   : > { %1046 = vperm.xlu1 %5458, %v782_v34   ;;  %v6146_v34 = vld [vmem:[%s7721_s2] ss:$0 sm:$0xff] }
  0x41   : > { %5354 = vmatpush3.bf16.msra.mxu0 %v5509_v22 }
  0x42   : > { %1868 = vmatpush2.bf16.msra.mxu1 %v5496_v7  ;;  %5355 = vmatprep.subr.bf16.mxu0 %v5510_v23 }
  0x43   : > { %1051 = vperm.xlu0 %5457, %v783_v35   ;;  %1869 = vmatprep.subr.bf16.mxu1 %v5724_v3 }
  0x44   : > { %5272 = vmatmul.mubr.bf16.gmra.mxu0 %v5469_v32  ;;  %1056 = vperm.xlu1 %5458, %v784_v36   ;;  %v5486_v32 = vld [vmem:[%s5857_s26 + $0x98] sm:$0xff]   ;;  %v6151_v36 = vld [vmem:[%s7722_s3] ss:$0 sm:$0xff]  ;;  %s4686_s26 = sshll.u32 %s325_s16, 4  ;;  %s7675_s26 = int_to_ptr.vmem [resolvable:$true] %s4686_s26 }
  0x45   : > { %5275 = vmatprep.mubr.msk.bf16.mxu0 %vm5723_vm0, %v5722_v1  ;;  %5356 = vmatpush3.bf16.msra.mxu0 %v5510_v23  ;;  %s5660_s23 = scalar_lea.vmem %s7675_s26, 1024  ;;  %p5667_p0 = scmp.lt.s32.totalorder %s7675_s26, %s5665_s27 }
  0x46   : > { %1870 = vmatpush2.bf16.msra.mxu1 %v5497_v8  ;;  %5357 = vmatprep.subr.bf16.mxu0 %v5512_v25  ;;  %p5661_p11 = scmp.ne.s32.totalorder %s7675_s26, %s5660_s23  ;;  %p5668_p1 = scmp.lt.s32.totalorder %s5666_s25, %s5660_s23 }
  0x47   : > { %1061 = vperm.xlu0 %5457, %v785_v38   ;;  %1871 = vmatprep.subr.bf16.mxu1 %v5724_v3 }
  0x48   : > { %1066 = vperm.xlu1 %5458, %v786_v39   ;;  %p5662_p12 = pnand %p5661_p11, %p5816_p5  ;;  %p5669_p2 = por %p5668_p1, %p5667_p0 }
  0x49   : > { %5358 = vmatpush3.bf16.msra.mxu0 %v5512_v25 }
  0x4a   : > { %1872 = vmatpush2.bf16.msra.mxu1 %v5498_v10  ;;  %5359 = vmatprep.subr.bf16.mxu0 %v5513_v26  ;;  %p5663_p13 = pneg %p5662_p12 }
  0x4b   : > { %1071 = vperm.xlu0 %5457, %v787_v40   ;;  %1873 = vmatprep.subr.bf16.mxu1 %v5724_v3 }
  0x4c   : > { %5276 = vmatmul.mubr.bf16.gmra.mxu0 %v5470_v37  ;;  %1076 = vperm.xlu1 %5458, %v788_v41   ;;  %p5670_p3 = pnand %p5669_p2, %p5663_p13 }
  0x4d   : > { %5279 = vmatprep.mubr.msk.bf16.mxu0 %vm5723_vm0, %v5722_v1  ;;  %5360 = vmatpush3.bf16.msra.mxu0 %v5513_v26 }
  0x4e   : > { %1874 = vmatpush2.bf16.msra.mxu1 %v5499_v11  ;;  %5361 = vmatprep.subr.bf16.mxu0 %v5516_v28 }
  0x4f   : > { %1081 = vperm.xlu0 %5457, %v789_v43   ;;  %1875 = vmatprep.subr.bf16.mxu1 %v5724_v3 }
  0x50   : > { %1086 = vperm.xlu1 %5458, %v790_v44  }
  0x51   : > { %5362 = vmatpush3.bf16.msra.mxu0 %v5516_v28 }
  0x52   : > { %1876 = vmatpush2.bf16.msra.mxu1 %v5500_v13  ;;  %3596 = vmatprep.subr.bf16.mxu0 %v5724_v3 }
  0x53   : > { %1091 = vperm.xlu0 %5457, %v791_v46   ;;  %1877 = vmatprep.subr.bf16.mxu1 %v5724_v3 }
  0x54   : > { %5280 = vmatmul.mubr.bf16.gmra.mxu0 %v5471_v42  ;;  %1096 = vperm.xlu1 %5458, %v792_v47  }
  0x55   : > { %5283 = vmatprep.mubr.msk.bf16.mxu0 %vm5723_vm0, %v5722_v1 }
  0x56   : > { %1878 = vmatpush2.bf16.msra.mxu1 %v5501_v14 }
  0x57   : > { %1101 = vperm.xlu0 %5457, %v793_v50   ;;  %1879 = vmatprep.subr.bf16.mxu1 %v5724_v3 }
  0x58   : > { %1106 = vperm.xlu1 %5458, %v794_v51  }
  0x5a   : > { %1880 = vmatpush2.bf16.msra.mxu1 %v5503_v17 }
  0x5b   : > { %1111 = vperm.xlu0 %5457, %v795_v53   ;;  %1881 = vmatprep.subr.bf16.mxu1 %v5724_v3 }
  0x5c   : > { %5284 = vmatmul.mubr.bf16.gmra.mxu0 %v5472_v49  ;;  %1116 = vperm.xlu1 %5458, %v796_v54  }
  0x5d   : > { %5287 = vmatprep.mubr.msk.bf16.mxu0 %vm5723_vm0, %v5722_v1 }
  0x5e   : > { %1882 = vmatpush2.bf16.msra.mxu1 %v5505_v19 }
  0x5f   : > { %1121 = vperm.xlu0 %5457, %v797_v57   ;;  %2690 = vmatprep.subr.bf16.mxu1 %v5724_v3 }
  0x60   : > { %1126 = vperm.xlu1 %5458, %v798_v58  }
  0x63   : > { %1131 = vperm.xlu0 %5457, %v799_v60  }
  0x64   : > { %5288 = vmatmul.mubr.bf16.gmra.mxu0 %v5473_v56  ;;  %1136 = vperm.xlu1 %5458, %v800_v61  }
  0x65   : > { %5291 = vmatprep.mubr.msk.bf16.mxu0 %vm5723_vm0, %v5722_v1 }
  0x67   : > { %1141 = vperm.xlu0 %5457, %v801_v0  }
  0x6c   : > { %5292 = vmatmul.mubr.bf16.gmra.mxu0 %v5474_v63 }
  0x6d   : > { %5295 = vmatprep.mubr.msk.bf16.mxu0 %vm5723_vm0, %v5722_v1 }
  0x74   : > { %5296 = vmatmul.mubr.bf16.gmra.mxu0 %v5475_v4 }
  0x75   : > { %5299 = vmatprep.mubr.msk.bf16.mxu0 %vm5723_vm0, %v5722_v1 }
  0x7c   : > { %5300 = vmatmul.mubr.bf16.gmra.mxu0 %v5476_v6 }
  0x7d   : > { %5303 = vmatprep.mubr.msk.bf16.mxu0 %vm5723_vm0, %v5722_v1 }
  0x84   : > { %5304 = vmatmul.mubr.bf16.gmra.mxu0 %v5477_v9 }
  0x85   : > { %5307 = vmatprep.mubr.msk.bf16.mxu0 %vm5723_vm0, %v5722_v1 }
  0x8c   : > { %5308 = vmatmul.mubr.bf16.gmra.mxu0 %v5478_v12 }
  0x8d   : > { %5311 = vmatprep.mubr.msk.bf16.mxu0 %vm5723_vm0, %v5722_v1 }
  0x92   : > { %v942_v40 = vpop.permute.xlu0 %941 }
  0x93   : > { %v952_v53 = vpop.permute.xlu1 %951 }
  0x94   : > { %5312 = vmatmul.mubr.bf16.gmra.mxu0 %v5479_v16 }
  0x95   : > { %5315 = vmatprep.mubr.msk.bf16.mxu0 %vm5723_vm0, %v5722_v1 }
  0x96   : > { %v947_v48 = vpop.permute.xlu0 %946 }
  0x97   : > { %v957_v63 = vpop.permute.xlu1 %956 }
  0x9a   : > { %v962_v16 = vpop.permute.xlu0 %961 }
  0x9b   : > { %v967_v19 = vpop.permute.xlu1 %966 }
  0x9c   : > { %5316 = vmatmul.mubr.bf16.gmra.mxu0 %v5480_v21 }
  0x9d   : > { %5319 = vmatprep.mubr.msk.bf16.mxu0 %vm5723_vm0, %v5722_v1 }
  0xa4   : > { %5320 = vmatmul.mubr.bf16.gmra.mxu0 %v5481_v24 }
  0xa5   : > { %5323 = vmatprep.mubr.msk.bf16.mxu0 %vm5723_vm0, %v5722_v1 }
  0xac   : > { %5324 = vmatmul.mubr.bf16.gmra.mxu0 %v5482_v27 }
  0xad   : > { %5327 = vmatprep.mubr.msk.bf16.mxu0 %vm5723_vm0, %v5722_v1 }
  0xb4   : > { %5328 = vmatmul.mubr.bf16.gmra.mxu0 %v5483_v29 }
  0xb5   : > { %5331 = vmatprep.mubr.msk.bf16.mxu0 %vm5723_vm0, %v5722_v1 }
  0xbc   : > { %5332 = vmatmul.mubr.bf16.gmra.mxu0 %v5484_v30 }
  0xbd   : > { %5335 = vmatprep.mubr.msk.bf16.mxu0 %vm5723_vm0, %v5722_v1 }
  0xc4   : > { %5336 = vmatmul.mubr.bf16.gmra.mxu0 %v5485_v31 }
  0xc5   : > { %5339 = vmatprep.mubr.msk.bf16.mxu0 %vm5723_vm0, %v5722_v1 }
  0xcc   : > { %5340 = vmatmul.mubr.bf16.gmra.mxu0 %v5486_v32 }
  0xcd   : > { %5343 = vmatprep.mubr.msk.bf16.mxu0 %vm5723_vm0, %v5722_v1 }
  0xd4   : > { %5344 = vmatmul.mubr.bf16.gmra.mxu0 %v5487_v33 }
  0xf4   : > { %v595_v35 = vpop.f32.mrf.mxu0 }
  0xf5   : > { %v809_v37 = vmul.f32 %v6146_v34, %v595_v35 }
  0xf6   : > { %v5265_v38 = vpop.f32.mrf.mxu0 }
  0xf7   : > { %v857_v39 = vadd.f32 %v6151_v36, %v809_v37 }
  0xf8   : > { %v598_v1 = vpop.f32.mrf.mxu0 }
  0xf9   : > { %v810_v41 = vmul.f32 %v6146_v34, %v598_v1  ;;  %v898_v43 = vmax.f32 %v857_v39, 0.0 }
  0xfa   : > { %v5266_v42 = vpop.f32.mrf.mxu0 }
  0xfb   : > { %v858_v44 = vadd.f32 %v6151_v36, %v810_v41  ;;  %v1144_v50 = vmul.f32 %v942_v40, %v898_v43  ;;  %v972_v40 = vpop.permute.xlu0 %971 }
  0xfc   : > { %v603_v45 = vpop.f32.mrf.mxu0 }
  0xfd   : > { %v899_v46 = vmax.f32 %v858_v44, 0.0  ;;  %v811_v47 = vmul.f32 %v6146_v34, %v603_v45  ;;  %v977_v44 = vpop.permute.xlu1 %976 }
  0xfe   : > { %v5269_v49 = vpop.f32.mrf.mxu0 }
  0xff   : > { %v1145_v51 = vmul.f32 %v947_v48, %v899_v46  ;;  %v859_v52 = vadd.f32 %v6151_v36, %v811_v47 }
 0x100   : > { %v606_v54 = vpop.f32.mrf.mxu0 }
 0x101   : > { %v5030_v55 = vpack.c.bf16 %v1145_v51, %v1144_v50  ;;  %v812_v56 = vmul.f32 %v6146_v34, %v606_v54  ;;  %v900_v58 = vmax.f32 %v859_v52, 0.0  ;;  %v5525_v51 = vld [vmem:[%s7723_s4 + $0xb8] sm:$0xff]  }
 0x102   : > { %v5270_v57 = vpop.f32.mrf.mxu0 }
 0x103   : > { %5031 = vst [vmem:[#allocation2] sm:$0xff] %v5030_v55   ;;  %v860_v59 = vadd.f32 %v6151_v36, %v812_v56  ;;  %v1146_v2 = vmul.f32 %v952_v53, %v900_v58 }
 0x104   : > { %v611_v60 = vpop.f32.mrf.mxu0 }
 0x105   : > { %v901_v61 = vmax.f32 %v860_v59, 0.0  ;;  %v813_v62 = vmul.f32 %v6146_v34, %v611_v60 }
 0x106   : > { %v5273_v0 = vpop.f32.mrf.mxu0 }
 0x107   : > { %v1147_v4 = vmul.f32 %v957_v63, %v901_v61  ;;  %v861_v5 = vadd.f32 %v6151_v36, %v813_v62  ;;  %v5527_v63 = vld [vmem:[%s7723_s4 + $0xb0] sm:$0xff]  }
 0x108   : > { %v614_v6 = vpop.f32.mrf.mxu0 }
 0x109   : > { %v5035_v7 = vpack.c.bf16 %v1147_v4, %v1146_v2  ;;  %v814_v8 = vmul.f32 %v6146_v34, %v614_v6  ;;  %v902_v12 = vmax.f32 %v861_v5, 0.0  ;;  %v982_v4 = vpop.permute.xlu0 %981 }
 0x10a   : > { %v5274_v9 = vpop.f32.mrf.mxu0  ;;  %v1444_v10 = vld [vmem:[#allocation2] sm:$0xf]  ;;  %v1445_v11 = vld [vmem:[#allocation2 + $0x4] sm:$0xf] }
 0x10b   : > { %5127 = vst [vmem:[#allocation2 + $0x8] sm:$0xff] %v5035_v7   ;;  %v862_v13 = vadd.f32 %v6151_v36, %v814_v8  ;;  %v4826_v14 = vcombine.low %v1444_v10, %v1445_v11  ;;  %v2325_v22 = vld [vmem:[#allocation2] sm:$0xe]  ;;  %v1148_v23 = vmul.f32 %v962_v16, %v902_v12  ;;  %v987_v9 = vpop.permute.xlu1 %986 }
 0x10c   : > { %v619_v15 = vpop.f32.mrf.mxu0  ;;  %v4873_v29 = vcombine.low %v2325_v22, %v1445_v11 }
 0x10d   : > { %v903_v17 = vmax.f32 %v862_v13, 0.0  ;;  %v815_v18 = vmul.f32 %v6146_v34, %v619_v15  ;;  %v1565_v21 = vshll.u32 %v4826_v14, 16  ;;  %v1563_v38 = vshrl.u32 %v4826_v14, 16 }
 0x10e   : > { %v5277_v20 = vpop.f32.mrf.mxu0  ;;  %v2488_v42 = vrot.slane %v4873_v29, 1 }
 0x10f   : > { %v1149_v24 = vmul.f32 %v967_v19, %v903_v17  ;;  %v863_v25 = vadd.f32 %v6151_v36, %v815_v18  ;;  %v1567_v32 = vrot.slane %v1565_v21, 1  ;;  %v5528_v19 = vld [vmem:[%s7723_s4 + $0xa8] sm:$0xff]  }
 0x110   : > { %v622_v26 = vpop.f32.mrf.mxu0 }
 0x111   : > { %v5040_v27 = vpack.c.bf16 %v1149_v24, %v1148_v23  ;;  %v816_v28 = vmul.f32 %v6146_v34, %v622_v26  ;;  %v904_v33 = vmax.f32 %v863_v25, 0.0  ;;  %v1568_v46 = vor.u32 %v1567_v32, %v1563_v38 }
 0x112   : > { %v5278_v30 = vpop.f32.mrf.mxu0  ;;  %v6168_v31 = vld [vmem:[#allocation2 + $0x8] sm:$0xff]  }
 0x113   : > { %5128 = vst [vmem:[#allocation2 + $0x10] sm:$0xff] %v5040_v27   ;;  %v864_v35 = vadd.f32 %v6151_v36, %v816_v28  ;;  %v1570_v39 = vshll.u32 %v6168_v31, 16  ;;  %v2489_v43 = vrot.slane %v6168_v31, 1  ;;  %v1150_v48 = vmul.f32 %v972_v40, %v904_v33 }
 0x114   : > { %v627_v37 = vpop.f32.mrf.mxu0  ;;  %v1574_v2 = vshrl.u32 %v6168_v31, 16 }
 0x115   : > { %v905_v1 = vmax.f32 %v864_v35, 0.0  ;;  %v817_v41 = vmul.f32 %v6146_v34, %v627_v37  ;;  %v1572_v47 = vrot.slane %v1570_v39, 1  ;;  %v6179_v52 = vsel %vm2487_vm2, %v2488_v42, %v2489_v43  ;;  %v5531_v35 = vld [vmem:[%s7723_s4 + $0xa0] sm:$0xff]   ;;  %v992_v37 = vpop.permute.xlu0 %991 }
 0x116   : > { %v5281_v45 = vpop.f32.mrf.mxu0 }
 0x117   : > { %v1151_v49 = vmul.f32 %v977_v44, %v905_v1  ;;  %v865_v50 = vadd.f32 %v6151_v36, %v817_v41  ;;  %v1573_v54 = vsel %vm1561_vm1, %v1568_v46, %v1572_v47  ;;  %v1576_v11 = vor.u32 %v1574_v2, %v1572_v47 }
 0x118   : > { %v630_v53 = vpop.f32.mrf.mxu0  ;;  %1883 = vmatprep.mubr.bf16.mxu1 %v1573_v54 }
 0x119   : > { %v5045_v55 = vpack.c.bf16 %v1151_v49, %v1150_v48  ;;  %v818_v56 = vmul.f32 %v6146_v34, %v630_v53  ;;  %1884 = vmatmul.mubr.bf16.vlgmr.msra.gmra.mxu1 %v4826_v14  ;;  %v906_v60 = vmax.f32 %v865_v50, 0.0  ;;  %v5533_v48 = vld [vmem:[%s7723_s4 + $0x98] sm:$0xff]  }
 0x11a   : > { %v5282_v57 = vpop.f32.mrf.mxu0  ;;  %v1392_v58 = vld [vmem:[#allocation2 + $0x14] sm:$0xf]  ;;  %v1448_v59 = vld [vmem:[#allocation2 + $0x10] sm:$0xf]  ;;  %2691 = vmatpush1.bf16.msra.mxu1 %v5525_v51 }
 0x11b   : > { %5129 = vst [vmem:[#allocation2 + $0x18] sm:$0xff] %v5045_v55   ;;  %v866_v61 = vadd.f32 %v6151_v36, %v818_v56  ;;  %v6184_v62 = vcombine.low %v1448_v59, %v1392_v58  ;;  %2692 = vmatprep.subr.bf16.mxu1 %v5724_v3  ;;  %v1391_v8 = vld [vmem:[#allocation2 + $0x10] sm:$0x8]  ;;  %v1152_v13 = vmul.f32 %v982_v4, %v906_v60  ;;  %v5529_v60 = vld [vmem:[%s7723_s4 + $0x138] sm:$0xff]  }
 0x11c   : > { %v635_v0 = vpop.f32.mrf.mxu0  ;;  %v4861_v18 = vcombine.low %v1391_v8, %v1392_v58 }
 0x11d   : > { %v907_v5 = vmax.f32 %v866_v61, 0.0  ;;  %v819_v6 = vmul.f32 %v6146_v34, %v635_v0  ;;  %v1578_v7 = vshll.u32 %v6184_v62, 16  ;;  %v2494_v12 = vrot.slane %v6184_v62, 1  ;;  %v5536_v61 = vld [vmem:[%s7723_s4 + $0x90] sm:$0xff]  }
 0x11e   : > { %v5285_v10 = vpop.f32.mrf.mxu0  ;;  %2693 = vmatpush1.bf16.msra.mxu1 %v5527_v63  ;;  %v2045_v29 = vrot.slane %v4861_v18, 3  ;;  %v1582_v32 = vshrl.u32 %v6184_v62, 16  ;;  %v1002_v63 = vpop.permute.xlu0 %1001 }
 0x11f   : > { %v1153_v14 = vmul.f32 %v987_v9, %v907_v5  ;;  %v867_v15 = vadd.f32 %v6151_v36, %v819_v6  ;;  %v1580_v16 = vrot.slane %v1578_v7, 1  ;;  %2694 = vmatprep.subr.bf16.mxu1 %v5724_v3  ;;  %v6202_v20 = vsel %vm2487_vm2, %v2489_v43, %v2494_v12 }
 0x120   : > { %v638_v17 = vpop.f32.mrf.mxu0 }
 0x121   : > { %v5050_v21 = vpack.c.bf16 %v1153_v14, %v1152_v13  ;;  %v820_v22 = vmul.f32 %v6146_v34, %v638_v17  ;;  %v1581_v23 = vsel %vm1561_vm1, %v1576_v11, %v1580_v16  ;;  %v908_v26 = vmax.f32 %v867_v15, 0.0  ;;  %v5532_v15 = vld [vmem:[%s7723_s4 + $0x130] sm:$0xff]  }
 0x122   : > { %v5286_v24 = vpop.f32.mrf.mxu0  ;;  %1891 = vmatprep.mubr.bf16.mxu1 %v1581_v23  ;;  %v6206_v25 = vld [vmem:[#allocation2 + $0x18] sm:$0xff]   ;;  %2695 = vmatpush1.bf16.msra.mxu1 %v5528_v19  ;;  %v1584_v41 = vor.u32 %v1582_v32, %v1580_v16  ;;  %v5538_v16 = vld [vmem:[%s7723_s4 + $0x88] sm:$0xff]   ;;  %v1012_v32 = vpop.permute.xlu0 %1011 }
 0x123   : > { %5130 = vst [vmem:[#allocation2 + $0x20] sm:$0xff] %v5050_v21   ;;  %v868_v27 = vadd.f32 %v6151_v36, %v820_v22  ;;  %1892 = vmatmul.mubr.bf16.gmra.mxu1 %v6168_v31  ;;  %v2046_v30 = vrot.slane %v6206_v25, 3  ;;  %v1586_v33 = vshll.u32 %v6206_v25, 16  ;;  %2696 = vmatprep.subr.bf16.mxu1 %v5724_v3  ;;  %v997_v31 = vpop.permute.xlu1 %996  ;;  %v1154_v43 = vmul.f32 %v992_v37, %v908_v26  ;;  %v5534_v24 = vld [vmem:[%s7723_s4 + $0x128] sm:$0xff]  }
 0x124   : > { %v643_v28 = vpop.f32.mrf.mxu0  ;;  %v1590_v58 = vshrl.u32 %v6206_v25, 16 }
 0x125   : > { %v909_v38 = vmax.f32 %v868_v27, 0.0  ;;  %v821_v39 = vmul.f32 %v6146_v34, %v643_v28  ;;  %v2047_v1 = vsel %vm2044_vm3, %v2045_v29, %v2046_v30  ;;  %v6219_v42 = vrot.slane %v1586_v33, 1 }
 0x126   : > { %v5289_v40 = vpop.f32.mrf.mxu0  ;;  %5363 = vmatprep.mubr.bf16.mxu0 %v2047_v1  ;;  %2697 = vmatpush1.bf16.msra.mxu1 %v5531_v35 }
 0x127   : > { %v1155_v44 = vmul.f32 %v997_v31, %v909_v38  ;;  %v869_v45 = vadd.f32 %v6151_v36, %v821_v39  ;;  %v1589_v47 = vsel %vm1561_vm1, %v1584_v41, %v6219_v42  ;;  %2698 = vmatprep.subr.bf16.mxu1 %v5724_v3  ;;  %v1007_v4 = vpop.permute.xlu1 %1006  ;;  %v1592_v7 = vor.u32 %v1590_v58, %v6219_v42 }
 0x128   : > { %v646_v46 = vpop.f32.mrf.mxu0  ;;  %1899 = vmatprep.mubr.bf16.mxu1 %v1589_v47 }
 0x129   : > { %v5055_v49 = vpack.c.bf16 %v1155_v44, %v1154_v43  ;;  %v822_v50 = vmul.f32 %v6146_v34, %v646_v46  ;;  %v910_v54 = vmax.f32 %v869_v45, 0.0  ;;  %v5537_v45 = vld [vmem:[%s7723_s4 + $0x120] sm:$0xff]   ;;  %v5543_v46 = vld [vmem:[%s7723_s4 + $0xf8] sm:$0xff]  }
 0x12a   : > { %v5290_v51 = vpop.f32.mrf.mxu0  ;;  %v6229_v53 = vld [vmem:[#allocation2 + $0x20] sm:$0xff]   ;;  %2699 = vmatpush1.bf16.msra.mxu1 %v5533_v48 }
 0x12b   : > { %5131 = vst [vmem:[#allocation2 + $0x28] sm:$0xff] %v5055_v49   ;;  %v870_v55 = vadd.f32 %v6151_v36, %v822_v50  ;;  %1900 = vmatmul.mubr.bf16.gmra.mxu1 %v6184_v62  ;;  %v2048_v57 = vrot.slane %v6229_v53, 3  ;;  %v1594_v59 = vshll.u32 %v6229_v53, 16  ;;  %2700 = vmatprep.subr.bf16.mxu1 %v5724_v3  ;;  %v1156_v9 = vmul.f32 %v1002_v63, %v910_v54  ;;  %v1017_v35 = vpop.permute.xlu1 %1016 }
 0x12c   : > { %v651_v56 = vpop.f32.mrf.mxu0  ;;  %v1598_v28 = vshrl.u32 %v6229_v53, 16 }
 0x12d   : > { %v911_v0 = vmax.f32 %v870_v55, 0.0  ;;  %v823_v2 = vmul.f32 %v6146_v34, %v651_v56  ;;  %v2049_v6 = vsel %vm2044_vm3, %v2046_v30, %v2048_v57  ;;  %v1596_v8 = vrot.slane %v1594_v59, 1  ;;  %v5541_v30 = vld [vmem:[%s7723_s4 + $0x80] sm:$0xff]   ;;  %v5539_v59 = vld [vmem:[%s7723_s4 + $0x118] sm:$0xff]  }
 0x12e   : > { %v5293_v5 = vpop.f32.mrf.mxu0  ;;  %5364 = vmatmul.mubr.bf16.vlgmr.msra.gmra.mxu0 %v2049_v6  ;;  %2701 = vmatpush1.bf16.msra.mxu1 %v5536_v61  ;;  %v1022_v61 = vpop.permute.xlu0 %1021 }
 0x12f   : > { %v1157_v10 = vmul.f32 %v1007_v4, %v911_v0  ;;  %v871_v11 = vadd.f32 %v6151_v36, %v823_v2  ;;  %v6248_v14 = vsel %vm1561_vm1, %v1592_v7, %v1596_v8  ;;  %3597 = vmatpush1.bf16.msra.mxu0 %v5529_v60  ;;  %2702 = vmatprep.subr.bf16.mxu1 %v5724_v3  ;;  %v5546_v60 = vld [vmem:[%s7723_s4 + $0xf0] sm:$0xff]   ;;  %v1027_v0 = vpop.permute.xlu1 %1026 }
 0x130   : > { %v654_v13 = vpop.f32.mrf.mxu0  ;;  %1907 = vmatprep.mubr.bf16.mxu1 %v6248_v14  ;;  %3598 = vmatprep.subr.bf16.mxu0 %v5724_v3  ;;  %v1600_v39 = vor.u32 %v1598_v28, %v1596_v8 }
 0x131   : > { %v5060_v17 = vpack.c.bf16 %v1157_v10, %v1156_v9  ;;  %v824_v18 = vmul.f32 %v6146_v34, %v654_v13  ;;  %v912_v22 = vmax.f32 %v871_v11, 0.0  ;;  %v5542_v13 = vld [vmem:[%s7723_s4 + $0x110] sm:$0xff]  }
 0x132   : > { %v5294_v19 = vpop.f32.mrf.mxu0  ;;  %v6259_v21 = vld [vmem:[#allocation2 + $0x28] sm:$0xff]   ;;  %2703 = vmatpush1.bf16.msra.mxu1 %v5538_v16 }
 0x133   : > { %5132 = vst [vmem:[#allocation2 + $0x30] sm:$0xff] %v5060_v17   ;;  %v872_v23 = vadd.f32 %v6151_v36, %v824_v18  ;;  %1908 = vmatmul.mubr.bf16.gmra.mxu1 %v6206_v25  ;;  %v2050_v27 = vrot.slane %v6259_v21, 3  ;;  %v1602_v29 = vshll.u32 %v6259_v21, 16  ;;  %3599 = vmatpush1.bf16.msra.mxu0 %v5532_v15  ;;  %v1158_v40 = vmul.f32 %v1012_v32, %v912_v22  ;;  %v5548_v15 = vld [vmem:[%s7723_s4 + $0xe8] sm:$0xff]   ;;  %v1032_v32 = vpop.permute.xlu0 %1031 }
 0x134   : > { %v659_v26 = vpop.f32.mrf.mxu0  ;;  %3600 = vmatprep.subr.bf16.mxu0 %v5724_v3  ;;  %2704 = vmatprep.subr.bf16.mxu1 %v5724_v3 }
 0x135   : > { %v913_v33 = vmax.f32 %v872_v23, 0.0  ;;  %v825_v25 = vmul.f32 %v6146_v34, %v659_v26  ;;  %v2051_v38 = vsel %vm2044_vm3, %v2048_v57, %v2050_v27  ;;  %v1604_v31 = vrot.slane %v1602_v29, 1 }
 0x136   : > { %v5297_v37 = vpop.f32.mrf.mxu0  ;;  %5367 = vmatprep.mubr.bf16.mxu0 %v2051_v38  ;;  %2705 = vmatpush1.bf16.msra.mxu1 %v5541_v30  ;;  %v1606_v57 = vshrl.u32 %v6259_v21, 16  ;;  %v5551_v30 = vld [vmem:[%s7723_s4 + $0xe0] sm:$0xff]  }
 0x137   : > { %v1159_v1 = vmul.f32 %v1017_v35, %v913_v33  ;;  %v873_v41 = vadd.f32 %v6151_v36, %v825_v25  ;;  %v6279_v44 = vsel %vm1561_vm1, %v1600_v39, %v1604_v31  ;;  %3601 = vmatpush1.bf16.msra.mxu0 %v5534_v24  ;;  %2706 = vmatprep.subr.bf16.mxu1 %v5724_v3  ;;  %v5544_v24 = vld [vmem:[%s7723_s4 + $0x108] sm:$0xff]   ;;  %v1037_v25 = vpop.permute.xlu1 %1036 }
 0x138   : > { %v662_v43 = vpop.f32.mrf.mxu0  ;;  %1915 = vmatprep.mubr.bf16.mxu1 %v6279_v44  ;;  %3602 = vmatprep.subr.bf16.mxu0 %v5724_v3  ;;  %v1608_v5 = vor.u32 %v1606_v57, %v1604_v31 }
 0x139   : > { %v5065_v47 = vpack.c.bf16 %v1159_v1, %v1158_v40  ;;  %v826_v48 = vmul.f32 %v6146_v34, %v662_v43  ;;  %v914_v51 = vmax.f32 %v873_v41, 0.0 }
 0x13a   : > { %v5298_v49 = vpop.f32.mrf.mxu0  ;;  %v6290_v50 = vld [vmem:[#allocation2 + $0x30] sm:$0xff]   ;;  %2707 = vmatpush2.bf16.msra.mxu1 %v5543_v46  ;;  %v5553_v46 = vld [vmem:[%s7723_s4 + $0xd8] sm:$0xff]  }
 0x13b   : > { %5133 = vst [vmem:[#allocation2 + $0x38] sm:$0xff] %v5065_v47   ;;  %v874_v54 = vadd.f32 %v6151_v36, %v826_v48  ;;  %1916 = vmatmul.mubr.bf16.gmra.mxu1 %v6229_v53  ;;  %v2052_v56 = vrot.slane %v6290_v50, 3  ;;  %v1610_v58 = vshll.u32 %v6290_v50, 16  ;;  %3603 = vmatpush1.bf16.msra.mxu0 %v5537_v45  ;;  %v1160_v7 = vmul.f32 %v1022_v61, %v914_v51  ;;  %v5547_v45 = vld [vmem:[%s7723_s4 + $0x100] sm:$0xff]   ;;  %v5556_v61 = vld [vmem:[%s7723_s4 + $0xd0] sm:$0xff]  }
 0x13c   : > { %v667_v55 = vpop.f32.mrf.mxu0  ;;  %3604 = vmatprep.subr.bf16.mxu0 %v5724_v3  ;;  %2708 = vmatprep.subr.bf16.mxu1 %v5724_v3  ;;  %v1614_v28 = vshrl.u32 %v6290_v50, 16 }
 0x13d   : > { %v915_v63 = vmax.f32 %v874_v54, 0.0  ;;  %v827_v53 = vmul.f32 %v6146_v34, %v667_v55  ;;  %v2053_v4 = vsel %vm2044_vm3, %v2050_v27, %v2052_v56  ;;  %v1612_v6 = vrot.slane %v1610_v58, 1 }
 0x13e   : > { %v5301_v2 = vpop.f32.mrf.mxu0  ;;  %5368 = vmatmul.mubr.bf16.gmra.mxu0 %v2053_v4  ;;  %2709 = vmatpush2.bf16.msra.mxu1 %v5546_v60 }
 0x13f   : > { %v1161_v8 = vmul.f32 %v1027_v0, %v915_v63  ;;  %v875_v9 = vadd.f32 %v6151_v36, %v827_v53  ;;  %v6310_v11 = vsel %vm1561_vm1, %v1608_v5, %v1612_v6  ;;  %3605 = vmatpush1.bf16.msra.mxu0 %v5539_v59  ;;  %2710 = vmatprep.subr.bf16.mxu1 %v5724_v3  ;;  %v1042_v63 = vpop.permute.xlu0 %1041  ;;  %v1047_v0 = vpop.permute.xlu1 %1046 }
 0x140   : > { %v670_v10 = vpop.f32.mrf.mxu0  ;;  %1923 = vmatprep.mubr.bf16.mxu1 %v6310_v11  ;;  %3606 = vmatprep.subr.bf16.mxu0 %v5724_v3  ;;  %v1616_v38 = vor.u32 %v1614_v28, %v1612_v6 }
 0x141   : > { %v5070_v16 = vpack.c.bf16 %v1161_v8, %v1160_v7  ;;  %v828_v17 = vmul.f32 %v6146_v34, %v670_v10  ;;  %v916_v22 = vmax.f32 %v875_v9, 0.0 }
 0x142   : > { %v5302_v18 = vpop.f32.mrf.mxu0  ;;  %v6321_v19 = vld [vmem:[#allocation2 + $0x38] sm:$0xff]   ;;  %2711 = vmatpush2.bf16.msra.mxu1 %v5548_v15  ;;  %v5552_v15 = vld [vmem:[%s7723_s4 + $0x170] sm:$0xff]  }
 0x143   : > { %5134 = vst [vmem:[#allocation2 + $0x40] sm:$0xff] %v5070_v16   ;;  %v876_v23 = vadd.f32 %v6151_v36, %v828_v17  ;;  %1924 = vmatmul.mubr.bf16.gmra.mxu1 %v6259_v21  ;;  %v2054_v27 = vrot.slane %v6321_v19, 3  ;;  %v1618_v29 = vshll.u32 %v6321_v19, 16  ;;  %3607 = vmatpush1.bf16.msra.mxu0 %v5542_v13  ;;  %v1162_v31 = vmul.f32 %v1032_v32, %v916_v22  ;;  %v5559_v16 = vld [vmem:[%s7723_s4 + $0xc8] sm:$0xff]  }
 0x144   : > { %v675_v26 = vpop.f32.mrf.mxu0  ;;  %3608 = vmatprep.subr.bf16.mxu0 %v5724_v3  ;;  %2712 = vmatprep.subr.bf16.mxu1 %v5724_v3  ;;  %v1622_v59 = vshrl.u32 %v6321_v19, 16 }
 0x145   : > { %v917_v33 = vmax.f32 %v876_v23, 0.0  ;;  %v829_v21 = vmul.f32 %v6146_v34, %v675_v26  ;;  %v2055_v37 = vsel %vm2044_vm3, %v2052_v56, %v2054_v27  ;;  %v1620_v39 = vrot.slane %v1618_v29, 1  ;;  %v5549_v56 = vld [vmem:[%s7723_s4 + $0x178] sm:$0xff]  }
 0x146   : > { %v5305_v35 = vpop.f32.mrf.mxu0  ;;  %5371 = vmatprep.mubr.bf16.mxu0 %v2055_v37  ;;  %2713 = vmatpush2.bf16.msra.mxu1 %v5551_v30 }
 0x147   : > { %v1163_v40 = vmul.f32 %v1037_v25, %v917_v33  ;;  %v877_v1 = vadd.f32 %v6151_v36, %v829_v21  ;;  %v6341_v43 = vsel %vm1561_vm1, %v1616_v38, %v1620_v39  ;;  %3609 = vmatpush1.bf16.msra.mxu0 %v5544_v24  ;;  %2714 = vmatprep.subr.bf16.mxu1 %v5724_v3  ;;  %v5564_v33 = vld [vmem:[%s7723_s4 + $0xc0] sm:$0xff]   ;;  %v1052_v21 = vpop.permute.xlu0 %1051  ;;  %v1057_v35 = vpop.permute.xlu1 %1056 }
 0x148   : > { %v678_v41 = vpop.f32.mrf.mxu0  ;;  %1931 = vmatprep.mubr.bf16.mxu1 %v6341_v43  ;;  %3610 = vmatprep.subr.bf16.mxu0 %v5724_v3  ;;  %v1624_v5 = vor.u32 %v1622_v59, %v1620_v39 }
 0x149   : > { %v5075_v47 = vpack.c.bf16 %v1163_v40, %v1162_v31  ;;  %v830_v48 = vmul.f32 %v6146_v34, %v678_v41  ;;  %v918_v54 = vmax.f32 %v877_v1, 0.0 }
 0x14a   : > { %v5306_v49 = vpop.f32.mrf.mxu0  ;;  %v6352_v51 = vld [vmem:[#allocation2 + $0x40] sm:$0xff]   ;;  %2715 = vmatpush2.bf16.msra.mxu1 %v5553_v46 }
 0x14b   : > { %5135 = vst [vmem:[#allocation2 + $0x48] sm:$0xff] %v5075_v47   ;;  %v878_v55 = vadd.f32 %v6151_v36, %v830_v48  ;;  %1932 = vmatmul.mubr.bf16.gmra.mxu1 %v6290_v50  ;;  %v2056_v58 = vrot.slane %v6352_v51, 3  ;;  %v1626_v60 = vshll.u32 %v6352_v51, 16  ;;  %3611 = vmatpush1.bf16.msra.mxu0 %v5547_v45  ;;  %v1164_v7 = vmul.f32 %v1042_v63, %v918_v54  ;;  %v5557_v47 = vld [vmem:[%s7723_s4 + $0x160] sm:$0xff]   ;;  %v5562_v63 = vld [vmem:[%s7723_s4 + $0x158] sm:$0xff]  }
 0x14c   : > { %v683_v57 = vpop.f32.mrf.mxu0  ;;  %3612 = vmatprep.subr.bf16.mxu0 %v5724_v3  ;;  %2716 = vmatprep.subr.bf16.mxu1 %v5724_v3  ;;  %v1630_v30 = vshrl.u32 %v6352_v51, 16 }
 0x14d   : > { %v919_v53 = vmax.f32 %v878_v55, 0.0  ;;  %v831_v50 = vmul.f32 %v6146_v34, %v683_v57  ;;  %v2057_v4 = vsel %vm2044_vm3, %v2054_v27, %v2056_v58  ;;  %v1628_v6 = vrot.slane %v1626_v60, 1  ;;  %v5554_v27 = vld [vmem:[%s7723_s4 + $0x168] sm:$0xff]  }
 0x14e   : > { %v5309_v2 = vpop.f32.mrf.mxu0  ;;  %5372 = vmatmul.mubr.bf16.gmra.mxu0 %v2057_v4  ;;  %2717 = vmatpush2.bf16.msra.mxu1 %v5556_v61 }
 0x14f   : > { %v1165_v8 = vmul.f32 %v1047_v0, %v919_v53  ;;  %v879_v9 = vadd.f32 %v6151_v36, %v831_v50  ;;  %v6372_v13 = vsel %vm1561_vm1, %v1624_v5, %v1628_v6  ;;  %3613 = vmatpush2.bf16.msra.mxu0 %v5549_v56  ;;  %2718 = vmatprep.subr.bf16.mxu1 %v5724_v3  ;;  %v1062_v53 = vpop.permute.xlu0 %1061  ;;  %v1067_v2 = vpop.permute.xlu1 %1066 }
 0x150   : > { %v686_v10 = vpop.f32.mrf.mxu0  ;;  %1939 = vmatprep.mubr.bf16.mxu1 %v6372_v13  ;;  %3614 = vmatprep.subr.bf16.mxu0 %v5724_v3  ;;  %v1632_v39 = vor.u32 %v1630_v30, %v1628_v6 }
 0x151   : > { %v5080_v17 = vpack.c.bf16 %v1165_v8, %v1164_v7  ;;  %v832_v18 = vmul.f32 %v6146_v34, %v686_v10  ;;  %v920_v24 = vmax.f32 %v879_v9, 0.0 }
 0x152   : > { %v5310_v22 = vpop.f32.mrf.mxu0  ;;  %v6383_v23 = vld [vmem:[#allocation2 + $0x48] sm:$0xff]   ;;  %2719 = vmatpush2.bf16.msra.mxu1 %v5559_v16  ;;  %v5565_v16 = vld [vmem:[%s7723_s4 + $0x150] sm:$0xff]  }
 0x153   : > { %5136 = vst [vmem:[#allocation2 + $0x50] sm:$0xff] %v5080_v17   ;;  %v880_v26 = vadd.f32 %v6151_v36, %v832_v18  ;;  %1940 = vmatmul.mubr.bf16.gmra.mxu1 %v6321_v19  ;;  %v2058_v29 = vrot.slane %v6383_v23, 3  ;;  %v1634_v32 = vshll.u32 %v6383_v23, 16  ;;  %3615 = vmatpush2.bf16.msra.mxu0 %v5552_v15  ;;  %v1166_v40 = vmul.f32 %v1052_v21, %v920_v24  ;;  %v1072_v21 = vpop.permute.xlu0 %1071 }
 0x154   : > { %v691_v28 = vpop.f32.mrf.mxu0  ;;  %3616 = vmatprep.subr.bf16.mxu0 %v5724_v3  ;;  %2720 = vmatprep.subr.bf16.mxu1 %v5724_v3  ;;  %v1638_v60 = vshrl.u32 %v6383_v23, 16 }
 0x155   : > { %v921_v25 = vmax.f32 %v880_v26, 0.0  ;;  %v833_v19 = vmul.f32 %v6146_v34, %v691_v28  ;;  %v2059_v38 = vsel %vm2044_vm3, %v2056_v58, %v2058_v29  ;;  %v1636_v31 = vrot.slane %v1634_v32, 1 }
 0x156   : > { %v5313_v37 = vpop.f32.mrf.mxu0  ;;  %5375 = vmatprep.mubr.bf16.mxu0 %v2059_v38  ;;  %2721 = vmatpush2.bf16.msra.mxu1 %v5564_v33  ;;  %v5569_v33 = vld [vmem:[%s7723_s4 + $0x148] sm:$0xff]  }
 0x157   : > { %v1167_v1 = vmul.f32 %v1057_v35, %v921_v25  ;;  %v881_v41 = vadd.f32 %v6151_v36, %v833_v19  ;;  %v6403_v46 = vsel %vm1561_vm1, %v1632_v39, %v1636_v31  ;;  %3617 = vmatpush2.bf16.msra.mxu0 %v5554_v27  ;;  %4088 = vmatprep.subr.bf16.mxu1 %v5724_v3  ;;  %v1077_v35 = vpop.permute.xlu1 %1076 }
 0x158   : > { %v694_v45 = vpop.f32.mrf.mxu0  ;;  %1947 = vmatprep.mubr.bf16.mxu1 %v6403_v46  ;;  %3618 = vmatprep.subr.bf16.mxu0 %v5724_v3  ;;  %v1640_v5 = vor.u32 %v1638_v60, %v1636_v31 }
 0x159   : > { %v5085_v48 = vpack.c.bf16 %v1167_v1, %v1166_v40  ;;  %v834_v49 = vmul.f32 %v6146_v34, %v694_v45  ;;  %v922_v56 = vmax.f32 %v881_v41, 0.0 }
 0x15a   : > { %v5314_v54 = vpop.f32.mrf.mxu0  ;;  %v6411_v55 = vld [vmem:[#allocation2 + $0x50] sm:$0xff]  }
 0x15b   : > { %5137 = vst [vmem:[#allocation2 + $0x58] sm:$0xff] %v5085_v48   ;;  %v882_v57 = vadd.f32 %v6151_v36, %v834_v49  ;;  %1948 = vmatmul.mubr.bf16.gmra.mxu1 %v6352_v51  ;;  %v2060_v59 = vrot.slane %v6411_v55, 3  ;;  %v1642_v61 = vshll.u32 %v6411_v55, 16  ;;  %3619 = vmatpush2.bf16.msra.mxu0 %v5557_v47  ;;  %v1168_v7 = vmul.f32 %v1062_v53, %v922_v56  ;;  %v6458_v48 = vld [vmem:[%s7721_s2] ss:$0 sm:$0xff]  ;;  %v1082_v53 = vpop.permute.xlu0 %1081 }
 0x15c   : > { %v699_v58 = vpop.f32.mrf.mxu0  ;;  %3620 = vmatprep.subr.bf16.mxu0 %v5724_v3  ;;  %v1646_v30 = vshrl.u32 %v6411_v55, 16 }
 0x15d   : > { %v923_v50 = vmax.f32 %v882_v57, 0.0  ;;  %v835_v0 = vmul.f32 %v6146_v34, %v699_v58  ;;  %v2061_v4 = vsel %vm2044_vm3, %v2058_v29, %v2060_v59  ;;  %v1644_v6 = vrot.slane %v1642_v61, 1  ;;  %v6466_v57 = vld [vmem:[%s7722_s3] ss:$0 sm:$0xff] }
 0x15e   : > { %v5317_v51 = vpop.f32.mrf.mxu0  ;;  %5376 = vmatmul.mubr.bf16.gmra.mxu0 %v2061_v4 }
 0x15f   : > { %v1169_v8 = vmul.f32 %v1067_v2, %v923_v50  ;;  %v883_v9 = vadd.f32 %v6151_v36, %v835_v0  ;;  %v6427_v15 = vsel %vm1561_vm1, %v1640_v5, %v1644_v6  ;;  %3621 = vmatpush2.bf16.msra.mxu0 %v5562_v63  ;;  %v1648_v38 = vor.u32 %v1646_v30, %v1644_v6  ;;  %v1087_v2 = vpop.permute.xlu1 %1086 }
 0x160   : > { %v702_v10 = vpop.f32.mrf.mxu0  ;;  %1955 = vmatprep.mubr.bf16.mxu1 %v6427_v15  ;;  %3622 = vmatprep.subr.bf16.mxu0 %v5724_v3 }
 0x161   : > { %v5090_v17 = vpack.c.bf16 %v1169_v8, %v1168_v7  ;;  %v836_v18 = vmul.f32 %v6146_v34, %v702_v10  ;;  %v924_v26 = vmax.f32 %v883_v9, 0.0 }
 0x162   : > { %v5318_v22 = vpop.f32.mrf.mxu0  ;;  %v6435_v24 = vld [vmem:[#allocation2 + $0x58] sm:$0xff]  }
 0x163   : > { %5138 = vst [vmem:[#allocation2 + $0x60] sm:$0xff] %v5090_v17   ;;  %v884_v27 = vadd.f32 %v6151_v36, %v836_v18  ;;  %1956 = vmatmul.mubr.bf16.gmra.mxu1 %v6383_v23  ;;  %v2062_v29 = vrot.slane %v6435_v24, 3  ;;  %v1650_v32 = vshll.u32 %v6435_v24, 16  ;;  %3623 = vmatpush2.bf16.msra.mxu0 %v5565_v16  ;;  %v1170_v31 = vmul.f32 %v1072_v21, %v924_v26 }
 0x164   : > { %v707_v28 = vpop.f32.mrf.mxu0  ;;  %3624 = vmatprep.subr.bf16.mxu0 %v5724_v3  ;;  %v1654_v61 = vshrl.u32 %v6435_v24, 16 }
 0x165   : > { %v925_v25 = vmax.f32 %v884_v27, 0.0  ;;  %v837_v19 = vmul.f32 %v6146_v34, %v707_v28  ;;  %v2063_v37 = vsel %vm2044_vm3, %v2060_v59, %v2062_v29  ;;  %v1652_v39 = vrot.slane %v1650_v32, 1  ;;  %v5573_v34 = vld [vmem:[%s7723_s4 + $0x140] sm:$0xff]  }
 0x166   : > { %v5321_v23 = vpop.f32.mrf.mxu0  ;;  %5379 = vmatprep.mubr.bf16.mxu0 %v2063_v37 }
 0x167   : > { %v1171_v40 = vmul.f32 %v1077_v35, %v925_v25  ;;  %v885_v1 = vadd.f32 %v6151_v36, %v837_v19  ;;  %v6450_v45 = vsel %vm1561_vm1, %v1648_v38, %v1652_v39  ;;  %3625 = vmatpush2.bf16.msra.mxu0 %v5569_v33  ;;  %v1656_v5 = vor.u32 %v1654_v61, %v1652_v39  ;;  %v1092_v33 = vpop.permute.xlu0 %1091  ;;  %v1097_v19 = vpop.permute.xlu1 %1096 }
 0x168   : > { %v710_v41 = vpop.f32.mrf.mxu0  ;;  %1963 = vmatprep.mubr.bf16.mxu1 %v6450_v45  ;;  %3626 = vmatprep.subr.bf16.mxu0 %v5724_v3 }
 0x169   : > { %v5095_v47 = vpack.c.bf16 %v1171_v40, %v1170_v31  ;;  %v838_v49 = vmul.f32 %v6458_v48, %v710_v41  ;;  %v926_v56 = vmax.f32 %v885_v1, 0.0 }
 0x16a   : > { %v5322_v36 = vpop.f32.mrf.mxu0  ;;  %v5526_v54 = vld [vmem:[#allocation2 + $0x60] sm:$0xff]  }
 0x16b   : > { %5139 = vst [vmem:[#allocation2 + $0x68] sm:$0xff] %v5095_v47   ;;  %v886_v58 = vadd.f32 %v6466_v57, %v838_v49  ;;  %1964 = vmatmul.mubr.bf16.gmra.mxu1 %v6411_v55  ;;  %v2064_v60 = vrot.slane %v5526_v54, 3  ;;  %v1658_v63 = vshll.u32 %v5526_v54, 16  ;;  %3627 = vmatpush2.bf16.msra.mxu0 %v5573_v34  ;;  %v1172_v7 = vmul.f32 %v1082_v53, %v926_v56 }
 0x16c   : > { %v715_v59 = vpop.f32.mrf.mxu0  ;;  %v1662_v30 = vshrl.u32 %v5526_v54, 16 }
 0x16d   : > { %v927_v50 = vmax.f32 %v886_v58, 0.0  ;;  %v839_v0 = vmul.f32 %v6458_v48, %v715_v59  ;;  %v2065_v4 = vsel %vm2044_vm3, %v2062_v29, %v2064_v60  ;;  %v1660_v6 = vrot.slane %v1658_v63, 1  ;;  %v1102_v63 = vpop.permute.xlu0 %1101 }
 0x16e   : > { %v5325_v51 = vpop.f32.mrf.mxu0  ;;  %5380 = vmatmul.mubr.bf16.gmra.mxu0 %v2065_v4 }
 0x16f   : > { %v1173_v8 = vmul.f32 %v1087_v2, %v927_v50  ;;  %v887_v55 = vadd.f32 %v6466_v57, %v839_v0  ;;  %v6475_v10 = vsel %vm1561_vm1, %v1656_v5, %v1660_v6  ;;  %v1664_v37 = vor.u32 %v1662_v30, %v1660_v6  ;;  %v1107_v0 = vpop.permute.xlu1 %1106 }
 0x170   : > { %v718_v9 = vpop.f32.mrf.mxu0  ;;  %1971 = vmatprep.mubr.bf16.mxu1 %v6475_v10 }
 0x171   : > { %v5100_v16 = vpack.c.bf16 %v1173_v8, %v1172_v7  ;;  %v840_v17 = vmul.f32 %v6458_v48, %v718_v9  ;;  %v928_v26 = vmax.f32 %v887_v55, 0.0 }
 0x172   : > { %v5326_v18 = vpop.f32.mrf.mxu0  ;;  %v5530_v22 = vld [vmem:[#allocation2 + $0x68] sm:$0xff]  }
 0x173   : > { %5140 = vst [vmem:[#allocation2 + $0x70] sm:$0xff] %v5100_v16   ;;  %v888_v27 = vadd.f32 %v6466_v57, %v840_v17  ;;  %1972 = vmatmul.mubr.bf16.gmra.mxu1 %v6435_v24  ;;  %v2066_v29 = vrot.slane %v5530_v22, 3  ;;  %v1666_v32 = vshll.u32 %v5530_v22, 16  ;;  %v1174_v39 = vmul.f32 %v1092_v33, %v928_v26  ;;  %v1112_v33 = vpop.permute.xlu0 %1111 }
 0x174   : > { %v723_v28 = vpop.f32.mrf.mxu0 }
 0x175   : > { %v929_v21 = vmax.f32 %v888_v27, 0.0  ;;  %v841_v25 = vmul.f32 %v6458_v48, %v723_v28  ;;  %v2067_v23 = vsel %vm2044_vm3, %v2064_v60, %v2066_v29  ;;  %v1668_v38 = vrot.slane %v1666_v32, 1 }
 0x176   : > { %v5329_v35 = vpop.f32.mrf.mxu0  ;;  %5383 = vmatprep.mubr.bf16.mxu0 %v2067_v23  ;;  %v1670_v60 = vshrl.u32 %v5530_v22, 16 }
 0x177   : > { %v1175_v31 = vmul.f32 %v1097_v19, %v929_v21  ;;  %v889_v40 = vadd.f32 %v6466_v57, %v841_v25  ;;  %v6485_v1 = vsel %vm1561_vm1, %v1664_v37, %v1668_v38  ;;  %v1117_v19 = vpop.permute.xlu1 %1116 }
 0x178   : > { %v726_v24 = vpop.f32.mrf.mxu0  ;;  %1979 = vmatprep.mubr.bf16.mxu1 %v6485_v1  ;;  %v1672_v4 = vor.u32 %v1670_v60, %v1668_v38 }
 0x179   : > { %v5105_v41 = vpack.c.bf16 %v1175_v31, %v1174_v39  ;;  %v842_v34 = vmul.f32 %v6458_v48, %v726_v24  ;;  %v930_v36 = vmax.f32 %v889_v40, 0.0 }
 0x17a   : > { %v5330_v47 = vpop.f32.mrf.mxu0  ;;  %v5535_v49 = vld [vmem:[#allocation2 + $0x70] sm:$0xff]  }
 0x17b   : > { %5141 = vst [vmem:[#allocation2 + $0x78] sm:$0xff] %v5105_v41   ;;  %v890_v56 = vadd.f32 %v6466_v57, %v842_v34  ;;  %1980 = vmatmul.mubr.bf16.gmra.mxu1 %v5526_v54  ;;  %v2068_v59 = vrot.slane %v5535_v49, 3  ;;  %v1674_v61 = vshll.u32 %v5535_v49, 16  ;;  %v1176_v6 = vmul.f32 %v1102_v63, %v930_v36  ;;  %v6511_v47 = vld [vmem:[#allocation2 + $0xc] sm:$0xf] }
 0x17c   : > { %v731_v58 = vpop.f32.mrf.mxu0  ;;  %v1678_v30 = vshrl.u32 %v5535_v49, 16  ;;  %v2940_v36 = vld [vmem:[#allocation2 + $0x8] sm:$0xc] }
 0x17d   : > { %v931_v53 = vmax.f32 %v890_v56, 0.0  ;;  %v843_v50 = vmul.f32 %v6458_v48, %v731_v58  ;;  %v2069_v51 = vsel %vm2044_vm3, %v2066_v29, %v2068_v59  ;;  %v1676_v5 = vrot.slane %v1674_v61, 1  ;;  %v6513_v56 = vld [vmem:[#allocation2 + $0x10] sm:$0xff]  }
 0x17e   : > { %v5333_v2 = vpop.f32.mrf.mxu0  ;;  %5384 = vmatmul.mubr.bf16.gmra.mxu0 %v2069_v51  ;;  %v6524_v51 = vcombine.low %v2940_v36, %v6511_v47 }
 0x17f   : > { %v1177_v7 = vmul.f32 %v1107_v0, %v931_v53  ;;  %v891_v8 = vadd.f32 %v6466_v57, %v843_v50  ;;  %v6494_v55 = vsel %vm1561_vm1, %v1672_v4, %v1676_v5  ;;  %v1680_v37 = vor.u32 %v1678_v30, %v1676_v5  ;;  %v6521_v2 = vld [vmem:[#allocation2 + $0x18] sm:$0xff]   ;;  %v1122_v4 = vpop.permute.xlu0 %1121 }
 0x180   : > { %v734_v54 = vpop.f32.mrf.mxu0  ;;  %1987 = vmatprep.mubr.bf16.mxu1 %v6494_v55 }
 0x181   : > { %v5110_v9 = vpack.c.bf16 %v1177_v7, %v1176_v6  ;;  %v844_v16 = vmul.f32 %v6458_v48, %v734_v54  ;;  %v932_v26 = vmax.f32 %v891_v8, 0.0  ;;  %v1127_v7 = vpop.permute.xlu1 %1126 }
 0x182   : > { %v5334_v17 = vpop.f32.mrf.mxu0  ;;  %v6498_v18 = vld [vmem:[#allocation2 + $0x78] sm:$0xff]  }
 0x183   : > { %7762 = vst [vmem:[#allocation6_spill] sm:$0xff] %v6498_v18  ;;  %5142 = vst [vmem:[#allocation2 + $0x80] sm:$0xff] %v5110_v9   ;;  %v892_v27 = vadd.f32 %v6466_v57, %v844_v16  ;;  %1988 = vmatmul.mubr.bf16.gmra.mxu1 %v5530_v22  ;;  %v2070_v29 = vrot.slane %v6498_v18, 3  ;;  %v1682_v32 = vshll.u32 %v6498_v18, 16  ;;  %v1178_v39 = vmul.f32 %v1112_v33, %v932_v26 }
 0x184   : > { %v739_v28 = vpop.f32.mrf.mxu0  ;;  %v1686_v50 = vshrl.u32 %v6498_v18, 16  ;;  %v3045_v16 = vshll.u32 %v6513_v56, 16  ;;  %v3053_v33 = vshll.u32 %v6521_v2, 16 }
 0x185   : > { %v933_v21 = vmax.f32 %v892_v27, 0.0  ;;  %v845_v25 = vmul.f32 %v6458_v48, %v739_v28  ;;  %v2071_v23 = vsel %vm2044_vm3, %v2068_v59, %v2070_v29  ;;  %v1684_v38 = vrot.slane %v1682_v32, 1 }
 0x186   : > { %v5337_v35 = vpop.f32.mrf.mxu0  ;;  %5387 = vmatprep.mubr.bf16.mxu0 %v2071_v23  ;;  %v3040_v32 = vshll.u32 %v6524_v51, 16  ;;  %v3055_v36 = vrot.slane %v3053_v33, 1 }
 0x187   : > { %v1179_v31 = vmul.f32 %v1117_v19, %v933_v21  ;;  %v893_v22 = vadd.f32 %v6466_v57, %v845_v25  ;;  %v6507_v24 = vsel %vm1561_vm1, %v1680_v37, %v1684_v38  ;;  %v1688_v54 = vor.u32 %v1686_v50, %v1684_v38  ;;  %v1137_v50 = vpop.permute.xlu1 %1136 }
 0x188   : > { %v742_v40 = vpop.f32.mrf.mxu0  ;;  %1995 = vmatprep.mubr.bf16.mxu1 %v6507_v24  ;;  %v3047_v37 = vrot.slane %v3045_v16, 1 }
 0x189   : > { %v5115_v41 = vpack.c.bf16 %v1179_v31, %v1178_v39  ;;  %v846_v34 = vmul.f32 %v6458_v48, %v742_v40  ;;  %v934_v60 = vmax.f32 %v893_v22, 0.0  ;;  %v1132_v31 = vpop.permute.xlu0 %1131 }
 0x18a   : > { %v5338_v58 = vpop.f32.mrf.mxu0  ;;  %v6515_v59 = vld [vmem:[#allocation2 + $0x80] sm:$0xff]  }
 0x18b   : > { %5143 = vst [vmem:[#allocation2 + $0x88] sm:$0xff] %v5115_v41   ;;  %v894_v61 = vadd.f32 %v6466_v57, %v846_v34  ;;  %1996 = vmatmul.mubr.bf16.gmra.mxu1 %v5535_v49  ;;  %v2072_v53 = vrot.slane %v6515_v59, 3  ;;  %v1690_v0 = vshll.u32 %v6515_v59, 16  ;;  %v1180_v17 = vmul.f32 %v1122_v4, %v934_v60 }
 0x18c   : > { %v747_v63 = vpop.f32.mrf.mxu0  ;;  %v1694_v40 = vshrl.u32 %v6515_v59, 16  ;;  %v3042_v41 = vrot.slane %v3040_v32, 1  ;;  %v3049_v34 = vshrl.u32 %v6513_v56, 16 }
 0x18d   : > { %v935_v5 = vmax.f32 %v894_v61, 0.0  ;;  %v847_v6 = vmul.f32 %v6458_v48, %v747_v63  ;;  %v2073_v49 = vsel %vm2044_vm3, %v2070_v29, %v2072_v53  ;;  %v1692_v9 = vrot.slane %v1690_v0, 1 }
 0x18e   : > { %v5341_v8 = vpop.f32.mrf.mxu0  ;;  %5388 = vmatmul.mubr.bf16.gmra.mxu0 %v2073_v49 }
 0x18f   : > { %v1181_v26 = vmul.f32 %v1127_v7, %v935_v5  ;;  %v895_v27 = vadd.f32 %v6466_v57, %v847_v6  ;;  %v6531_v30 = vsel %vm1561_vm1, %v1688_v54, %v1692_v9  ;;  %v1696_v4 = vor.u32 %v1694_v40, %v1692_v9  ;;  %v5560_v40 = vld [vmem:[#allocation2 + $0x8] sm:$0xfe]  }
 0x190   : > { %v750_v28 = vpop.f32.mrf.mxu0  ;;  %2003 = vmatprep.mubr.bf16.mxu1 %v6531_v30  ;;  %v3051_v6 = vor.u32 %v3049_v34, %v3047_v37 }
 0x191   : > { %v5120_v21 = vpack.c.bf16 %v1181_v26, %v1180_v17  ;;  %v848_v29 = vmul.f32 %v6458_v48, %v750_v28  ;;  %v936_v25 = vmax.f32 %v895_v27, 0.0  ;;  %v3038_v26 = vshrl.u32 %v6524_v51, 16 }
 0x192   : > { %v5342_v19 = vpop.f32.mrf.mxu0  ;;  %v6537_v35 = vld [vmem:[#allocation2 + $0x88] sm:$0xf]  ;;  %v1422_v23 = vld [vmem:[#allocation2 + $0x8c] sm:$0xf]  ;;  %v3056_v27 = vsel %vm1561_vm1, %v3051_v6, %v3055_v36 }
 0x193   : > { %5144 = vst [vmem:[#allocation2 + $0x90] sm:$0xff] %v5120_v21   ;;  %v896_v38 = vadd.f32 %v6466_v57, %v848_v29  ;;  %2004 = vmatmul.mubr.bf16.gmra.mxu1 %v6498_v18  ;;  %v6544_v39 = vcombine.low %v6537_v35, %v1422_v23  ;;  %v1182_v0 = vmul.f32 %v1132_v31, %v936_v25  ;;  %v6567_v25 = vld [vmem:[#allocation2 + $0x10] sm:$0xff]  }
 0x194   : > { %v755_v22 = vpop.f32.mrf.mxu0  ;;  %v3043_v19 = vor.u32 %v3042_v41, %v3038_v26 }
 0x195   : > { %v937_v58 = vmax.f32 %v896_v38, 0.0  ;;  %v849_v60 = vmul.f32 %v6458_v48, %v755_v22  ;;  %v2074_v61 = vrot.slane %v6544_v39, 3  ;;  %v1698_v63 = vshll.u32 %v6544_v39, 16  ;;  %v6558_v48 = vld [vmem:[#allocation2 + $0x20] sm:$0xff]   ;;  %v2903_v38 = vld [vmem:[#allocation2 + $0x8] sm:$0xe] }
 0x196   : > { %v1702_v5 = vshrl.u32 %v6544_v39, 16  ;;  %v5345_v7 = vpop.f32.mrf.mxu0  ;;  %v3061_v31 = vshll.u32 %v6558_v48, 16  ;;  %v4908_v6 = vcombine.low %v2903_v38, %v6511_v47 }
 0x197   : > { %v1183_v8 = vmul.f32 %v1137_v50, %v937_v58  ;;  %v897_v49 = vadd.f32 %v6466_v57, %v849_v60  ;;  %v2075_v54 = vsel %vm2044_vm3, %v2072_v53, %v2074_v61  ;;  %v1700_v17 = vrot.slane %v1698_v63, 1  ;;  %v1142_v57 = vpop.permute.xlu0 %1141 }
 0x198   : > { %5391 = vmatprep.mubr.bf16.mxu0 %v2075_v54  ;;  %v758_v9 = vpop.f32.mrf.mxu0  ;;  %v3048_v58 = vsel %vm1561_vm1, %v3043_v19, %v3047_v37  ;;  %v3241_v60 = vshrl.u32 %v3056_v27, 16  ;;  %v3244_v50 = vshll.u32 %v3056_v27, 16  ;;  %v3063_v37 = vrot.slane %v3061_v31, 1 }
 0x199   : > { %v5125_v28 = vpack.c.bf16 %v1183_v8, %v1182_v0  ;;  %v938_v32 = vmax.f32 %v897_v49, 0.0  ;;  %v6563_v21 = vsel %vm1561_vm1, %v1696_v4, %v1700_v17  ;;  %v6565_v29 = vor.u32 %v1702_v5, %v1700_v17  ;;  %v6577_v0 = vld [vmem:[#allocation2 + $0x28] sm:$0xff]   ;;  %v6585_v17 = vld [vmem:[#allocation2 + $0x18] sm:$0xff]  }
 0x19a   : > { %2011 = vmatprep.mubr.bf16.mxu1 %v6563_v21  ;;  %v6570_v53 = vld [vmem:[#allocation2 + $0x90] sm:$0xff]   ;;  %v5346_v23 = vpop.f32.mrf.mxu0  ;;  %v1449_v4 = vld [vmem:[#allocation2 + $0x8c] sm:$0x7]  ;;  %v2492_v5 = vrot.slane %v6567_v25, 1  ;;  %v3233_v7 = vshrl.u32 %v3048_v58, 16  ;;  %v3236_v8 = vshll.u32 %v3048_v58, 16 }
 0x19b   : > { %5145 = vst [vmem:[#allocation2 + $0x98] sm:$0xff] %v5125_v28   ;;  %v1184_v51 = vmul.f32 %v1142_v57, %v938_v32  ;;  %2012 = vmatmul.mubr.bf16.gmra.mxu1 %v6515_v59  ;;  %v2076_v22 = vrot.slane %v6570_v53, 3  ;;  %v3057_v49 = vshrl.u32 %v6521_v2, 16  ;;  %v2491_v54 = vrot.slane %v5560_v40, 1  ;;  %v5643_v2 = vld [vmem:[#allocation2 + $0x14] sm:$0xf] }
 0x19c   : > { %2019 = vmatprep.mubr.bf16.mxu1 %v6565_v29  ;;  %v3243_v26 = vrot.slane %v3241_v60, 1  ;;  %v3246_v27 = vrot.slane %v3244_v50, 2  ;;  %v7729_v47 = vshll.u32 %v6577_v0, 16  ;;  %v3221_v32 = vshrl.u32 %v4908_v6, 16  ;;  %v6601_v60 = vld [vmem:[#allocation2 + $0x20] sm:$0xff]  }
 0x19d   : > { %v5025_v63 = vpack.c.bf16 %v1184_v51, %v1184_v51  ;;  %v2077_v41 = vsel %vm2044_vm3, %v2074_v61, %v2076_v22  ;;  %v4843_v61 = vcombine.low %v6537_v35, %v1449_v4  ;;  %v3059_v9 = vor.u32 %v3057_v49, %v3055_v36  ;;  %v6593_v51 = vld [vmem:[#allocation2 + $0x30] sm:$0xff]  }
 0x19e   : > { %5392 = vmatmul.mubr.bf16.gmra.mxu0 %v2077_v41  ;;  %v2493_v25 = vsel %vm2487_vm2, %v2491_v54, %v2492_v5  ;;  %v3235_v57 = vrot.slane %v3233_v7, 1  ;;  %v3238_v19 = vrot.slane %v3236_v8, 2  ;;  %v2496_v35 = vrot.slane %v6585_v17, 1 }
 0x19f   : > { %1390 = vst [vmem:[#allocation2 + $0xa0] sm:$0x3] %v5025_v63  ;;  %v3064_v23 = vsel %vm1561_vm1, %v3059_v9, %v3063_v37  ;;  %v3224_v36 = vshll.u32 %v4908_v6, 16  ;;  %v3228_v40 = vrot.slane %v3049_v34, 1  ;;  %v6599_v58 = vor.u32 %v3246_v27, %v3243_v26 }
 0x1a0   : > { %v3229_v63 = vrot.slane %v3045_v16, 2  ;;  %v3065_v50 = vshrl.u32 %v6558_v48, 16  ;;  %v3071_v41 = vrot.slane %v7729_v47, 1  ;;  %v3254_v6 = vshrl.u32 %v3064_v23, 16 }
 0x1a1   : > { %v3239_v8 = vor.u32 %v3238_v19, %v3235_v57  ;;  %v3257_v34 = vshll.u32 %v3064_v23, 16  ;;  %v7730_v17 = vshll.u32 %v6593_v51, 16  ;;  %v2497_v56 = vsel %vm2487_vm2, %v2492_v5, %v2496_v35  ;;  %v6620_v57 = vld [vmem:[#allocation2 + $0x38] sm:$0xff]  }
 0x1a2   : > { %v6589_v28 = vld [vmem:[#allocation2 + $0x98] sm:$0xff]   ;;  %v3067_v54 = vor.u32 %v3065_v50, %v3063_v37  ;;  %v3223_v16 = vrot.slane %v3221_v32, 1  ;;  %v6617_v9 = vor.u32 %v3229_v63, %v3228_v40  ;;  %v3256_v5 = vrot.slane %v3254_v6, 1  ;;  %v6630_v63 = vld [vmem:[#allocation2 + $0x28] sm:$0xff]  }
 0x1a3   : > { %2020 = vmatmul.mubr.bf16.gmra.mxu1 %v4843_v61  ;;  %v2078_v38 = vrot.slane %v6589_v28, 3  ;;  %v3226_v61 = vrot.slane %v3224_v36, 2  ;;  %v3248_v27 = vsel %vm3219_vm4, %v3239_v8, %v6599_v58  ;;  %v5594_v37 = vld [vmem:[%s7723_s4 + $0x1b8] sm:$0xff]   ;;  %v3249_v36 = vrot.slane %v3057_v49, 1 }
 0x1a4   : > { %2722 = vmatprep.mubr.bf16.mxu1 %v2493_v25  ;;  %v3072_v25 = vsel %vm1561_vm1, %v3067_v54, %v3071_v41  ;;  %v6626_v32 = vld [vmem:[#allocation2 + $0x18] sm:$0xff]   ;;  %v3259_v40 = vrot.slane %v3257_v34, 2  ;;  %v3250_v8 = vrot.slane %v3053_v33, 2  ;;  %v3073_v54 = vshrl.u32 %v6577_v0, 16  ;;  %v5596_v34 = vld [vmem:[%s7723_s4 + $0x1b0] sm:$0xff]  }
 0x1a5   : > { %v2079_v4 = vsel %vm2044_vm3, %v2076_v22, %v2078_v38  ;;  %v2500_v22 = vrot.slane %v6601_v60, 1  ;;  %v2498_v23 = vrot.slane %v6626_v32, 1  ;;  %v3227_v6 = vor.u32 %v3226_v61, %v3223_v16  ;;  %v5600_v60 = vld [vmem:[%s7723_s4 + $0x1a0] sm:$0xff]  }
 0x1a6   : > { %v6609_v7 = vld [vmem:[#allocation2 + $0xa0] ss:$0 sps:$4 sm:$0x33]   ;;  %5395 = vmatprep.mubr.bf16.mxu0 %v2079_v4  ;;  %v3809_v4 = vld [vmem:[#allocation2 + $0x10] sm:$0xc]  ;;  %v3270_v49 = vshll.u32 %v3072_v25, 16  ;;  %v3075_v47 = vor.u32 %v3073_v54, %v3071_v41  ;;  %v3260_v61 = vor.u32 %v3259_v40, %v3256_v5 }
 0x1a7   : > { %v2080_v26 = vrot.slane %v6609_v7, 3  ;;  %v6641_v33 = vcombine.low %v3809_v4, %v5643_v2  ;;  %v3231_v16 = vsel %vm3219_vm4, %v3227_v6, %v6617_v9  ;;  %v6654_v41 = vsel %vm2487_vm2, %v2494_v12, %v2498_v23  ;;  %v6663_v12 = vld [vmem:[#allocation2 + $0x38] sm:$0xff]  }
 0x1a8   : > { %v3272_v2 = vrot.slane %v3270_v49, 2  ;;  %v7733_v6 = vrot.slane %v6515_v59, 1  ;;  %v3263_v62 = vrot.slane %v3061_v31, 2  ;;  %v3081_v5 = vshrl.u32 %v6593_v51, 16 }
 0x1a9   : > { %v2081_v19 = vsel %vm2044_vm3, %v2078_v38, %v2080_v26  ;;  %v3079_v38 = vrot.slane %v7730_v17, 1  ;;  %v3267_v26 = vshrl.u32 %v3072_v25, 16  ;;  %v3251_v25 = vor.u32 %v3250_v8, %v3249_v36  ;;  %v5644_v8 = vld [vmem:[#allocation2 + $0x20] sm:$0xff]  }
 0x1aa   : > { %5396 = vmatmul.mubr.bf16.gmra.mxu0 %v2081_v19  ;;  %v7732_v17 = vrot.slane %v6544_v39, 1  ;;  %v3262_v19 = vrot.slane %v3065_v50, 1  ;;  %v3890_v40 = vrot.slane %v6279_v44, 2  ;;  %v3261_v31 = vsel %vm3219_vm4, %v6599_v58, %v3260_v61 }
 0x1ab   : > { %2723 = vmatmul.mubr.bf16.vlgmr.msra.gmra.mxu1 %v6179_v52  ;;  %3628 = vmatprep.mubr.bf16.mxu0 %v3248_v27  ;;  %v7731_v52 = vshll.u32 %v6620_v57, 16  ;;  %v2504_v27 = vrot.slane %v6630_v63, 1  ;;  %v3080_v4 = vsel %vm1561_vm1, %v3075_v47, %v3079_v38  ;;  %v5598_v47 = vld [vmem:[%s7723_s4 + $0x1a8] sm:$0xff]  }
 0x1ac   : > { %2730 = vmatprep.mubr.bf16.mxu1 %v2497_v56  ;;  %4089 = vmatpush1.bf16.msra.mxu1 %v5594_v37  ;;  %v2501_v56 = vsel %vm2487_vm2, %v2496_v35, %v2500_v22  ;;  %v5579_v37 = vld [vmem:[#allocation2 + $0x30] sm:$0xff]   ;;  %v3269_v35 = vrot.slane %v3267_v26, 1  ;;  %v3280_v63 = vshrl.u32 %v3080_v4, 16  ;;  %v3283_v50 = vshll.u32 %v3080_v4, 16  ;;  %v6687_v4 = vld [vmem:[#allocation2 + $0x40] sm:$0xff]  }
 0x1ad   : > { %4090 = vmatprep.subr.bf16.mxu1 %v5724_v3  ;;  %v6668_v36 = vrot.slane %v7731_v52, 1  ;;  %v6680_v48 = vsel %vm2487_vm2, %v7733_v6, %v7732_v17  ;;  %v2502_v26 = vrot.slane %v5644_v8, 1  ;;  %v2508_v49 = vrot.slane %v5579_v37, 1  ;;  %v6699_v37 = vld [vmem:[#allocation2 + $0x28] sm:$0xff]  }
 0x1ae   : > { %v3894_v52 = vrot.slane %v6310_v11, 2  ;;  %v6695_v58 = vor.u32 %v3272_v2, %v3269_v35  ;;  %v6697_v8 = vor.u32 %v3263_v62, %v3262_v19  ;;  %v7737_v17 = vrot.slane %v6663_v12, 1  ;;  %v5606_v11 = vld [vmem:[%s7723_s4 + $0x188] sm:$0xff]  }
 0x1af   : > { %v3275_v35 = vrot.slane %v3073_v54, 1  ;;  %v7763_v19 = vshll.u32 %v6577_v0, 16  ;;  %v3898_v62 = vrot.slane %v6341_v43, 2  ;;  %v3906_v6 = vrot.slane %v6403_v46, 2 }
 0x1b0   : > { %4091 = vmatpush1.bf16.msra.mxu1 %v5596_v34  ;;  %v3083_v34 = vor.u32 %v3081_v5, %v3079_v38  ;;  %v7740_v38 = vrot.slane %v6699_v37, 1  ;;  %v3274_v54 = vsel %vm3219_vm4, %v3260_v61, %v6695_v58  ;;  %v3265_v43 = vsel %vm3219_vm4, %v3251_v25, %v6697_v8  ;;  %v5602_v61 = vld [vmem:[%s7723_s4 + $0x198] sm:$0xff]  }
 0x1b1   : > { %4092 = vmatprep.subr.bf16.mxu1 %v5724_v3  ;;  %v3276_v2 = vrot.slane %v7763_v19, 2  ;;  %v3902_v19 = vrot.slane %v6372_v13, 2  ;;  %v3910_v46 = vrot.slane %v6427_v15, 2  ;;  %v3922_v15 = vrot.slane %v6485_v1, 2 }
 0x1b2   : > { %3629 = vmatmul.mubr.bf16.vlgmr.msra.gmra.mxu0 %v3231_v16  ;;  %v3252_v16 = vsel %vm3219_vm4, %v6617_v9, %v3251_v25  ;;  %v3285_v9 = vrot.slane %v3283_v50, 2  ;;  %v3820_v50 = vshll.u32 %v6641_v33, 16  ;;  %v6730_v32 = vsel %vm2487_vm2, %v2502_v26, %v7740_v38 }
 0x1b3   : > { %2731 = vmatmul.mubr.bf16.gmra.mxu1 %v6202_v20  ;;  %3636 = vmatprep.mubr.bf16.mxu0 %v3261_v31  ;;  %v2505_v20 = vsel %vm2487_vm2, %v2500_v22, %v2504_v27  ;;  %v3282_v22 = vrot.slane %v3280_v63, 1  ;;  %v6715_v31 = vsel %vm2487_vm2, %v2498_v23, %v2502_v26  ;;  %v6735_v23 = vsel %vm2487_vm2, %v2508_v49, %v7737_v17 }
 0x1b4   : > { %2738 = vmatprep.mubr.bf16.mxu1 %v2501_v56  ;;  %v3088_v56 = vsel %vm1561_vm1, %v3083_v34, %v6668_v36  ;;  %4093 = vmatpush1.bf16.msra.mxu1 %v5598_v47  ;;  %v6718_v47 = vsel %vm2487_vm2, %v2504_v27, %v2508_v49  ;;  %v7734_v34 = vshll.u32 %v6687_v4, 16  ;;  %v6742_v13 = vor.u32 %v3276_v2, %v3275_v35  ;;  %v6753_v2 = vld [vmem:[#allocation2 + $0x48] sm:$0xff]  }
 0x1b5   : > { %4094 = vmatprep.subr.bf16.mxu1 %v5724_v3  ;;  %v3293_v63 = vshrl.u32 %v3088_v56, 16  ;;  %v3296_v0 = vshll.u32 %v3088_v56, 16  ;;  %v6740_v27 = vor.u32 %v3285_v9, %v3282_v22  ;;  %v3818_v25 = vshrl.u32 %v6641_v33, 16  ;;  %v6747_v56 = vld [vmem:[#allocation2 + $0x30] sm:$0xff]  }
 0x1b6   : > { %v3822_v26 = vrot.slane %v3820_v50, 1  ;;  %v3095_v22 = vrot.slane %v7734_v34, 1  ;;  %v3288_v34 = vrot.slane %v3081_v5, 1  ;;  %v3914_v5 = vrot.slane %v6450_v45, 2 }
 0x1b7   : > { %v3295_v9 = vrot.slane %v3293_v63, 1  ;;  %v3298_v35 = vrot.slane %v3296_v0, 2  ;;  %v6776_v63 = vsel %vm3881_vm5, %v3890_v40, %v3894_v52  ;;  %v7765_v0 = vshll.u32 %v6593_v51, 16 }
 0x1b8   : > { %4095 = vmatpush1.bf16.msra.mxu1 %v5600_v60  ;;  %v7739_v60 = vshrl.u32 %v6620_v57, 16  ;;  %v3823_v50 = vor.u32 %v3822_v26, %v3818_v25  ;;  %v7735_v51 = vshll.u32 %v6753_v2, 16  ;;  %v7766_v1 = vrot.slane %v6248_v14, 2 }
 0x1b9   : > { %4096 = vmatprep.subr.bf16.mxu1 %v5724_v3  ;;  %v3289_v25 = vrot.slane %v7765_v0, 2  ;;  %v6793_v45 = vor.u32 %v3298_v35, %v3295_v9  ;;  %v6812_v9 = vsel %vm3881_vm5, %v3902_v19, %v3906_v6  ;;  %v6820_v35 = vsel %vm3881_vm5, %v3910_v46, %v3914_v5 }
 0x1ba   : > { %3637 = vmatmul.mubr.bf16.gmra.mxu0 %v3252_v16  ;;  %v3842_v17 = vshll.u32 %v6609_v7, 16 }
 0x1bb   : > { %2739 = vmatmul.mubr.bf16.gmra.mxu1 %v6654_v41  ;;  %3644 = vmatprep.mubr.bf16.mxu0 %v3274_v54  ;;  %v7764_v41 = vrot.slane %v6248_v14, 2  ;;  %v5604_v54 = vld [vmem:[%s7723_s4 + $0x190] sm:$0xff]   ;;  %v3287_v14 = vsel %vm3219_vm4, %v6695_v58, %v6740_v27 }
 0x1bc   : > { %2746 = vmatprep.mubr.bf16.mxu1 %v2505_v20  ;;  %v3091_v20 = vor.u32 %v7739_v60, %v6668_v36  ;;  %4097 = vmatpush1.bf16.msra.mxu1 %v5602_v61  ;;  %v3824_v36 = vsel %vm1561_vm1, %v3823_v50, %v6219_v42  ;;  %v3918_v61 = vrot.slane %v6475_v10, 2  ;;  %v3926_v42 = vrot.slane %v6494_v55, 2  ;;  %v6801_v50 = vld [vmem:[#allocation2 + $0x40] sm:$0xff]  }
 0x1bd   : > { %v6760_v16 = vsel %vm3881_vm5, %v7764_v41, %v3890_v40  ;;  %4098 = vmatprep.subr.bf16.mxu1 %v5724_v3  ;;  %v3885_v44 = vrot.slane %v3824_v36, 2  ;;  %v6790_v40 = vsel %vm3881_vm5, %v3894_v52, %v3898_v62  ;;  %v6797_v41 = vsel %vm3881_vm5, %v3898_v62, %v3902_v19 }
 0x1be   : > { %v3096_v26 = vsel %vm1561_vm1, %v3091_v20, %v3095_v22  ;;  %v3930_v10 = vrot.slane %v6507_v24, 2  ;;  %v3934_v62 = vrot.slane %v6531_v30, 2  ;;  %v6817_v24 = vsel %vm3881_vm5, %v3906_v6, %v3910_v46 }
 0x1bf   : > { %v6809_v52 = vsel %vm3881_vm5, %v3885_v44, %v7766_v1  ;;  %v3306_v55 = vshrl.u32 %v3096_v26, 16  ;;  %v3938_v20 = vrot.slane %v6563_v21, 2  ;;  %v3309_v19 = vshll.u32 %v3096_v26, 16  ;;  %v5623_v1 = vld [vmem:[#allocation2 + $0xa0] ss:$0 sps:$4 sm:$0x11]  }
 0x1c0   : > { %4099 = vmatpush1.bf16.msra.mxu1 %v5604_v54  ;;  %v6828_v30 = vsel %vm3881_vm5, %v3914_v5, %v3918_v61  ;;  %v3278_v6 = vsel %vm3219_vm4, %v6697_v8, %v6742_v13  ;;  %v7736_v54 = vshrl.u32 %v6687_v4, 16  ;;  %v6842_v58 = vsel %vm3881_vm5, %v3918_v61, %v3922_v15  ;;  %v5608_v8 = vld [vmem:[%s7723_s4 + $0x180] sm:$0xff]  }
 0x1c1   : > { %4100 = vmatprep.subr.bf16.mxu1 %v5724_v3  ;;  %v6845_v5 = vor.u32 %v3289_v25, %v3288_v34  ;;  %v6854_v0 = vsel %vm3881_vm5, %v3926_v42, %v3930_v10  ;;  %v3300_v36 = vsel %vm3219_vm4, %v6740_v27, %v6793_v45  ;;  %v3308_v61 = vrot.slane %v3306_v55, 1  ;;  %v5610_v55 = vld [vmem:[%s7723_s4 + $0x1f8] sm:$0xff]  }
 0x1c2   : > { %3645 = vmatmul.mubr.bf16.gmra.mxu0 %v3265_v43  ;;  %v6839_v43 = vld [vmem:[#allocation2 + $0x50] sm:$0xff]   ;;  %7768 = vst [vmem:[#allocation8_spill] sm:$0xff] %v6854_v0  ;;  %v3099_v34 = vor.u32 %v7736_v54, %v3095_v22  ;;  %v6863_v25 = vsel %vm3881_vm5, %v3930_v10, %v3934_v62  ;;  %v3311_v26 = vrot.slane %v3309_v19, 2  ;;  %v7738_v44 = vrot.slane %v6498_v18, 2 }
 0x1c3   : > { %2747 = vmatmul.mubr.bf16.gmra.mxu1 %v6715_v31  ;;  %3652 = vmatprep.mubr.bf16.mxu0 %v3287_v14  ;;  %v6837_v31 = vrot.slane %v7735_v51, 1  ;;  %7769 = vst [vmem:[#allocation9_spill] sm:$0xff] %v6863_v25  ;;  %v3940_v10 = vrot.slane %v6544_v39, 2  ;;  %v3830_v14 = vshrl.u32 %v6570_v53, 16  ;;  %v3834_v19 = vshll.u32 %v6589_v28, 16 }
 0x1c4   : > { %2754 = vmatprep.mubr.bf16.mxu1 %v6718_v47  ;;  %4101 = vmatpush1.bf16.msra.mxu1 %v5606_v11  ;;  %v6851_v47 = vsel %vm3881_vm5, %v3922_v15, %v3926_v42  ;;  %v6869_v15 = vsel %vm3881_vm5, %v3934_v62, %v3938_v20  ;;  %v3936_v42 = vrot.slane %v6515_v59, 2  ;;  %v3826_v11 = vshll.u32 %v6570_v53, 16 }
 0x1c5   : > { %7767 = vst [vmem:[#allocation7_spill] sm:$0xff] %v6851_v47  ;;  %4102 = vmatprep.subr.bf16.mxu1 %v5724_v3  ;;  %7770 = vst [vmem:[#allocation10_spill] sm:$0xff] %v6869_v15  ;;  %v6874_v27 = vsel %vm1561_vm1, %v3099_v34, %v6837_v31  ;;  %v3944_v34 = vrot.slane %v6570_v53, 2  ;;  %v3838_v54 = vshrl.u32 %v6589_v28, 16  ;;  %v3948_v60 = vrot.slane %v6589_v28, 2 }
 0x1c6   : > { %v6885_v62 = vsel %vm3881_vm5, %v7738_v44, %v3936_v42  ;;  %v3828_v51 = vrot.slane %v3826_v11, 1  ;;  %v3836_v44 = vrot.slane %v3834_v19, 1  ;;  %v3846_v53 = vshrl.u32 %v6609_v7, 16 }
 0x1c7   : > { %7771 = vst [vmem:[#allocation11_spill] sm:$0xff] %v6885_v62  ;;  %v6898_v46 = vsel %vm3881_vm5, %v3940_v10, %v3944_v34  ;;  %v3844_v38 = vrot.slane %v3842_v17, 1  ;;  %v3952_v49 = vrot.slane %v5623_v1, 2  ;;  %v6905_v22 = vor.u32 %v3311_v26, %v3308_v61 }
 0x1c8   : > { %4103 = vmatpush1.bf16.msra.mxu1 %v5608_v8  ;;  %v6892_v8 = vsel %vm3881_vm5, %v3936_v42, %v3940_v10  ;;  %7773 = vst [vmem:[#allocation13_spill] sm:$0xff] %v6898_v46  ;;  %v3829_v42 = vsel %vm1561_vm1, %v6565_v29, %v3828_v51  ;;  %v3832_v11 = vor.u32 %v3830_v14, %v3828_v51  ;;  %v3105_v10 = vshrl.u32 %v6753_v2, 16 }
 0x1c9   : > { %4104 = vmatprep.subr.bf16.mxu1 %v5724_v3  ;;  %7772 = vst [vmem:[#allocation12_spill] sm:$0xff] %v6892_v8  ;;  %v3840_v28 = vor.u32 %v3838_v54, %v3836_v44  ;;  %v6911_v7 = vsel %vm3881_vm5, %v3944_v34, %v3948_v60  ;;  %v3848_v17 = vor.u32 %v3846_v53, %v3844_v38  ;;  %v7777_v1 = vshll.u32 %v6839_v43, 16  ;;  %v5614_v34 = vld [vmem:[%s7723_s4 + $0x1e8] sm:$0xff]  }
 0x1ca   : > { %3653 = vmatmul.mubr.bf16.gmra.mxu0 %v3278_v6  ;;  %v3942_v6 = vrot.slane %v3829_v42, 2  ;;  %7774 = vst [vmem:[#allocation14_spill] sm:$0xff] %v6911_v7  ;;  %v3837_v29 = vsel %vm1561_vm1, %v3832_v11, %v3836_v44  ;;  %v6917_v51 = vsel %vm3881_vm5, %v3948_v60, %v3952_v49  ;;  %v6929_v44 = vld [vmem:[#allocation2 + $0x58] sm:$0xff]   ;;  %v7778_v60 = vrot.slane %v6747_v56, 1 }
 0x1cb   : > { %2755 = vmatmul.mubr.bf16.gmra.mxu1 %v6730_v32  ;;  %3660 = vmatprep.mubr.bf16.mxu0 %v3300_v36  ;;  %v5612_v32 = vld [vmem:[%s7723_s4 + $0x1f0] sm:$0xff]   ;;  %7775 = vst [vmem:[#allocation15_spill] sm:$0xff] %v6917_v51  ;;  %v3322_v36 = vshll.u32 %v6874_v27, 16  ;;  %v3946_v54 = vrot.slane %v3837_v29, 2  ;;  %v3845_v26 = vsel %vm1561_vm1, %v3840_v28, %v3844_v38  ;;  %v3954_v49 = vrot.slane %v3848_v17, 2  ;;  %v6967_v29 = vld [vmem:[#allocation2 + $0x48] sm:$0xff]  }
 0x1cc   : > { %2762 = vmatprep.mubr.bf16.mxu1 %v6735_v23  ;;  %4105 = vmatpush2.bf16.msra.mxu1 %v5610_v55  ;;  %v3319_v23 = vshrl.u32 %v6874_v27, 16  ;;  %v6923_v61 = vsel %vm3881_vm5, %v3938_v20, %v3942_v6  ;;  %v3111_v55 = vrot.slane %v7777_v1, 1  ;;  %v3950_v14 = vrot.slane %v3845_v26, 2 }
 0x1cd   : > { %4106 = vmatprep.subr.bf16.mxu1 %v5724_v3  ;;  %7776 = vst [vmem:[#allocation16_spill] sm:$0xff] %v6923_v61  ;;  %v7779_v27 = vrot.slane %v6699_v37, 1  ;;  %v3291_v20 = vsel %vm3219_vm4, %v6742_v13, %v6845_v5  ;;  %v7780_v38 = vshrl.u32 %v6620_v57, 16  ;;  %v6945_v53 = vsel %vm3881_vm5, %v3942_v6, %v3946_v54  ;;  %v7142_v61 = vld [vmem:[#allocation2 + $0x88] sm:$0xff]  }
 0x1ce   : > { %7781 = vst [vmem:[#allocation17_spill] sm:$0xff] %v6945_v53  ;;  %v7782_v42 = vshll.u32 %v6620_v57, 16  ;;  %v3107_v11 = vor.u32 %v3105_v10, %v6837_v31  ;;  %v6954_v13 = vsel %vm3881_vm5, %v3946_v54, %v3950_v14  ;;  %v7785_v28 = vrot.slane %v6801_v50, 1 }
 0x1cf   : > { %v2511_v21 = vsel %vm2487_vm2, %v7779_v27, %v7778_v60  ;;  %v3301_v19 = vrot.slane %v7780_v38, 1  ;;  %7783 = vst [vmem:[#allocation18_spill] sm:$0xff] %v6954_v13  ;;  %v7786_v6 = vrot.slane %v6663_v12, 1  ;;  %v3313_v31 = vsel %vm3219_vm4, %v6793_v45, %v6905_v22  ;;  %v6982_v38 = vld [vmem:[#allocation2 + $0x60] sm:$0xff]  }
 0x1d0   : > { %4107 = vmatpush2.bf16.msra.mxu1 %v5612_v32  ;;  %v3302_v37 = vrot.slane %v7782_v42, 2  ;;  %v6957_v32 = vsel %vm3881_vm5, %v3950_v14, %v3954_v49  ;;  %v3321_v17 = vrot.slane %v3319_v23, 1  ;;  %v3324_v54 = vrot.slane %v3322_v36, 2  ;;  %v6971_v14 = vld [vmem:[#allocation2 + $0x38] sm:$0xff]   ;;  %v5616_v49 = vld [vmem:[%s7723_s4 + $0x1e0] sm:$0xff]  }
 0x1d1   : > { %4108 = vmatprep.subr.bf16.mxu1 %v5724_v3  ;;  %7784 = vst [vmem:[#allocation19_spill] sm:$0xff] %v6957_v32  ;;  %v2517_v57 = vsel %vm2487_vm2, %v7786_v6, %v7785_v28  ;;  %v3112_v26 = vsel %vm1561_vm1, %v3107_v11, %v3111_v55  ;;  %v7742_v1 = vshll.u32 %v6929_v44, 16  ;;  %v2514_v12 = vrot.slane %v6971_v14, 1 }
 0x1d2   : > { %3661 = vmatmul.mubr.bf16.gmra.mxu0 %v3291_v20  ;;  %v3303_v45 = vor.u32 %v3302_v37, %v3301_v19  ;;  %v2520_v23 = vrot.slane %v6967_v29, 1  ;;  %v3325_v36 = vor.u32 %v3324_v54, %v3321_v17  ;;  %v3332_v60 = vshrl.u32 %v3112_v26, 16  ;;  %v5617_v19 = vld [vmem:[%s7723_s4 + $0x1d8] sm:$0xff]   ;;  %v7006_v54 = vld [vmem:[#allocation2 + $0x50] sm:$0xff]  }
 0x1d3   : > { %2763 = vmatmul.mubr.bf16.gmra.mxu1 %v2511_v21  ;;  %3668 = vmatprep.mubr.bf16.mxu0 %v3313_v31  ;;  %v3335_v27 = vshll.u32 %v3112_v26, 16  ;;  %v3113_v21 = vshrl.u32 %v6839_v43, 16  ;;  %v3119_v20 = vrot.slane %v7742_v1, 1  ;;  %v7788_v28 = vshrl.u32 %v6687_v4, 16 }
 0x1d4   : > { %2770 = vmatprep.mubr.bf16.mxu1 %v2517_v57  ;;  %4109 = vmatpush2.bf16.msra.mxu1 %v5614_v34  ;;  %v7787_v34 = vrot.slane %v6747_v56, 1  ;;  %v3304_v11 = vsel %vm3219_vm4, %v6845_v5, %v3303_v45  ;;  %v7789_v57 = vshll.u32 %v6687_v4, 16  ;;  %v7790_v29 = vrot.slane %v6801_v50, 1 }
 0x1d5   : > { %4110 = vmatprep.subr.bf16.mxu1 %v5724_v3  ;;  %v3314_v6 = vrot.slane %v7788_v28, 1  ;;  %v3115_v56 = vor.u32 %v3113_v21, %v3111_v55  ;;  %v3326_v5 = vsel %vm3219_vm4, %v6905_v22, %v3325_v36  ;;  %v3334_v26 = vrot.slane %v3332_v60, 1  ;;  %v5619_v22 = vld [vmem:[%s7723_s4 + $0x1d0] sm:$0xff]  }
 0x1d6   : > { %v2515_v42 = vsel %vm2487_vm2, %v7787_v34, %v2514_v12  ;;  %v3315_v31 = vrot.slane %v7789_v57, 2  ;;  %v2521_v17 = vsel %vm2487_vm2, %v7790_v29, %v2520_v23  ;;  %v7741_v34 = vshll.u32 %v6982_v38, 16 }
 0x1d7   : > { %v3120_v55 = vsel %vm1561_vm1, %v3115_v56, %v3119_v20  ;;  %v3340_v51 = vrot.slane %v3113_v21, 1  ;;  %v7068_v21 = vld [vmem:[#allocation2 + $0x60] sm:$0xff]   ;;  %v7796_v53 = vshll.u32 %v6982_v38, 16 }
 0x1d8   : > { %4111 = vmatpush2.bf16.msra.mxu1 %v5616_v49  ;;  %v3337_v49 = vrot.slane %v3335_v27, 2  ;;  %v3316_v60 = vor.u32 %v3315_v31, %v3314_v6  ;;  %v2524_v27 = vrot.slane %v7006_v54, 1  ;;  %v3345_v57 = vshrl.u32 %v3120_v55, 16  ;;  %v5620_v6 = vld [vmem:[%s7723_s4 + $0x1c8] sm:$0xff]  }
 0x1d9   : > { %v6990_v37 = vpop.f32.mrf.mxu1  ;;  %4112 = vmatprep.subr.bf16.mxu1 %v5724_v3  ;;  %v3348_v56 = vshll.u32 %v3120_v55, 16  ;;  %v3327_v54 = vrot.slane %v3105_v10, 1 }
 0x1da   : > { %3669 = vmatmul.mubr.bf16.gmra.mxu0 %v3304_v11  ;;  %v3338_v28 = vor.u32 %v3337_v49, %v3334_v26  ;;  %v3317_v31 = vsel %vm3219_vm4, %v3303_v45, %v3316_v60  ;;  %v7791_v26 = vshll.u32 %v6753_v2, 16  ;;  %v3347_v45 = vrot.slane %v3345_v57, 1 }
 0x1db   : > { %2771 = vmatmul.mubr.bf16.gmra.mxu1 %v2515_v42  ;;  %v1887_v4 = vpop.f32.mrf.mxu1  ;;  %3676 = vmatprep.mubr.bf16.mxu0 %v3326_v5  ;;  %v7010_v42 = vld [vmem:[#allocation2 + $0x40] sm:$0xff]   ;;  %v7023_v5 = vld [vmem:[#allocation2 + $0x68] sm:$0xff]   ;;  %v3350_v1 = vrot.slane %v3348_v56, 2 }
 0x1dc   : > { %2778 = vmatprep.mubr.bf16.mxu1 %v2521_v17  ;;  %v2518_v50 = vrot.slane %v7010_v42, 1  ;;  %4113 = vmatpush2.bf16.msra.mxu1 %v5617_v19  ;;  %v7743_v17 = vshrl.u32 %v6929_v44, 16  ;;  %v3127_v19 = vrot.slane %v7741_v34, 1  ;;  %v3328_v49 = vrot.slane %v7791_v26, 2  ;;  %v7039_v34 = vld [vmem:[#allocation2 + $0x58] sm:$0xff]  }
 0x1dd   : > { %v7016_v11 = vpop.f32.mrf.mxu1  ;;  %4114 = vmatprep.subr.bf16.mxu1 %v5724_v3  ;;  %v7744_v10 = vshll.u32 %v7023_v5, 16  ;;  %v2528_v56 = vrot.slane %v7039_v34, 1  ;;  %v3351_v26 = vor.u32 %v3350_v1, %v3347_v45 }
 0x1de   : > { %v2519_v4 = vsel %vm2487_vm2, %v2514_v12, %v2518_v50  ;;  %v3123_v55 = vor.u32 %v7743_v17, %v3119_v20  ;;  %v2525_v12 = vsel %vm2487_vm2, %v2520_v23, %v2524_v27  ;;  %v7046_v23 = vld [vmem:[#allocation2 + $0x48] sm:$0xff]  }
 0x1df   : > { %v1890_v29 = vpop.f32.mrf.mxu1 }
 0x1e0   : > { %4115 = vmatpush2.bf16.msra.mxu1 %v5619_v22  ;;  %v3339_v22 = vsel %vm3219_vm4, %v3325_v36, %v3338_v28  ;;  %v3128_v2 = vsel %vm1561_vm1, %v3123_v55, %v3127_v19  ;;  %v2522_v36 = vrot.slane %v7046_v23, 1 }
 0x1e1   : > { %4116 = vmatprep.subr.bf16.mxu1 %v5724_v3  ;;  %v3358_v55 = vshrl.u32 %v3128_v2, 16 }
 0x1e2   : > { %3677 = vmatmul.mubr.bf16.gmra.mxu0 %v3317_v31  ;;  %v3329_v31 = vor.u32 %v3328_v49, %v3327_v54  ;;  %v7792_v54 = vshll.u32 %v6839_v43, 16  ;;  %v2523_v34 = vsel %vm2487_vm2, %v2518_v50, %v2522_v36 }
 0x1e3   : > { %v1893_v29 = vpop.f32.mrf.mxu1  ;;  %2779 = vmatmul.mubr.bf16.gmra.mxu1 %v2519_v4  ;;  %3684 = vmatprep.mubr.bf16.mxu0 %v3339_v22  ;;  %v5622_v4 = vld [vmem:[%s7723_s4 + $0x1c0] sm:$0xff]   ;;  %v7745_v22 = vshrl.u32 %v6982_v38, 16  ;;  %v3360_v43 = vrot.slane %v3358_v55, 1 }
 0x1e4   : > { %2786 = vmatprep.mubr.bf16.mxu1 %v2525_v12  ;;  %4117 = vmatpush2.bf16.msra.mxu1 %v5620_v6  ;;  %v3361_v12 = vshll.u32 %v3128_v2, 16  ;;  %v3135_v6 = vrot.slane %v7744_v10, 1  ;;  %v3330_v1 = vsel %vm3219_vm4, %v3316_v60, %v3329_v31  ;;  %v2529_v2 = vsel %vm2487_vm2, %v2524_v27, %v2528_v56 }
 0x1e5   : > { %v1895_v20 = vpop.f32.mrf.mxu1  ;;  %4118 = vmatprep.subr.bf16.mxu1 %v5724_v3  ;;  %v3341_v3 = vrot.slane %v7792_v54, 2  ;;  %v3131_v49 = vor.u32 %v7745_v22, %v3127_v19  ;;  %v7072_v19 = vld [vmem:[#allocation2 + $0x50] sm:$0xff]  }
 0x1e6   : > { %v7054_v20 = vld [vmem:[#allocation2 + $0x70] sm:$0xff]   ;;  %v3363_v54 = vrot.slane %v3361_v12, 2 }
 0x1e7   : > { %v1896_v57 = vpop.f32.mrf.mxu1  ;;  %v3136_v50 = vsel %vm1561_vm1, %v3131_v49, %v3135_v6  ;;  %v7746_v60 = vshll.u32 %v7054_v20, 16  ;;  %v3342_v10 = vor.u32 %v3341_v3, %v3340_v51  ;;  %v7747_v49 = vshrl.u32 %v7023_v5, 16 }
 0x1e8   : > { %4119 = vmatpush2.bf16.msra.mxu1 %v5622_v4  ;;  %v3364_v22 = vor.u32 %v3363_v54, %v3360_v43  ;;  %v3371_v55 = vshrl.u32 %v3136_v50, 16  ;;  %v3374_v12 = vshll.u32 %v3136_v50, 16  ;;  %v7793_v43 = vshrl.u32 %v6929_v44, 16 }
 0x1e9   : > { %v1898_v17 = vpop.f32.mrf.mxu1  ;;  %v3343_v3 = vsel %vm3219_vm4, %v3329_v31, %v3342_v10  ;;  %v7794_v54 = vshll.u32 %v6929_v44, 16  ;;  %v7098_v31 = vld [vmem:[#allocation2 + $0x68] sm:$0xff]  }
 0x1ea   : > { %3685 = vmatmul.mubr.bf16.gmra.mxu0 %v3330_v1  ;;  %v3352_v17 = vsel %vm3219_vm4, %v3338_v28, %v3351_v26  ;;  %v2532_v28 = vrot.slane %v7068_v21, 1 }
 0x1eb   : > { %v7064_v45 = vpop.f32.mrf.mxu1  ;;  %2787 = vmatmul.mubr.bf16.gmra.mxu1 %v2523_v34  ;;  %3692 = vmatprep.mubr.bf16.mxu0 %v3352_v17  ;;  %v2526_v34 = vrot.slane %v7072_v19, 1  ;;  %v3143_v17 = vrot.slane %v7746_v60, 1  ;;  %v3354_v50 = vrot.slane %v7794_v54, 2 }
 0x1ec   : > { %2794 = vmatprep.mubr.bf16.mxu1 %v2529_v2  ;;  %v2533_v13 = vsel %vm2487_vm2, %v2528_v56, %v2532_v28 }
 0x1ed   : > { %v1903_v4 = vpop.f32.mrf.mxu1  ;;  %v2527_v51 = vsel %vm2487_vm2, %v2522_v36, %v2526_v34  ;;  %v3365_v36 = vsel %vm3219_vm4, %v3351_v26, %v3364_v22  ;;  %v2536_v26 = vrot.slane %v7098_v31, 1 }
 0x1ee   : > { %v5365_v1 = vpop.f32.mrf.mxu0  ;;  %v7083_v4 = vld [vmem:[#allocation2 + $0x78] sm:$0xff]  }
 0x1ef   : > { %v7075_v27 = vpop.f32.mrf.mxu1  ;;  %v7078_v2 = vadd.f32 %v5365_v1, %v1893_v29  ;;  %v3353_v29 = vrot.slane %v7793_v43, 1  ;;  %v3139_v1 = vor.u32 %v7747_v49, %v3135_v6  ;;  %v7748_v6 = vshll.u32 %v7083_v4, 16 }
 0x1f0   : > { %v2182_v7 = vpop.f32.mrf.mxu0 }
 0x1f1   : > { %v1906_v32 = vpop.f32.mrf.mxu1  ;;  %v7088_v21 = vadd.f32 %v2182_v7, %v6990_v37  ;;  %v3373_v7 = vrot.slane %v3371_v55, 1  ;;  %v3376_v37 = vrot.slane %v3374_v12, 2  ;;  %v3144_v44 = vsel %vm1561_vm1, %v3139_v1, %v3143_v17  ;;  %v7111_v1 = vld [vmem:[#allocation2 + $0x80] sm:$0xff]  }
 0x1f2   : > { %v5366_v32 = vpop.f32.mrf.mxu0  ;;  %3693 = vmatmul.mubr.bf16.gmra.mxu0 %v3343_v3  ;;  %v3355_v3 = vor.u32 %v3354_v50, %v3353_v29  ;;  %v3384_v55 = vshrl.u32 %v3144_v44, 16  ;;  %v3387_v12 = vshll.u32 %v3144_v44, 16  ;;  %v3367_v29 = vrot.slane %v7796_v53, 2 }
 0x1f3   : > { %v1909_v60 = vpop.f32.mrf.mxu1  ;;  %2795 = vmatmul.mubr.bf16.gmra.mxu1 %v2527_v51  ;;  %v7100_v46 = vadd.f32 %v5366_v32, %v1896_v57  ;;  %3700 = vmatprep.mubr.bf16.mxu0 %v3365_v36  ;;  %v7104_v51 = vld [vmem:[#allocation2 + $0x58] sm:$0xff]   ;;  %v3377_v49 = vor.u32 %v3376_v37, %v3373_v7  ;;  %v7749_v57 = vshrl.u32 %v7054_v20, 16  ;;  %v7795_v36 = vshrl.u32 %v6982_v38, 16 }
 0x1f4   : > { %2802 = vmatprep.mubr.bf16.mxu1 %v2533_v13  ;;  %v2530_v56 = vrot.slane %v7104_v51, 1  ;;  %v3151_v13 = vrot.slane %v7748_v6, 1  ;;  %v3356_v31 = vsel %vm3219_vm4, %v3342_v10, %v3355_v3  ;;  %v2537_v44 = vsel %vm2487_vm2, %v2532_v28, %v2536_v26  ;;  %v7125_v6 = vld [vmem:[#allocation2 + $0x70] sm:$0xff]  }
 0x1f5   : > { %v1911_v43 = vpop.f32.mrf.mxu1  ;;  %v3147_v7 = vor.u32 %v7749_v57, %v3143_v17  ;;  %v3389_v38 = vrot.slane %v3387_v12, 2  ;;  %v7750_v10 = vshll.u32 %v7111_v1, 16  ;;  %v7131_v57 = vld [vmem:[#allocation2 + $0x60] sm:$0xff]  }
 0x1f6   : > { %v3366_v43 = vrot.slane %v7795_v36, 1  ;;  %v2531_v50 = vsel %vm2487_vm2, %v2526_v34, %v2530_v56  ;;  %v3386_v36 = vrot.slane %v3384_v55, 1  ;;  %v7129_v34 = vpop.f32.mrf.mxu0  ;;  %v2534_v28 = vrot.slane %v7131_v57, 1 }
 0x1f7   : > { %v1912_v54 = vpop.f32.mrf.mxu1  ;;  %v3152_v53 = vsel %vm1561_vm1, %v3147_v7, %v3151_v13  ;;  %v2540_v55 = vrot.slane %v7125_v6, 1  ;;  %v7752_v7 = vshrl.u32 %v7083_v4, 16 }
 0x1f8   : > { %v3390_v12 = vor.u32 %v3389_v38, %v3386_v36  ;;  %v7798_v36 = vshrl.u32 %v7023_v5, 16  ;;  %v7799_v38 = vshll.u32 %v7023_v5, 16 }
 0x1f9   : > { %v1914_v32 = vpop.f32.mrf.mxu1  ;;  %v2541_v18 = vsel %vm2487_vm2, %v2536_v26, %v2540_v55 }
 0x1fa   : > { %3701 = vmatmul.mubr.bf16.gmra.mxu0 %v3356_v31  ;;  %v3378_v32 = vsel %vm3219_vm4, %v3364_v22, %v3377_v49 }
 0x1fb   : > { %v7121_v37 = vpop.f32.mrf.mxu1  ;;  %2803 = vmatmul.mubr.bf16.gmra.mxu1 %v2531_v50  ;;  %3708 = vmatprep.mubr.bf16.mxu0 %v3378_v32  ;;  %v3368_v50 = vor.u32 %v3367_v29, %v3366_v43  ;;  %v3400_v32 = vshll.u32 %v3152_v53, 16  ;;  %v2535_v43 = vsel %vm2487_vm2, %v2530_v56, %v2534_v28  ;;  %v3391_v56 = vsel %vm3219_vm4, %v3377_v49, %v3390_v12 }
 0x1fc   : > { %2810 = vmatprep.mubr.bf16.mxu1 %v2537_v44  ;;  %v3397_v44 = vshrl.u32 %v3152_v53, 16  ;;  %v3380_v53 = vrot.slane %v7799_v38, 2 }
 0x1fd   : > { %v1919_v17 = vpop.f32.mrf.mxu1  ;;  %v3369_v29 = vsel %vm3219_vm4, %v3355_v3, %v3368_v50  ;;  %v7157_v3 = vld [vmem:[#allocation2 + $0x78] sm:$0xff]  }
 0x1fe   : > { %v5369_v22 = vpop.f32.mrf.mxu0  ;;  %v3159_v17 = vrot.slane %v7750_v10, 1  ;;  %v2544_v49 = vrot.slane %v7157_v3, 1  ;;  %v7803_v3 = vshll.u32 %v7054_v20, 16 }
 0x1ff   : > { %v7134_v31 = vpop.f32.mrf.mxu1  ;;  %v7137_v8 = vadd.f32 %v5369_v22, %v1909_v60  ;;  %v3379_v60 = vrot.slane %v7798_v36, 1  ;;  %v3155_v22 = vor.u32 %v7752_v7, %v3151_v13  ;;  %v7753_v13 = vshll.u32 %v7142_v61, 16 }
 0x200   : > { %7797 = vst [vmem:[#allocation20_spill] sm:$0xff] %v7134_v31  ;;  %v2198_v15 = vpop.f32.mrf.mxu0 }
 0x201   : > { %v1922_v62 = vpop.f32.mrf.mxu1  ;;  %v7147_v6 = vadd.f32 %v2198_v15, %v7064_v45  ;;  %v3399_v15 = vrot.slane %v3397_v44, 1  ;;  %v3402_v45 = vrot.slane %v3400_v32, 2  ;;  %v3160_v5 = vsel %vm1561_vm1, %v3155_v22, %v3159_v17  ;;  %v7170_v22 = vld [vmem:[#allocation2 + $0x90] sm:$0xff]  }
 0x202   : > { %v5370_v62 = vpop.f32.mrf.mxu0  ;;  %3709 = vmatmul.mubr.bf16.gmra.mxu0 %v3369_v29  ;;  %v3381_v29 = vor.u32 %v3380_v53, %v3379_v60  ;;  %v3410_v44 = vshrl.u32 %v3160_v5, 16  ;;  %v3413_v32 = vshll.u32 %v3160_v5, 16  ;;  %v7802_v60 = vshrl.u32 %v7054_v20, 16 }
 0x203   : > { %v1925_v10 = vpop.f32.mrf.mxu1  ;;  %2811 = vmatmul.mubr.bf16.gmra.mxu1 %v2535_v43  ;;  %v7159_v25 = vadd.f32 %v5370_v62, %v1912_v54  ;;  %3716 = vmatprep.mubr.bf16.mxu0 %v3391_v56  ;;  %v7163_v43 = vld [vmem:[#allocation2 + $0x68] sm:$0xff]   ;;  %v3403_v7 = vor.u32 %v3402_v45, %v3399_v15  ;;  %v7754_v54 = vshrl.u32 %v7111_v1, 16  ;;  %v3393_v15 = vrot.slane %v7803_v3, 2 }
 0x204   : > { %2818 = vmatprep.mubr.bf16.mxu1 %v2541_v18  ;;  %7801 = vst [vmem:[#allocation22_spill] sm:$0xff] %v7163_v43  ;;  %v2538_v26 = vrot.slane %v7163_v43, 1  ;;  %v3167_v18 = vrot.slane %v7753_v13, 1  ;;  %v3392_v53 = vrot.slane %v7802_v60, 1  ;;  %v2545_v13 = vsel %vm2487_vm2, %v2540_v55, %v2544_v49  ;;  %v7188_v3 = vpop.f32.mrf.mxu0 }
 0x205   : > { %7800 = vst [vmem:[#allocation21_spill] sm:$0xff] %v7159_v25  ;;  %v1927_v36 = vpop.f32.mrf.mxu1  ;;  %v3163_v45 = vor.u32 %v7754_v54, %v3159_v17  ;;  %v3415_v31 = vrot.slane %v3413_v32, 2  ;;  %v7757_v60 = vshll.u32 %v7170_v22, 16  ;;  %v7190_v54 = vld [vmem:[#allocation2 + $0x70] sm:$0xff]  }
 0x206   : > { %v2539_v56 = vsel %vm2487_vm2, %v2534_v28, %v2538_v26  ;;  %v3382_v36 = vsel %vm3219_vm4, %v3368_v50, %v3381_v29  ;;  %v7184_v28 = vld [vmem:[#allocation2 + $0x80] sm:$0xff]   ;;  %v3412_v50 = vrot.slane %v3410_v44, 1  ;;  %7804 = vst [vmem:[#allocation23_spill] sm:$0xff] %v7190_v54  ;;  %v2542_v55 = vrot.slane %v7190_v54, 1 }
 0x207   : > { %v1928_v38 = vpop.f32.mrf.mxu1  ;;  %v3168_v20 = vsel %vm1561_vm1, %v3163_v45, %v3167_v18  ;;  %v2548_v44 = vrot.slane %v7184_v28, 1  ;;  %v7758_v45 = vshrl.u32 %v7142_v61, 16  ;;  %v7201_v25 = vld [vmem:[#allocation2 + $0x98] ss:$0 sps:$4 sm:$0x11]   ;;  %v7809_v28 = vshll.u32 %v7083_v4, 16 }
 0x208   : > { %v3416_v32 = vor.u32 %v3415_v31, %v3412_v50 }
 0x209   : > { %v1930_v62 = vpop.f32.mrf.mxu1  ;;  %v3406_v50 = vrot.slane %v7809_v28, 2  ;;  %v5655_v28 = vld [vmem:[#allocation2 + $0x78] sm:$0xff]  }
 0x20a   : > { %3717 = vmatmul.mubr.bf16.gmra.mxu0 %v3382_v36  ;;  %v3404_v62 = vsel %vm3219_vm4, %v3390_v12, %v3403_v7 }
 0x20b   : > { %v7180_v5 = vpop.f32.mrf.mxu1  ;;  %2819 = vmatmul.mubr.bf16.gmra.mxu1 %v2539_v56  ;;  %3724 = vmatprep.mubr.bf16.mxu0 %v3404_v62  ;;  %v3394_v56 = vor.u32 %v3393_v15, %v3392_v53  ;;  %v3426_v62 = vshll.u32 %v3168_v20, 16  ;;  %v2543_v53 = vsel %vm2487_vm2, %v2538_v26, %v2542_v55  ;;  %v7807_v15 = vshrl.u32 %v7083_v4, 16 }
 0x20c   : > { %2826 = vmatprep.mubr.bf16.mxu1 %v2545_v13  ;;  %v3423_v13 = vshrl.u32 %v3168_v20, 16  ;;  %v3171_v20 = vor.u32 %v7758_v45, %v3167_v18  ;;  %v3417_v26 = vsel %vm3219_vm4, %v3403_v7, %v3416_v32 }
 0x20d   : > { %v1935_v17 = vpop.f32.mrf.mxu1 }
 0x20e   : > { %v5373_v12 = vpop.f32.mrf.mxu0  ;;  %v3175_v17 = vrot.slane %v7757_v60, 1  ;;  %v2549_v60 = vsel %vm2487_vm2, %v2544_v49, %v2548_v44 }
 0x20f   : > { %v7193_v36 = vpop.f32.mrf.mxu1  ;;  %v7196_v0 = vadd.f32 %v5373_v12, %v1925_v10  ;;  %v3395_v10 = vsel %vm3219_vm4, %v3381_v29, %v3394_v56  ;;  %v7759_v29 = vshll.u32 %v7201_v25, 16 }
 0x210   : > { %7805 = vst [vmem:[#allocation24_spill] sm:$0xff] %v7193_v36  ;;  %v2214_v54 = vpop.f32.mrf.mxu0  ;;  %v3405_v36 = vrot.slane %v7807_v15, 1  ;;  %v5609_v15 = vld [vmem:[#allocation2 + $0x88] sm:$0xff]   ;;  %v3176_v4 = vsel %vm1561_vm1, %v3171_v20, %v3175_v17 }
 0x211   : > { %7806 = vst [vmem:[#allocation25_spill] sm:$0xff] %v7196_v0  ;;  %v1938_v43 = vpop.f32.mrf.mxu1  ;;  %v7207_v31 = vadd.f32 %v2214_v54, %v7121_v37  ;;  %v3425_v0 = vrot.slane %v3423_v13, 1  ;;  %v3428_v37 = vrot.slane %v3426_v62, 2  ;;  %v2552_v49 = vrot.slane %v5609_v15, 1 }
 0x212   : > { %v5374_v43 = vpop.f32.mrf.mxu0  ;;  %3725 = vmatmul.mubr.bf16.gmra.mxu0 %v3395_v10  ;;  %v3407_v45 = vor.u32 %v3406_v50, %v3405_v36  ;;  %v3436_v47 = vshrl.u32 %v3176_v4, 16  ;;  %v3439_v7 = vshll.u32 %v3176_v4, 16  ;;  %v3177_v13 = vshrl.u32 %v7170_v22, 16 }
 0x213   : > { %7808 = vst [vmem:[#allocation26_spill] sm:$0xff] %v7207_v31  ;;  %v1941_v12 = vpop.f32.mrf.mxu1  ;;  %2827 = vmatmul.mubr.bf16.gmra.mxu1 %v2543_v53  ;;  %v7216_v54 = vadd.f32 %v5374_v43, %v1928_v38  ;;  %3732 = vmatprep.mubr.bf16.mxu0 %v3417_v26  ;;  %v2546_v53 = vrot.slane %v5655_v28, 1  ;;  %v3429_v10 = vor.u32 %v3428_v37, %v3425_v0  ;;  %v3183_v38 = vrot.slane %v7759_v29, 1 }
 0x214   : > { %2834 = vmatprep.mubr.bf16.mxu1 %v2549_v60  ;;  %v3408_v20 = vsel %vm3219_vm4, %v3394_v56, %v3407_v45  ;;  %v7811_v43 = vshrl.u32 %v7111_v1, 16  ;;  %v7812_v36 = vshll.u32 %v7111_v1, 16  ;;  %v3179_v15 = vor.u32 %v3177_v13, %v3175_v17 }
 0x215   : > { %7810 = vst [vmem:[#allocation27_spill] sm:$0xff] %v7216_v54  ;;  %v1943_v18 = vpop.f32.mrf.mxu1  ;;  %v2547_v62 = vsel %vm2487_vm2, %v2542_v55, %v2546_v53  ;;  %v2553_v37 = vsel %vm2487_vm2, %v2548_v44, %v2552_v49  ;;  %v3430_v4 = vsel %vm3219_vm4, %v3416_v32, %v3429_v10  ;;  %v3438_v28 = vrot.slane %v3436_v47, 1 }
 0x216   : > { %v3418_v26 = vrot.slane %v7811_v43, 1  ;;  %v3419_v50 = vrot.slane %v7812_v36, 2  ;;  %v5613_v18 = vld [vmem:[#allocation2 + $0x90] sm:$0xff]   ;;  %v3441_v55 = vrot.slane %v3439_v7, 2  ;;  %v3184_v56 = vsel %vm1561_vm1, %v3179_v15, %v3183_v38 }
 0x217   : > { %v1944_v31 = vpop.f32.mrf.mxu1  ;;  %v3449_v44 = vshrl.u32 %v3184_v56, 16  ;;  %v7813_v7 = vrot.slane %v6515_v59, 1 }
 0x218   : > { %v3420_v43 = vor.u32 %v3419_v50, %v3418_v26  ;;  %v3442_v29 = vor.u32 %v3441_v55, %v3438_v28  ;;  %v7814_v50 = vshrl.u32 %v7142_v61, 16 }
 0x219   : > { %v1946_v60 = vpop.f32.mrf.mxu1 }
 0x21a   : > { %3733 = vmatmul.mubr.bf16.gmra.mxu0 %v3408_v20  ;;  %v7234_v60 = vpop.f32.mrf.mxu0  ;;  %v3452_v20 = vshll.u32 %v3184_v56, 16  ;;  %v3421_v26 = vsel %vm3219_vm4, %v3407_v45, %v3420_v43  ;;  %v3431_v15 = vrot.slane %v7814_v50, 1  ;;  %v3443_v59 = vsel %vm3219_vm4, %v3429_v10, %v3442_v29 }
 0x21b   : > { %v7229_v0 = vpop.f32.mrf.mxu1  ;;  %2835 = vmatmul.mubr.bf16.gmra.mxu1 %v2547_v62  ;;  %3740 = vmatprep.mubr.bf16.mxu0 %v3430_v4  ;;  %v2556_v62 = vrot.slane %v5613_v18, 1  ;;  %v7815_v4 = vshll.u32 %v7142_v61, 16 }
 0x21c   : > { %2842 = vmatprep.mubr.bf16.mxu1 %v2553_v37  ;;  %v2551_v37 = vsel %vm2487_vm2, %v2546_v53, %v7813_v7  ;;  %v3451_v53 = vrot.slane %v3449_v44, 1  ;;  %v3454_v56 = vrot.slane %v3452_v20, 2 }
 0x21d   : > { %v1951_v1 = vpop.f32.mrf.mxu1  ;;  %v3432_v18 = vrot.slane %v7815_v4, 2  ;;  %v2557_v55 = vsel %vm2487_vm2, %v2552_v49, %v2556_v62  ;;  %v7816_v49 = vshll.u32 %v7170_v22, 16 }
 0x21e   : > { %v5377_v36 = vpop.f32.mrf.mxu0 }
 0x21f   : > { %v7236_v17 = vpop.f32.mrf.mxu1  ;;  %v7238_v54 = vadd.f32 %v5377_v36, %v1941_v12  ;;  %v3433_v1 = vor.u32 %v3432_v18, %v3431_v15 }
 0x220   : > { %v2230_v47 = vpop.f32.mrf.mxu0 }
 0x221   : > { %v1954_v32 = vpop.f32.mrf.mxu1  ;;  %v7244_v38 = vadd.f32 %v2230_v47, %v7180_v5  ;;  %v3185_v47 = vshrl.u32 %v7201_v25, 16  ;;  %v3434_v7 = vsel %vm3219_vm4, %v3420_v43, %v3433_v1 }
 0x222   : > { %v5378_v12 = vpop.f32.mrf.mxu0  ;;  %3741 = vmatmul.mubr.bf16.gmra.mxu0 %v3421_v26  ;;  %v3455_v32 = vor.u32 %v3454_v56, %v3451_v53  ;;  %v3445_v26 = vrot.slane %v7816_v49, 2 }
 0x223   : > { %v1957_v28 = vpop.f32.mrf.mxu1  ;;  %2843 = vmatmul.mubr.bf16.gmra.mxu1 %v2551_v37  ;;  %v7253_v5 = vadd.f32 %v5378_v12, %v1944_v31  ;;  %3748 = vmatprep.mubr.bf16.mxu0 %v3443_v59  ;;  %v3444_v37 = vrot.slane %v3177_v13, 1  ;;  %v3460_v50 = vshll.u32 %v3185_v47, 16 }
 0x224   : > { %2850 = vmatprep.mubr.bf16.mxu1 %v2557_v55  ;;  %v3456_v31 = vsel %vm3219_vm4, %v3442_v29, %v3455_v32  ;;  %v7261_v44 = vpop.f32.mrf.mxu0 }
 0x225   : > { %v1959_v45 = vpop.f32.mrf.mxu1  ;;  %v3446_v15 = vor.u32 %v3445_v26, %v3444_v37  ;;  %v3462_v12 = vrot.slane %v3460_v50, 2  ;;  %v5657_v26 = vld [vmem:[#allocation2 + $0x20] sm:$0xff]  }
 0x226   : > { %v5656_v45 = vld [vmem:[#allocation2 + $0x18] sm:$0xff]  }
 0x227   : > { %v1960_v36 = vpop.f32.mrf.mxu1  ;;  %v3463_v53 = vsel %vm3219_vm4, %v3455_v32, %v3462_v12 }
 0x229   : > { %v1962_v61 = vpop.f32.mrf.mxu1 }
 0x22a   : > { %3749 = vmatmul.mubr.bf16.gmra.mxu0 %v3434_v7  ;;  %v3883_v61 = vrot.slane %v5656_v45, 2  ;;  %v3882_v7 = vrot.slane %v6641_v33, 2 }
 0x22b   : > { %v1965_v10 = vpop.f32.mrf.mxu1  ;;  %2851 = vmatmul.mubr.bf16.gmra.mxu1 %v6680_v48  ;;  %3756 = vmatprep.mubr.bf16.mxu0 %v3456_v31  ;;  %v3447_v48 = vsel %vm3219_vm4, %v3433_v1, %v3446_v15  ;;  %v3888_v31 = vrot.slane %v5657_v26, 2 }
 0x22c   : > { %2858 = vmatprep.mubr.bf16.mxu1 %v2556_v62  ;;  %v7817_v62 = vrot.slane %v6544_v39, 1  ;;  %v3884_v37 = vsel %vm3881_vm5, %v3882_v7, %v3883_v61 }
 0x22d   : > { %v1967_v20 = vpop.f32.mrf.mxu1 }
 0x22e   : > { %v5381_v18 = vpop.f32.mrf.mxu0 }
 0x22f   : > { %v1968_v4 = vpop.f32.mrf.mxu1  ;;  %v7263_v43 = vadd.f32 %v5381_v18, %v1957_v28 }
 0x230   : > { %v2246_v22 = vpop.f32.mrf.mxu0 }
 0x231   : > { %v1970_v13 = vpop.f32.mrf.mxu1  ;;  %v7266_v55 = vadd.f32 %v2246_v22, %v7229_v0  ;;  %v7818_v0 = vshll.u32 %v7201_v25, 16 }
 0x232   : > { %v5382_v59 = vpop.f32.mrf.mxu0  ;;  %3757 = vmatmul.mubr.bf16.gmra.mxu0 %v3447_v48 }
 0x233   : > { %v1973_v29 = vpop.f32.mrf.mxu1  ;;  %2859 = vmatmul.mubr.bf16.gmra.mxu1 %v7817_v62  ;;  %v7272_v56 = vadd.f32 %v5382_v59, %v1960_v36  ;;  %3764 = vmatprep.mubr.bf16.mxu0 %v3463_v53  ;;  %v3457_v47 = vrot.slane %v7818_v0, 2  ;;  %v5658_v53 = vld [vmem:[#allocation2 + $0x28] sm:$0xff]  }
 0x234   : > { %4120 = vmatprep.mubr.bf16.mxu1 %v6809_v52  ;;  %v7281_v52 = vpop.f32.mrf.mxu0 }
 0x235   : > { %v1975_v28 = vpop.f32.mrf.mxu1  ;;  %v3458_v49 = vsel %vm3219_vm4, %v3446_v15, %v3457_v47  ;;  %v3889_v15 = vsel %vm3881_vm5, %v3883_v61, %v3888_v31  ;;  %v5659_v47 = vld [vmem:[#allocation2 + $0x30] sm:$0xff]  }
 0x237   : > { %v1976_v1 = vpop.f32.mrf.mxu1 }
 0x239   : > { %v1978_v39 = vpop.f32.mrf.mxu1 }
 0x23a   : > { %3765 = vmatmul.mubr.bf16.gmra.mxu0 %v3458_v49 }
 0x23b   : > { %v1981_v32 = vpop.f32.mrf.mxu1  ;;  %4121 = vmatmul.mubr.bf16.vlgmr.msra.gmra.mxu1 %v3884_v37 }
 0x23c   : > { %4128 = vmatprep.mubr.bf16.mxu1 %v6760_v16 }
 0x23d   : > { %v1983_v36 = vpop.f32.mrf.mxu1 }
 0x23e   : > { %v5385_v20 = vpop.f32.mrf.mxu0 }
 0x23f   : > { %v1984_v25 = vpop.f32.mrf.mxu1  ;;  %v7283_v50 = vadd.f32 %v5385_v20, %v1973_v29  ;;  %v3892_v29 = vrot.slane %v5658_v53, 2  ;;  %v3904_v53 = vrot.slane %v7010_v42, 2 }
 0x240   : > { %v2262_v18 = vpop.f32.mrf.mxu0 }
 0x241   : > { %v1986_v33 = vpop.f32.mrf.mxu1  ;;  %v7285_v13 = vadd.f32 %v2262_v18, %v1965_v10  ;;  %v3893_v10 = vsel %vm3881_vm5, %v3888_v31, %v3892_v29 }
 0x242   : > { %v5386_v12 = vpop.f32.mrf.mxu0 }
 0x243   : > { %v1989_v22 = vpop.f32.mrf.mxu1  ;;  %4129 = vmatmul.mubr.bf16.gmra.mxu1 %v3889_v15  ;;  %v7288_v48 = vadd.f32 %v5386_v12, %v1976_v1  ;;  %v3896_v1 = vrot.slane %v5659_v47, 2  ;;  %v3900_v15 = vrot.slane %v6971_v14, 2 }
 0x244   : > { %4136 = vmatprep.mubr.bf16.mxu1 %v6776_v63  ;;  %v2265_v62 = vpop.f32.mrf.mxu0 }
 0x245   : > { %v1991_v16 = vpop.f32.mrf.mxu1  ;;  %v7291_v59 = vadd.f32 %v2265_v62, %v1968_v4  ;;  %v3897_v36 = vsel %vm3881_vm5, %v3892_v29, %v3896_v1  ;;  %v3905_v14 = vsel %vm3881_vm5, %v3900_v15, %v3904_v53 }
 0x247   : > { %v1992_v28 = vpop.f32.mrf.mxu1 }
 0x249   : > { %v1994_v45 = vpop.f32.mrf.mxu1 }
 0x24b   : > { %v1997_v0 = vpop.f32.mrf.mxu1  ;;  %4137 = vmatmul.mubr.bf16.gmra.mxu1 %v3893_v10 }
 0x24c   : > { %4144 = vmatprep.mubr.bf16.mxu1 %v6790_v40 }
 0x24d   : > { %v1999_v61 = vpop.f32.mrf.mxu1 }
 0x24e   : > { %v5389_v39 = vpop.f32.mrf.mxu0 }
 0x24f   : > { %v2000_v7 = vpop.f32.mrf.mxu1  ;;  %v7295_v63 = vadd.f32 %v5389_v39, %v1989_v22 }
 0x250   : > { %v2278_v4 = vpop.f32.mrf.mxu0 }
 0x251   : > { %v2002_v37 = vpop.f32.mrf.mxu1  ;;  %v7297_v49 = vadd.f32 %v2278_v4, %v1981_v32  ;;  %v3901_v32 = vsel %vm3881_vm5, %v3896_v1, %v3900_v15 }
 0x252   : > { %v5390_v31 = vpop.f32.mrf.mxu0  ;;  %v3908_v37 = vrot.slane %v7046_v23, 2  ;;  %v3912_v23 = vrot.slane %v7072_v19, 2 }
 0x253   : > { %v2005_v26 = vpop.f32.mrf.mxu1  ;;  %4145 = vmatmul.mubr.bf16.gmra.mxu1 %v3897_v36  ;;  %v7300_v20 = vadd.f32 %v5390_v31, %v1992_v28 }
 0x254   : > { %4152 = vmatprep.mubr.bf16.mxu1 %v6797_v41  ;;  %v2281_v33 = vpop.f32.mrf.mxu0 }
 0x255   : > { %v2007_v40 = vpop.f32.mrf.mxu1  ;;  %v7303_v18 = vadd.f32 %v2281_v33, %v1984_v25 }
 0x257   : > { %v2008_v22 = vpop.f32.mrf.mxu1 }
 0x259   : > { %v2010_v12 = vpop.f32.mrf.mxu1 }
 0x25b   : > { %v2013_v16 = vpop.f32.mrf.mxu1  ;;  %4153 = vmatmul.mubr.bf16.gmra.mxu1 %v3901_v32 }
 0x25c   : > { %4160 = vmatprep.mubr.bf16.mxu1 %v6812_v9 }
 0x25d   : > { %v2015_v62 = vpop.f32.mrf.mxu1 }
 0x25e   : > { %v5393_v28 = vpop.f32.mrf.mxu0 }
 0x25f   : > { %v2016_v29 = vpop.f32.mrf.mxu1  ;;  %v7309_v41 = vadd.f32 %v5393_v28, %v2005_v26 }
 0x260   : > { %v2294_v25 = vpop.f32.mrf.mxu0 }
 0x261   : > { %v2018_v45 = vpop.f32.mrf.mxu1  ;;  %v7311_v10 = vadd.f32 %v2294_v25, %v1997_v0  ;;  %v3909_v0 = vsel %vm3881_vm5, %v3904_v53, %v3908_v37 }
 0x262   : > { %v5394_v47 = vpop.f32.mrf.mxu0 }
 0x263   : > { %v2021_v61 = vpop.f32.mrf.mxu1  ;;  %4161 = vmatmul.mubr.bf16.gmra.mxu1 %v3905_v14  ;;  %v7314_v1 = vadd.f32 %v5394_v47, %v2008_v22 }
 0x264   : > { %4168 = vmatprep.mubr.bf16.mxu1 %v6817_v24  ;;  %v2297_v39 = vpop.f32.mrf.mxu0 }
 0x265   : > { %v2023_v9 = vpop.f32.mrf.mxu1  ;;  %v7317_v42 = vadd.f32 %v2297_v39, %v2000_v7  ;;  %v2186_v7 = vadd.f32 %v7129_v34, %v7016_v11 }
 0x267   : > { %v2024_v4 = vpop.f32.mrf.mxu1 }
 0x269   : > { %v2026_v36 = vpop.f32.mrf.mxu1 }
 0x26a   : > { %v5397_v31 = vpop.f32.mrf.mxu0 }
 0x26b   : > { %v2724_v26 = vpop.f32.mrf.mxu1  ;;  %4169 = vmatmul.mubr.bf16.gmra.mxu1 %v3909_v0  ;;  %v7322_v33 = vadd.f32 %v5397_v31, %v2021_v61  ;;  %v3916_v61 = vrot.slane %v7104_v51, 2 }
 0x26c   : > { %v2867_v40 = vadd.f32 %v2724_v26, %v7088_v21  ;;  %4176 = vmatprep.mubr.bf16.mxu1 %v6820_v35  ;;  %v2310_v15 = vpop.f32.mrf.mxu0  ;;  %v3913_v35 = vsel %vm3881_vm5, %v3908_v37, %v3912_v23 }
 0x26d   : > { %v2726_v24 = vpop.f32.mrf.mxu1  ;;  %v7327_v22 = vadd.f32 %v2310_v15, %v2013_v16  ;;  %v3917_v36 = vsel %vm3881_vm5, %v3912_v23, %v3916_v61 }
 0x26e   : > { %v5398_v32 = vpop.f32.mrf.mxu0 }
 0x26f   : > { %v2727_v12 = vpop.f32.mrf.mxu1  ;;  %v7330_v53 = vadd.f32 %v5398_v32, %v2024_v4 }
 0x270   : > { %v2868_v62 = vadd.f32 %v2727_v12, %v2186_v7  ;;  %v2313_v21 = vpop.f32.mrf.mxu0 }
 0x271   : > { %v2729_v28 = vpop.f32.mrf.mxu1  ;;  %v7332_v45 = vadd.f32 %v2313_v21, %v2016_v29 }
 0x272   : > { %v3630_v14 = vpop.f32.mrf.mxu0 }
 0x273   : > { %v2732_v25 = vpop.f32.mrf.mxu1  ;;  %4177 = vmatmul.mubr.bf16.gmra.mxu1 %v3913_v35  ;;  %v7336_v34 = vadd.f32 %v3630_v14, %v2867_v40  ;;  %v3920_v40 = vrot.slane %v7131_v57, 2  ;;  %v7819_v35 = vld [vmem:[#allocation7_spill] sm:$0xff] }
 0x274   : > { %v2869_v11 = vadd.f32 %v2732_v25, %v7078_v2  ;;  %4184 = vmatprep.mubr.bf16.mxu1 %v6828_v30  ;;  %v3632_v16 = vpop.f32.mrf.mxu0 }
 0x275   : > { %v2734_v19 = vpop.f32.mrf.mxu1 }
 0x276   : > { %v3633_v9 = vpop.f32.mrf.mxu0  ;;  %v7821_v19 = vld [vmem:[#allocation21_spill] sm:$0xff] }
 0x277   : > { %v2735_v47 = vpop.f32.mrf.mxu1  ;;  %v7341_v39 = vadd.f32 %v3633_v9, %v2868_v62 }
 0x278   : > { %v2870_v29 = vadd.f32 %v2735_v47, %v7100_v46  ;;  %v3635_v4 = vpop.f32.mrf.mxu0  ;;  %v2202_v46 = vadd.f32 %v7188_v3, %v7075_v27  ;;  %v7820_v3 = vld [vmem:[#allocation22_spill] sm:$0xff] }
 0x279   : > { %v2737_v37 = vpop.f32.mrf.mxu1  ;;  %v3924_v25 = vrot.slane %v7820_v3, 2  ;;  %v7822_v4 = vld [vmem:[#allocation26_spill] sm:$0xff] }
 0x27a   : > { %v3638_v2 = vpop.f32.mrf.mxu0 }
 0x27b   : > { %v2740_v0 = vpop.f32.mrf.mxu1  ;;  %4185 = vmatmul.mubr.bf16.gmra.mxu1 %v3917_v36  ;;  %v7345_v30 = vadd.f32 %v3638_v2, %v2869_v11  ;;  %v7823_v2 = vld [vmem:[#allocation8_spill] sm:$0xff] }
 0x27c   : > { %v2871_v26 = vadd.f32 %v2740_v0, %v7147_v6  ;;  %4192 = vmatprep.mubr.bf16.mxu1 %v6842_v58  ;;  %v3640_v31 = vpop.f32.mrf.mxu0  ;;  %v3921_v6 = vsel %vm3881_vm5, %v3916_v61, %v3920_v40 }
 0x27d   : > { %v2742_v51 = vpop.f32.mrf.mxu1  ;;  %v7824_v31 = vld [vmem:[#allocation20_spill] sm:$0xff] }
 0x27e   : > { %v3641_v15 = vpop.f32.mrf.mxu0 }
 0x27f   : > { %v2743_v24 = vpop.f32.mrf.mxu1  ;;  %v7351_v23 = vadd.f32 %v3641_v15, %v2870_v29  ;;  %v3925_v29 = vsel %vm3881_vm5, %v3920_v40, %v3924_v25 }
 0x280   : > { %v2872_v7 = vadd.f32 %v2743_v24, %v2202_v46  ;;  %v3643_v32 = vpop.f32.mrf.mxu0  ;;  %v2218_v46 = vadd.f32 %v7234_v60, %v7824_v31  ;;  %v7825_v24 = vld [vmem:[#allocation23_spill] sm:$0xff] }
 0x281   : > { %v2745_v12 = vpop.f32.mrf.mxu1  ;;  %v3928_v15 = vrot.slane %v7825_v24, 2 }
 0x282   : > { %v3646_v28 = vpop.f32.mrf.mxu0 }
 0x283   : > { %v2748_v62 = vpop.f32.mrf.mxu1  ;;  %4193 = vmatmul.mubr.bf16.gmra.mxu1 %v3921_v6  ;;  %v7355_v21 = vadd.f32 %v3646_v28, %v2871_v26  ;;  %v3929_v28 = vsel %vm3881_vm5, %v3924_v25, %v3928_v15  ;;  %v7829_v25 = vld [vmem:[#allocation6_spill] sm:$0xff] }
 0x284   : > { %v2873_v58 = vadd.f32 %v2748_v62, %v7137_v8  ;;  %4200 = vmatprep.mubr.bf16.mxu1 %v7819_v35  ;;  %v3648_v57 = vpop.f32.mrf.mxu0 }
 0x285   : > { %v2750_v27 = vpop.f32.mrf.mxu1 }
 0x286   : > { %v3649_v11 = vpop.f32.mrf.mxu0  ;;  %v7826_v27 = vld [vmem:[#allocation25_spill] sm:$0xff] }
 0x287   : > { %v2751_v14 = vpop.f32.mrf.mxu1  ;;  %v7360_v47 = vadd.f32 %v3649_v11, %v2872_v7 }
 0x288   : > { %v2874_v16 = vadd.f32 %v2751_v14, %v7821_v19  ;;  %v3651_v9 = vpop.f32.mrf.mxu0  ;;  %v7827_v14 = vld [vmem:[#allocation9_spill] sm:$0xff] }
 0x289   : > { %v2753_v61 = vpop.f32.mrf.mxu1  ;;  %v7828_v9 = vld [vmem:[#allocation27_spill] sm:$0xff] }
 0x28a   : > { %v3654_v8 = vpop.f32.mrf.mxu0 }
 0x28b   : > { %v2756_v37 = vpop.f32.mrf.mxu1  ;;  %4201 = vmatmul.mubr.bf16.gmra.mxu1 %v3925_v29  ;;  %v7364_v0 = vadd.f32 %v3654_v8, %v2873_v58 }
 0x28c   : > { %v2875_v36 = vadd.f32 %v2756_v37, %v7822_v4  ;;  %4208 = vmatprep.mubr.bf16.mxu1 %v7823_v2  ;;  %v3656_v51 = vpop.f32.mrf.mxu0  ;;  %v7830_v4 = vrot.slane %v7829_v25, 2 }
 0x28d   : > { %v2758_v26 = vpop.f32.mrf.mxu1 }
 0x28e   : > { %v3657_v12 = vpop.f32.mrf.mxu0  ;;  %v3933_v2 = vsel %vm3881_vm5, %v3928_v15, %v7830_v4 }
 0x28f   : > { %v2759_v7 = vpop.f32.mrf.mxu1  ;;  %v7370_v40 = vadd.f32 %v3657_v12, %v2874_v16  ;;  %v7832_v12 = vld [vmem:[#allocation24_spill] sm:$0xff] }
 0x290   : > { %v2876_v32 = vadd.f32 %v2759_v7, %v2218_v46  ;;  %v3659_v62 = vpop.f32.mrf.mxu0  ;;  %v7831_v46 = vld [vmem:[#allocation10_spill] sm:$0xff] }
 0x291   : > { %v2761_v6 = vpop.f32.mrf.mxu1 }
 0x292   : > { %v3662_v35 = vpop.f32.mrf.mxu0 }
 0x293   : > { %v2764_v58 = vpop.f32.mrf.mxu1  ;;  %4209 = vmatmul.mubr.bf16.gmra.mxu1 %v3929_v28  ;;  %v7374_v3 = vadd.f32 %v3662_v35, %v2875_v36 }
 0x294   : > { %v2877_v57 = vadd.f32 %v2764_v58, %v7826_v27  ;;  %4216 = vmatprep.mubr.bf16.mxu1 %v7827_v14  ;;  %v3664_v11 = vpop.f32.mrf.mxu0  ;;  %v7833_v14 = vld [vmem:[#allocation11_spill] sm:$0xff] }
 0x295   : > { %v2766_v60 = vpop.f32.mrf.mxu1  ;;  %v7834_v11 = vld [vmem:[#allocation16_spill] sm:$0xff] }
 0x296   : > { %v3665_v61 = vpop.f32.mrf.mxu0 }
 0x297   : > { %v2767_v19 = vpop.f32.mrf.mxu1  ;;  %v7378_v29 = vadd.f32 %v3665_v61, %v2876_v32  ;;  %v2234_v32 = vadd.f32 %v7261_v44, %v7832_v12 }
 0x298   : > { %v2878_v16 = vadd.f32 %v2767_v19, %v7828_v9  ;;  %v3667_v8 = vpop.f32.mrf.mxu0 }
 0x299   : > { %v2769_v37 = vpop.f32.mrf.mxu1 }
 0x29a   : > { %v3670_v36 = vpop.f32.mrf.mxu0 }
 0x29b   : > { %v2772_v26 = vpop.f32.mrf.mxu1  ;;  %4217 = vmatmul.mubr.bf16.gmra.mxu1 %v3933_v2  ;;  %v7384_v31 = vadd.f32 %v3670_v36, %v2877_v57  ;;  %v7835_v2 = vld [vmem:[#allocation12_spill] sm:$0xff] }
 0x29c   : > { %v2879_v51 = vadd.f32 %v2772_v26, %v7244_v38  ;;  %4224 = vmatprep.mubr.bf16.mxu1 %v7831_v46  ;;  %v3672_v7 = vpop.f32.mrf.mxu0 }
 0x29d   : > { %v2774_v24 = vpop.f32.mrf.mxu1  ;;  %v2250_v7 = vadd.f32 %v7281_v52, %v7236_v17 }
 0x29e   : > { %v3673_v62 = vpop.f32.mrf.mxu0 }
 0x29f   : > { %v2775_v6 = vpop.f32.mrf.mxu1  ;;  %v7389_v58 = vadd.f32 %v3673_v62, %v2878_v16 }
 0x2a0   : > { %v2880_v28 = vadd.f32 %v2775_v6, %v2234_v32  ;;  %v3675_v35 = vpop.f32.mrf.mxu0 }
 0x2a1   : > { %v2777_v15 = vpop.f32.mrf.mxu1  ;;  %v7837_v35 = vld [vmem:[#allocation13_spill] sm:$0xff] }
 0x2a2   : > { %v3678_v38 = vpop.f32.mrf.mxu0 }
 0x2a3   : > { %v2780_v27 = vpop.f32.mrf.mxu1  ;;  %4225 = vmatmul.mubr.bf16.gmra.mxu1 %v7833_v14  ;;  %v7393_v60 = vadd.f32 %v3678_v38, %v2879_v51  ;;  %v7836_v51 = vld [vmem:[#allocation17_spill] sm:$0xff]  ;;  %v7838_v38 = vld [vmem:[#allocation18_spill] sm:$0xff] }
 0x2a4   : > { %v2881_v57 = vadd.f32 %v2780_v27, %v7238_v54  ;;  %4232 = vmatprep.mubr.bf16.mxu1 %v7834_v11  ;;  %v3680_v61 = vpop.f32.mrf.mxu0 }
 0x2a5   : > { %v2782_v19 = vpop.f32.mrf.mxu1 }
 0x2a6   : > { %v3681_v9 = vpop.f32.mrf.mxu0 }
 0x2a7   : > { %v2783_v44 = vpop.f32.mrf.mxu1  ;;  %v7397_v16 = vadd.f32 %v3681_v9, %v2880_v28 }
 0x2a8   : > { %v2882_v37 = vadd.f32 %v2783_v44, %v7253_v5  ;;  %v3683_v25 = vpop.f32.mrf.mxu0 }
 0x2a9   : > { %v2785_v8 = vpop.f32.mrf.mxu1 }
 0x2aa   : > { %v3686_v26 = vpop.f32.mrf.mxu0  ;;  %v7839_v8 = vld [vmem:[#allocation14_spill] sm:$0xff] }
 0x2ab   : > { %v2788_v4 = vpop.f32.mrf.mxu1  ;;  %4233 = vmatmul.mubr.bf16.gmra.mxu1 %v7835_v2  ;;  %v7401_v36 = vadd.f32 %v3686_v26, %v2881_v57  ;;  %v7840_v2 = vld [vmem:[#allocation19_spill] sm:$0xff] }
 0x2ac   : > { %v2883_v54 = vadd.f32 %v2788_v4, %v7266_v55  ;;  %4240 = vmatprep.mubr.bf16.mxu1 %v7836_v51  ;;  %v3688_v24 = vpop.f32.mrf.mxu0 }
 0x2ad   : > { %v2790_v46 = vpop.f32.mrf.mxu1 }
 0x2ae   : > { %v3689_v12 = vpop.f32.mrf.mxu0 }
 0x2af   : > { %v2791_v5 = vpop.f32.mrf.mxu1  ;;  %v7406_v6 = vadd.f32 %v3689_v12, %v2882_v37 }
 0x2b0   : > { %v2884_v32 = vadd.f32 %v2791_v5, %v2250_v7  ;;  %v3691_v28 = vpop.f32.mrf.mxu0 }
 0x2b1   : > { %v2793_v62 = vpop.f32.mrf.mxu1 }
 0x2b2   : > { %v3694_v55 = vpop.f32.mrf.mxu0 }
 0x2b3   : > { %v2796_v15 = vpop.f32.mrf.mxu1  ;;  %4241 = vmatmul.mubr.bf16.gmra.mxu1 %v7837_v35  ;;  %v7410_v14 = vadd.f32 %v3694_v55, %v2883_v54 }
 0x2b4   : > { %v2885_v27 = vadd.f32 %v2796_v15, %v7263_v43  ;;  %4248 = vmatprep.mubr.bf16.mxu1 %v7838_v38  ;;  %v3696_v11 = vpop.f32.mrf.mxu0 }
 0x2b5   : > { %v2798_v57 = vpop.f32.mrf.mxu1 }
 0x2b6   : > { %v3697_v52 = vpop.f32.mrf.mxu0 }
 0x2b7   : > { %v2799_v17 = vpop.f32.mrf.mxu1  ;;  %v7414_v61 = vadd.f32 %v3697_v52, %v2884_v32  ;;  %v7841_v32 = vld [vmem:[#allocation15_spill] sm:$0xff] }
 0x2b8   : > { %v2886_v19 = vadd.f32 %v2799_v17, %v7272_v56  ;;  %v3699_v9 = vpop.f32.mrf.mxu0 }
 0x2b9   : > { %v2801_v44 = vpop.f32.mrf.mxu1 }
 0x2ba   : > { %v3702_v25 = vpop.f32.mrf.mxu0 }
 0x2bb   : > { %v2804_v37 = vpop.f32.mrf.mxu1  ;;  %4249 = vmatmul.mubr.bf16.gmra.mxu1 %v7839_v8  ;;  %v7418_v4 = vadd.f32 %v3702_v25, %v2885_v27 }
 0x2bc   : > { %v2887_v43 = vadd.f32 %v2804_v37, %v7285_v13  ;;  %4256 = vmatprep.mubr.bf16.mxu1 %v7840_v2  ;;  %v3704_v54 = vpop.f32.mrf.mxu0 }
 0x2bd   : > { %v2806_v26 = vpop.f32.mrf.mxu1 }
 0x2be   : > { %v3705_v46 = vpop.f32.mrf.mxu0 }
 0x2bf   : > { %v2807_v51 = vpop.f32.mrf.mxu1  ;;  %v7422_v24 = vadd.f32 %v3705_v46, %v2886_v19 }
 0x2c0   : > { %v2888_v56 = vadd.f32 %v2807_v51, %v7291_v59  ;;  %v3707_v5 = vpop.f32.mrf.mxu0 }
 0x2c1   : > { %v2809_v7 = vpop.f32.mrf.mxu1 }
 0x2c2   : > { %v3710_v62 = vpop.f32.mrf.mxu0 }
 0x2c3   : > { %v2812_v12 = vpop.f32.mrf.mxu1  ;;  %4257 = vmatmul.mubr.bf16.gmra.mxu1 %v7841_v32  ;;  %v7426_v28 = vadd.f32 %v3710_v62, %v2887_v43 }
 0x2c4   : > { %v2889_v13 = vadd.f32 %v2812_v12, %v7283_v50  ;;  %v3712_v35 = vpop.f32.mrf.mxu0 }
 0x2c5   : > { %v2814_v15 = vpop.f32.mrf.mxu1 }
 0x2c6   : > { %v3713_v27 = vpop.f32.mrf.mxu0 }
 0x2c7   : > { %v2815_v55 = vpop.f32.mrf.mxu1  ;;  %v7429_v57 = vadd.f32 %v3713_v27, %v2888_v56 }
 0x2c8   : > { %v2890_v38 = vadd.f32 %v2815_v55, %v7288_v48  ;;  %v3715_v11 = vpop.f32.mrf.mxu0 }
 0x2c9   : > { %v2817_v59 = vpop.f32.mrf.mxu1 }
 0x2ca   : > { %v3718_v52 = vpop.f32.mrf.mxu0 }
 0x2cb   : > { %v2820_v17 = vpop.f32.mrf.mxu1  ;;  %v7432_v44 = vadd.f32 %v3718_v52, %v2889_v13 }
 0x2cc   : > { %v2891_v19 = vadd.f32 %v2820_v17, %v7297_v49  ;;  %v3720_v50 = vpop.f32.mrf.mxu0 }
 0x2cd   : > { %v2822_v9 = vpop.f32.mrf.mxu1 }
 0x2ce   : > { %v3721_v8 = vpop.f32.mrf.mxu0 }
 0x2cf   : > { %v2823_v37 = vpop.f32.mrf.mxu1  ;;  %v7435_v43 = vadd.f32 %v3721_v8, %v2890_v38 }
 0x2d0   : > { %v2892_v25 = vadd.f32 %v2823_v37, %v7303_v18  ;;  %v3723_v48 = vpop.f32.mrf.mxu0 }
 0x2d1   : > { %v2825_v2 = vpop.f32.mrf.mxu1 }
 0x2d2   : > { %v3726_v54 = vpop.f32.mrf.mxu0 }
 0x2d3   : > { %v2828_v26 = vpop.f32.mrf.mxu1  ;;  %v7438_v46 = vadd.f32 %v3726_v54, %v2891_v19 }
 0x2d4   : > { %v2893_v51 = vadd.f32 %v2828_v26, %v7295_v63  ;;  %v3728_v49 = vpop.f32.mrf.mxu0 }
 0x2d5   : > { %v2830_v56 = vpop.f32.mrf.mxu1 }
 0x2d6   : > { %v3729_v5 = vpop.f32.mrf.mxu0 }
 0x2d7   : > { %v2831_v7 = vpop.f32.mrf.mxu1  ;;  %v7441_v32 = vadd.f32 %v3729_v5, %v2892_v25 }
 0x2d8   : > { %v2894_v12 = vadd.f32 %v2831_v7, %v7300_v20  ;;  %v3731_v18 = vpop.f32.mrf.mxu0 }
 0x2d9   : > { %v2833_v62 = vpop.f32.mrf.mxu1 }
 0x2da   : > { %v3734_v15 = vpop.f32.mrf.mxu0 }
 0x2db   : > { %v2836_v13 = vpop.f32.mrf.mxu1  ;;  %v7444_v55 = vadd.f32 %v3734_v15, %v2893_v51 }
 0x2dc   : > { %v2895_v35 = vadd.f32 %v2836_v13, %v7311_v10  ;;  %v3736_v63 = vpop.f32.mrf.mxu0 }
 0x2dd   : > { %v2838_v27 = vpop.f32.mrf.mxu1 }
 0x2de   : > { %v3737_v59 = vpop.f32.mrf.mxu0 }
 0x2df   : > { %v2839_v38 = vpop.f32.mrf.mxu1  ;;  %v7447_v17 = vadd.f32 %v3737_v59, %v2894_v12 }
 0x2e0   : > { %v2896_v11 = vadd.f32 %v2839_v38, %v7317_v42  ;;  %v3739_v20 = vpop.f32.mrf.mxu0 }
 0x2e1   : > { %v2841_v52 = vpop.f32.mrf.mxu1 }
 0x2e2   : > { %v3742_v9 = vpop.f32.mrf.mxu0 }
 0x2e3   : > { %v2844_v19 = vpop.f32.mrf.mxu1  ;;  %v7450_v37 = vadd.f32 %v3742_v9, %v2895_v35 }
 0x2e4   : > { %v2897_v50 = vadd.f32 %v2844_v19, %v7309_v41  ;;  %v3744_v10 = vpop.f32.mrf.mxu0 }
 0x2e5   : > { %v2846_v8 = vpop.f32.mrf.mxu1 }
 0x2e6   : > { %v3745_v2 = vpop.f32.mrf.mxu0  ;;  %v7470_v8 = vld [vmem:[%s7724_s5] ss:$0 sm:$0xff] }
 0x2e7   : > { %v2847_v25 = vpop.f32.mrf.mxu1  ;;  %v7453_v26 = vadd.f32 %v3745_v2, %v2896_v11 }
 0x2e8   : > { %v2898_v48 = vadd.f32 %v2847_v25, %v7314_v1  ;;  %v3747_v42 = vpop.f32.mrf.mxu0 }
 0x2e9   : > { %v2849_v54 = vpop.f32.mrf.mxu1 }
 0x2ea   : > { %v3750_v56 = vpop.f32.mrf.mxu0 }
 0x2eb   : > { %v2852_v51 = vpop.f32.mrf.mxu1  ;;  %v7456_v7 = vadd.f32 %v3750_v56, %v2897_v50 }
 0x2ec   : > { %v2899_v49 = vadd.f32 %v2852_v51, %v7327_v22  ;;  %v3752_v41 = vpop.f32.mrf.mxu0 }
 0x2ed   : > { %v2854_v5 = vpop.f32.mrf.mxu1 }
 0x2ee   : > { %v3753_v62 = vpop.f32.mrf.mxu0 }
 0x2ef   : > { %v2855_v12 = vpop.f32.mrf.mxu1  ;;  %v7459_v13 = vadd.f32 %v3753_v62, %v2898_v48 }
 0x2f0   : > { %v2900_v18 = vadd.f32 %v2855_v12, %v7332_v45  ;;  %v3755_v1 = vpop.f32.mrf.mxu0 }
 0x2f1   : > { %v2857_v15 = vpop.f32.mrf.mxu1 }
 0x2f2   : > { %v3758_v27 = vpop.f32.mrf.mxu0 }
 0x2f3   : > { %v2860_v35 = vpop.f32.mrf.mxu1  ;;  %v7462_v38 = vadd.f32 %v3758_v27, %v2899_v49 }
 0x2f4   : > { %v2901_v63 = vadd.f32 %v2860_v35, %v7322_v33  ;;  %v3760_v22 = vpop.f32.mrf.mxu0 }
 0x2f5   : > { %v2862_v59 = vpop.f32.mrf.mxu1 }
 0x2f6   : > { %v3761_v52 = vpop.f32.mrf.mxu0 }
 0x2f7   : > { %v2863_v11 = vpop.f32.mrf.mxu1  ;;  %v7465_v19 = vadd.f32 %v3761_v52, %v2900_v18 }
 0x2f8   : > { %v2902_v20 = vadd.f32 %v2863_v11, %v7330_v53  ;;  %v3763_v45 = vpop.f32.mrf.mxu0  ;;  %v7479_v53 = vld [vmem:[%s7725_s6] ss:$0 sm:$0xff] }
 0x2f9   : > { %v2865_v9 = vpop.f32.mrf.mxu1 }
 0x2fa   : > { %v3766_v10 = vpop.f32.mrf.mxu0 }
 0x2fb   : > { %v4122_v50 = vpop.f32.mrf.mxu1  ;;  %v7473_v25 = vadd.f32 %v3766_v10, %v2901_v63 }
 0x2fc   : > { %v4265_v33 = vadd.f32 %v4122_v50, %v7336_v34  ;;  %v3768_v48 = vpop.f32.mrf.mxu0 }
 0x2fd   : > { %v4124_v2 = vpop.f32.mrf.mxu1 }
 0x2fe   : > { %v4308_v54 = vmul.f32 %v7470_v8, %v4265_v33  ;;  %v3769_v51 = vpop.f32.mrf.mxu0 }
 0x2ff   : > { %v4125_v42 = vpop.f32.mrf.mxu1  ;;  %v7482_v49 = vadd.f32 %v3769_v51, %v2902_v20 }
 0x300   : > { %v4266_v56 = vadd.f32 %v4125_v42, %v7341_v39  ;;  %v3771_v41 = vpop.f32.mrf.mxu0  ;;  %v4351_v34 = vadd.f32 %v7479_v53, %v4308_v54 }
 0x301   : > { %v4127_v5 = vpop.f32.mrf.mxu1 }
 0x302   : > { %v4309_v12 = vmul.f32 %v7470_v8, %v4266_v56  ;;  %v4387_v35 = vmax.f32 %v4351_v34, 0.0 }
 0x303   : > { %v4130_v62 = vpop.f32.mrf.mxu1 }
 0x304   : > { %v4352_v18 = vadd.f32 %v7479_v53, %v4309_v12  ;;  %v4267_v15 = vadd.f32 %v4130_v62, %v7345_v30 }
 0x305   : > { %v4132_v1 = vpop.f32.mrf.mxu1 }
 0x306   : > { %v4388_v27 = vmax.f32 %v4352_v18, 0.0  ;;  %v4310_v63 = vmul.f32 %v7470_v8, %v4267_v15 }
 0x307   : > { %v4133_v59 = vpop.f32.mrf.mxu1 }
 0x308   : > { %v7489_v39 = vpack.c.bf16 %v4388_v27, %v4387_v35  ;;  %v4268_v22 = vadd.f32 %v4133_v59, %v7351_v23  ;;  %v4353_v52 = vadd.f32 %v7479_v53, %v4310_v63 }
 0x309   : > { %v4135_v11 = vpop.f32.mrf.mxu1 }
 0x30a   : > { %v4311_v20 = vmul.f32 %v7470_v8, %v4268_v22  ;;  %v4389_v10 = vmax.f32 %v4353_v52, 0.0 }
 0x30b   : > { %v4138_v9 = vpop.f32.mrf.mxu1 }
 0x30c   : > { %v4354_v45 = vadd.f32 %v7479_v53, %v4311_v20  ;;  %v4269_v30 = vadd.f32 %v4138_v9, %v7355_v21 }
 0x30d   : > { %v4140_v50 = vpop.f32.mrf.mxu1 }
 0x30e   : > { %v4390_v33 = vmax.f32 %v4354_v45, 0.0  ;;  %v4312_v2 = vmul.f32 %v7470_v8, %v4269_v30  ;;  %v5626_v50 = vld [vmem:[%s7727_s8 + $0x4] ss:$12 sps:$4 sm:$0xff]  }
 0x30f   : > { %v4141_v48 = vpop.f32.mrf.mxu1  ;;  %4566 = vmatprep.mubr.bf16.mxu0 %v5626_v50 }
 0x310   : > { %v7497_v54 = vpack.c.bf16 %v4390_v33, %v4389_v10  ;;  %v4270_v23 = vadd.f32 %v4141_v48, %v7360_v47  ;;  %v4355_v51 = vadd.f32 %v7479_v53, %v4312_v2 }
 0x311   : > { %v4143_v42 = vpop.f32.mrf.mxu1 }
 0x312   : > { %v4313_v56 = vmul.f32 %v7470_v8, %v4270_v23  ;;  %v4391_v12 = vmax.f32 %v4355_v51, 0.0 }
 0x313   : > { %v4146_v5 = vpop.f32.mrf.mxu1 }
 0x314   : > { %v4356_v41 = vadd.f32 %v7479_v53, %v4313_v56  ;;  %v4271_v21 = vadd.f32 %v4146_v5, %v7364_v0 }
 0x315   : > { %v4148_v34 = vpop.f32.mrf.mxu1 }
 0x316   : > { %v4392_v62 = vmax.f32 %v4356_v41, 0.0  ;;  %v4314_v18 = vmul.f32 %v7470_v8, %v4271_v21 }
 0x317   : > { %v4149_v15 = vpop.f32.mrf.mxu1 }
 0x318   : > { %v7505_v1 = vpack.c.bf16 %v4392_v62, %v4391_v12  ;;  %v4272_v47 = vadd.f32 %v4149_v15, %v7370_v40  ;;  %v4357_v27 = vadd.f32 %v7479_v53, %v4314_v18 }
 0x319   : > { %v4151_v35 = vpop.f32.mrf.mxu1 }
 0x31a   : > { %v4315_v63 = vmul.f32 %v7470_v8, %v4272_v47  ;;  %v4393_v52 = vmax.f32 %v4357_v27, 0.0 }
 0x31b   : > { %v4154_v59 = vpop.f32.mrf.mxu1 }
 0x31c   : > { %v4358_v22 = vadd.f32 %v7479_v53, %v4315_v63  ;;  %v4273_v0 = vadd.f32 %v4154_v59, %v7374_v3 }
 0x31d   : > { %v4156_v11 = vpop.f32.mrf.mxu1 }
 0x31e   : > { %v4394_v20 = vmax.f32 %v4358_v22, 0.0  ;;  %v4316_v9 = vmul.f32 %v7470_v8, %v4273_v0 }
 0x31f   : > { %v4157_v45 = vpop.f32.mrf.mxu1 }
 0x320   : > { %v7513_v30 = vpack.c.bf16 %v4394_v20, %v4393_v52  ;;  %v4274_v40 = vadd.f32 %v4157_v45, %v7378_v29  ;;  %v4359_v33 = vadd.f32 %v7479_v53, %v4316_v9 }
 0x321   : > { %v4159_v10 = vpop.f32.mrf.mxu1 }
 0x322   : > { %v4317_v2 = vmul.f32 %v7470_v8, %v4274_v40  ;;  %v4395_v51 = vmax.f32 %v4359_v33, 0.0 }
 0x323   : > { %v4162_v3 = vpop.f32.mrf.mxu1 }
 0x324   : > { %v4360_v48 = vadd.f32 %v7479_v53, %v4317_v2  ;;  %v4275_v23 = vadd.f32 %v4162_v3, %v7384_v31 }
 0x325   : > { %v4164_v42 = vpop.f32.mrf.mxu1 }
 0x326   : > { %v4396_v56 = vmax.f32 %v4360_v48, 0.0  ;;  %v4318_v29 = vmul.f32 %v7470_v8, %v4275_v23 }
 0x327   : > { %v4165_v5 = vpop.f32.mrf.mxu1 }
 0x328   : > { %v7524_v41 = vpack.c.bf16 %v4396_v56, %v4395_v51  ;;  %v4276_v21 = vadd.f32 %v4165_v5, %v7389_v58  ;;  %v4361_v12 = vadd.f32 %v7479_v53, %v4318_v29 }
 0x329   : > { %v4167_v34 = vpop.f32.mrf.mxu1 }
 0x32a   : > { %v4319_v62 = vmul.f32 %v7470_v8, %v4276_v21  ;;  %v4397_v35 = vmax.f32 %v4361_v12, 0.0 }
 0x32b   : > { %v4170_v18 = vpop.f32.mrf.mxu1 }
 0x32c   : > { %v4362_v15 = vadd.f32 %v7479_v53, %v4319_v62  ;;  %v4277_v31 = vadd.f32 %v4170_v18, %v7393_v60 }
 0x32d   : > { %v4172_v47 = vpop.f32.mrf.mxu1 }
 0x32e   : > { %v4398_v27 = vmax.f32 %v4362_v15, 0.0  ;;  %v4320_v63 = vmul.f32 %v7470_v8, %v4277_v31 }
 0x32f   : > { %v4173_v59 = vpop.f32.mrf.mxu1 }
 0x330   : > { %v7532_v22 = vpack.c.bf16 %v4398_v27, %v4397_v35  ;;  %v4278_v58 = vadd.f32 %v4173_v59, %v7397_v16  ;;  %v4363_v11 = vadd.f32 %v7479_v53, %v4320_v63 }
 0x331   : > { %v4175_v0 = vpop.f32.mrf.mxu1 }
 0x332   : > { %v4321_v52 = vmul.f32 %v7470_v8, %v4278_v58  ;;  %v4399_v40 = vmax.f32 %v4363_v11, 0.0 }
 0x333   : > { %v4178_v20 = vpop.f32.mrf.mxu1 }
 0x334   : > { %v4364_v9 = vadd.f32 %v7479_v53, %v4321_v52  ;;  %v4279_v60 = vadd.f32 %v4178_v20, %v7401_v36 }
 0x335   : > { %v4180_v45 = vpop.f32.mrf.mxu1 }
 0x336   : > { %v4400_v50 = vmax.f32 %v4364_v9, 0.0  ;;  %v4322_v10 = vmul.f32 %v7470_v8, %v4279_v60 }
 0x337   : > { %v4181_v33 = vpop.f32.mrf.mxu1 }
 0x338   : > { %v7540_v2 = vpack.c.bf16 %v4400_v50, %v4399_v40  ;;  %v4280_v16 = vadd.f32 %v4181_v33, %v7406_v6  ;;  %v4365_v48 = vadd.f32 %v7479_v53, %v4322_v10 }
 0x339   : > { %v4183_v3 = vpop.f32.mrf.mxu1 }
 0x33a   : > { %v4323_v23 = vmul.f32 %v7470_v8, %v4280_v16  ;;  %v4401_v29 = vmax.f32 %v4365_v48, 0.0 }
 0x33b   : > { %v4186_v42 = vpop.f32.mrf.mxu1 }
 0x33c   : > { %v4366_v51 = vadd.f32 %v7479_v53, %v4323_v23  ;;  %v4281_v36 = vadd.f32 %v4186_v42, %v7410_v14 }
 0x33d   : > { %v4188_v56 = vpop.f32.mrf.mxu1 }
 0x33e   : > { %v4402_v5 = vmax.f32 %v4366_v51, 0.0  ;;  %v4324_v21 = vmul.f32 %v7470_v8, %v4281_v36 }
 0x33f   : > { %v4189_v34 = vpop.f32.mrf.mxu1 }
 0x340   : > { %v7548_v12 = vpack.c.bf16 %v4402_v5, %v4401_v29  ;;  %v4282_v6 = vadd.f32 %v4189_v34, %v7414_v61  ;;  %v4367_v18 = vadd.f32 %v7479_v53, %v4324_v21 }
 0x341   : > { %v4191_v62 = vpop.f32.mrf.mxu1 }
 0x342   : > { %v4325_v15 = vmul.f32 %v7470_v8, %v4282_v6  ;;  %v4403_v27 = vmax.f32 %v4367_v18, 0.0 }
 0x343   : > { %v4194_v31 = vpop.f32.mrf.mxu1 }
 0x344   : > { %v4368_v47 = vadd.f32 %v7479_v53, %v4325_v15  ;;  %v4283_v14 = vadd.f32 %v4194_v31, %v7418_v4 }
 0x345   : > { %v4196_v35 = vpop.f32.mrf.mxu1 }
 0x346   : > { %v4404_v63 = vmax.f32 %v4368_v47, 0.0  ;;  %v4326_v59 = vmul.f32 %v7470_v8, %v4283_v14 }
 0x347   : > { %v4197_v58 = vpop.f32.mrf.mxu1 }
 0x348   : > { %v4284_v0 = vadd.f32 %v4197_v58, %v7422_v24  ;;  %v7557_v11 = vpack.c.bf16 %v4404_v63, %v4403_v27  ;;  %v4369_v52 = vadd.f32 %v7479_v53, %v4326_v59 }
 0x349   : > { %v4199_v61 = vpop.f32.mrf.mxu1 }
 0x34a   : > { %v4327_v20 = vmul.f32 %v7470_v8, %v4284_v0  ;;  %v4405_v40 = vmax.f32 %v4369_v52, 0.0 }
 0x34b   : > { %v4202_v9 = vpop.f32.mrf.mxu1 }
 0x34c   : > { %v4370_v60 = vadd.f32 %v7479_v53, %v4327_v20  ;;  %v4285_v4 = vadd.f32 %v4202_v9, %v7426_v28 }
 0x34d   : > { %v4204_v45 = vpop.f32.mrf.mxu1 }
 0x34e   : > { %v4406_v50 = vmax.f32 %v4370_v60, 0.0  ;;  %v4328_v10 = vmul.f32 %v7470_v8, %v4285_v4 }
 0x34f   : > { %v4205_v33 = vpop.f32.mrf.mxu1 }
 0x350   : > { %v4286_v24 = vadd.f32 %v4205_v33, %v7429_v57  ;;  %v7565_v16 = vpack.c.bf16 %v4406_v50, %v4405_v40  ;;  %v4371_v48 = vadd.f32 %v7479_v53, %v4328_v10 }
 0x351   : > { %v4207_v3 = vpop.f32.mrf.mxu1 }
 0x352   : > { %v4329_v23 = vmul.f32 %v7470_v8, %v4286_v24  ;;  %v4407_v56 = vmax.f32 %v4371_v48, 0.0 }
 0x353   : > { %v4210_v42 = vpop.f32.mrf.mxu1 }
 0x354   : > { %v4372_v51 = vadd.f32 %v7479_v53, %v4329_v23  ;;  %v4287_v28 = vadd.f32 %v4210_v42, %v7432_v44 }
 0x355   : > { %v4212_v36 = vpop.f32.mrf.mxu1 }
 0x356   : > { %v4408_v29 = vmax.f32 %v4372_v51, 0.0  ;;  %v4330_v5 = vmul.f32 %v7470_v8, %v4287_v28 }
 0x357   : > { %v4213_v21 = vpop.f32.mrf.mxu1 }
 0x358   : > { %v4288_v57 = vadd.f32 %v4213_v21, %v7435_v43  ;;  %v7573_v34 = vpack.c.bf16 %v4408_v29, %v4407_v56  ;;  %v4373_v62 = vadd.f32 %v7479_v53, %v4330_v5 }
 0x359   : > { %v4215_v6 = vpop.f32.mrf.mxu1 }
 0x35a   : > { %v4331_v18 = vmul.f32 %v7470_v8, %v4288_v57  ;;  %v4409_v14 = vmax.f32 %v4373_v62, 0.0 }
 0x35b   : > { %v4218_v15 = vpop.f32.mrf.mxu1 }
 0x35c   : > { %v4374_v31 = vadd.f32 %v7479_v53, %v4331_v18  ;;  %v4289_v44 = vadd.f32 %v4218_v15, %v7438_v46 }
 0x35d   : > { %v4220_v47 = vpop.f32.mrf.mxu1 }
 0x35e   : > { %v4410_v35 = vmax.f32 %v4374_v31, 0.0  ;;  %v4332_v27 = vmul.f32 %v7470_v8, %v4289_v44 }
 0x35f   : > { %v4221_v63 = vpop.f32.mrf.mxu1 }
 0x360   : > { %v4290_v43 = vadd.f32 %v4221_v63, %v7441_v32  ;;  %v7581_v59 = vpack.c.bf16 %v4410_v35, %v4409_v14  ;;  %v4375_v0 = vadd.f32 %v7479_v53, %v4332_v27 }
 0x361   : > { %v4223_v58 = vpop.f32.mrf.mxu1 }
 0x362   : > { %v4333_v61 = vmul.f32 %v7470_v8, %v4290_v43  ;;  %v4411_v60 = vmax.f32 %v4375_v0, 0.0 }
 0x363   : > { %v4226_v52 = vpop.f32.mrf.mxu1 }
 0x364   : > { %v4376_v20 = vadd.f32 %v7479_v53, %v4333_v61  ;;  %v4291_v46 = vadd.f32 %v4226_v52, %v7444_v55 }
 0x365   : > { %v4228_v9 = vpop.f32.mrf.mxu1 }
 0x366   : > { %v4412_v4 = vmax.f32 %v4376_v20, 0.0  ;;  %v4334_v45 = vmul.f32 %v7470_v8, %v4291_v46 }
 0x367   : > { %v4229_v40 = vpop.f32.mrf.mxu1 }
 0x368   : > { %v4292_v32 = vadd.f32 %v4229_v40, %v7447_v17  ;;  %v7589_v50 = vpack.c.bf16 %v4412_v4, %v4411_v60  ;;  %v4377_v33 = vadd.f32 %v7479_v53, %v4334_v45 }
 0x369   : > { %v4231_v10 = vpop.f32.mrf.mxu1 }
 0x36a   : > { %v4335_v24 = vmul.f32 %v7470_v8, %v4292_v32  ;;  %v4413_v42 = vmax.f32 %v4377_v33, 0.0 }
 0x36b   : > { %v4234_v3 = vpop.f32.mrf.mxu1 }
 0x36c   : > { %v4378_v48 = vadd.f32 %v7479_v53, %v4335_v24  ;;  %v4293_v55 = vadd.f32 %v4234_v3, %v7450_v37 }
 0x36d   : > { %v4236_v23 = vpop.f32.mrf.mxu1 }
 0x36e   : > { %v4414_v51 = vmax.f32 %v4378_v48, 0.0  ;;  %v4336_v28 = vmul.f32 %v7470_v8, %v4293_v55 }
 0x36f   : > { %v4237_v36 = vpop.f32.mrf.mxu1 }
 0x370   : > { %v4294_v17 = vadd.f32 %v4237_v36, %v7453_v26  ;;  %v4452_v56 = vpack.c.bf16 %v4414_v51, %v4413_v42  ;;  %v4379_v5 = vadd.f32 %v7479_v53, %v4336_v28 }
 0x371   : > { %v4239_v29 = vpop.f32.mrf.mxu1 }
 0x372   : > { %v4337_v21 = vmul.f32 %v7470_v8, %v4294_v17  ;;  %v4415_v18 = vmax.f32 %v4379_v5, 0.0 }
 0x373   : > { %v4242_v57 = vpop.f32.mrf.mxu1 }
 0x374   : > { %v4380_v6 = vadd.f32 %v7479_v53, %v4337_v21  ;;  %v4295_v62 = vadd.f32 %v4242_v57, %v7456_v7 }
 0x375   : > { %v4244_v37 = vpop.f32.mrf.mxu1 }
 0x376   : > { %v4416_v15 = vmax.f32 %v4380_v6, 0.0  ;;  %v4338_v31 = vmul.f32 %v7470_v8, %v4295_v62 }
 0x377   : > { %v4245_v44 = vpop.f32.mrf.mxu1 }
 0x378   : > { %v4296_v47 = vadd.f32 %v4245_v44, %v7459_v13  ;;  %v4453_v26 = vpack.c.bf16 %v4416_v15, %v4415_v18  ;;  %v4381_v35 = vadd.f32 %v7479_v53, %v4338_v31 }
 0x379   : > { %v4247_v14 = vpop.f32.mrf.mxu1 }
 0x37a   : > { %v4339_v27 = vmul.f32 %v7470_v8, %v4296_v47  ;;  %v4417_v0 = vmax.f32 %v4381_v35, 0.0 }
 0x37b   : > { %v4250_v63 = vpop.f32.mrf.mxu1 }
 0x37c   : > { %v4382_v43 = vadd.f32 %v7479_v53, %v4339_v27  ;;  %v4297_v58 = vadd.f32 %v4250_v63, %v7462_v38 }
 0x37d   : > { %v4252_v7 = vpop.f32.mrf.mxu1 }
 0x37e   : > { %v4418_v61 = vmax.f32 %v4382_v43, 0.0  ;;  %v4340_v52 = vmul.f32 %v7470_v8, %v4297_v58 }
 0x37f   : > { %v4253_v20 = vpop.f32.mrf.mxu1 }
 0x380   : > { %v4298_v46 = vadd.f32 %v4253_v20, %v7465_v19  ;;  %v4454_v13 = vpack.c.bf16 %v4418_v61, %v4417_v0  ;;  %v4383_v60 = vadd.f32 %v7479_v53, %v4340_v52 }
 0x381   : > { %v4255_v9 = vpop.f32.mrf.mxu1 }
 0x382   : > { %v4341_v4 = vmul.f32 %v7470_v8, %v4298_v46  ;;  %5201 = vmatprep.subr.bf16.mxu0 %v4454_v13  ;;  %v4419_v10 = vmax.f32 %v4383_v60, 0.0 }
 0x383   : > { %v4258_v45 = vpop.f32.mrf.mxu1  ;;  %5202 = vmatpush3.bf16.msra.mxu0 %v7548_v12 }
 0x384   : > { %v4384_v38 = vadd.f32 %v7479_v53, %v4341_v4  ;;  %v4299_v40 = vadd.f32 %v4258_v45, %v7473_v25  ;;  %5203 = vmatprep.subr.bf16.mxu0 %v4453_v26 }
 0x385   : > { %v4260_v32 = vpop.f32.mrf.mxu1 }
 0x386   : > { %v4420_v33 = vmax.f32 %v4384_v38, 0.0  ;;  %v4342_v19 = vmul.f32 %v7470_v8, %v4299_v40 }
 0x387   : > { %v4261_v24 = vpop.f32.mrf.mxu1  ;;  %5204 = vmatpush3.bf16.msra.mxu0 %v7540_v2 }
 0x388   : > { %v4300_v3 = vadd.f32 %v4261_v24, %v7482_v49  ;;  %5205 = vmatprep.subr.bf16.mxu0 %v4452_v56  ;;  %v4455_v48 = vpack.c.bf16 %v4420_v33, %v4419_v10  ;;  %v4385_v12 = vadd.f32 %v7479_v53, %v4342_v19 }
 0x389   : > { %v4263_v55 = vpop.f32.mrf.mxu1 }
 0x38a   : > { %v4343_v23 = vmul.f32 %v7470_v8, %v4300_v3  ;;  %v4421_v42 = vmax.f32 %v4385_v12, 0.0  ;;  %v5624_v8 = vld [vmem:[%s7727_s8] ss:$12 sps:$4 sm:$0xff]  }
 0x38b   : > { %5206 = vmatpush3.bf16.msra.mxu0 %v7532_v22  ;;  %v5636_v22 = vld [vmem:[%s7727_s8 + $0x8] ss:$12 sps:$4 sm:$0xff]  }
 0x38c   : > { %v4386_v25 = vadd.f32 %v7479_v53, %v4343_v23  ;;  %5207 = vmatprep.subr.bf16.mxu0 %v7589_v50  ;;  %v5629_v53 = vld [vmem:[%s7727_s8 + $0x1c] ss:$12 sps:$4 sm:$0xff]  }
 0x38e   : > { %v4422_v51 = vmax.f32 %v4386_v25, 0.0 }
 0x38f   : > { %5208 = vmatpush3.bf16.msra.mxu0 %v7524_v41  ;;  %v5633_v41 = vld [vmem:[%s7727_s8 + $0x48] ss:$12 sps:$4 sm:$0xff]  }
 0x390   : > { %v4456_v2 = vpack.c.bf16 %v4422_v51, %v4421_v42  ;;  %5209 = vmatprep.subr.bf16.mxu0 %v7581_v59 }
 0x392   : > { %v4532_v49 = vsel %vm2487_vm2, %v4456_v2, 0 }
 0x393   : > { %5210 = vmatpush3.bf16.msra.mxu0 %v7513_v30  ;;  %v5635_v30 = vld [vmem:[%s7727_s8 + $0x4c] ss:$12 sps:$4 sm:$0xff]  }
 0x394   : > { %5211 = vmatprep.subr.bf16.mxu0 %v7573_v34  ;;  %v5639_v34 = vld [vmem:[%s7727_s8 + $0x50] ss:$12 sps:$4 sm:$0xff]  }
 0x397   : > { %5212 = vmatpush3.bf16.msra.mxu0 %v7505_v1  ;;  %v5630_v1 = vld [vmem:[%s7727_s8 + $0x30] ss:$12 sps:$4 sm:$0xff]  }
 0x398   : > { %5213 = vmatprep.subr.bf16.mxu0 %v7565_v16  ;;  %v5638_v16 = vld [vmem:[%s7727_s8 + $0x38] ss:$12 sps:$4 sm:$0xff]  }
 0x39b   : > { %5214 = vmatpush3.bf16.msra.mxu0 %v7497_v54  ;;  %v5627_v54 = vld [vmem:[%s7727_s8 + $0x18] ss:$12 sps:$4 sm:$0xff]  }
 0x39c   : > { %5215 = vmatprep.subr.bf16.mxu0 %v7557_v11  ;;  %v5637_v11 = vld [vmem:[%s7727_s8 + $0x20] ss:$12 sps:$4 sm:$0xff]  }
 0x39f   : > { %5216 = vmatpush3.bf16.msra.mxu0 %v7489_v39  ;;  %v5632_v39 = vld [vmem:[%s7727_s8 + $0x34] ss:$12 sps:$4 sm:$0xff]  }
 0x3a0   : > { %5411 = vmatprep.subr.msk.bf16.mxu0 %vm2487_vm2, %v4456_v2 }
 0x3a2   : > { %4567 = vmatmul.mubr.bf16.vlgmr.msra.gmra.mxu0 %v5624_v8 }
 0x3a3   : > { %5400 = vmatpush3.bf16.msra.mxu0 %v4532_v49  ;;  %4574 = vmatprep.mubr.bf16.mxu0 %v5629_v53 }
 0x3a4   : > { %5401 = vmatprep.subr.bf16.mxu0 %v4455_v48 }
 0x3a7   : > { %5402 = vmatpush3.bf16.msra.mxu0 %v4455_v48 }
 0x3aa   : > { %4575 = vmatmul.mubr.bf16.gmra.mxu0 %v5627_v54 }
 0x3ab   : > { %4582 = vmatprep.mubr.bf16.mxu0 %v5632_v39 }
 0x3b2   : > { %4583 = vmatmul.mubr.bf16.gmra.mxu0 %v5630_v1 }
 0x3b3   : > { %4590 = vmatprep.mubr.bf16.mxu0 %v5635_v30 }
 0x3ba   : > { %4591 = vmatmul.mubr.bf16.gmra.mxu0 %v5633_v41 }
 0x3bb   : > { %5403 = vmatprep.mubr.msk.bf16.mxu0 %vm4517_vm6, %v5636_v22 }
 0x3c2   : > { %5404 = vmatmul.mubr.msk.bf16.vlgmr.msra.gmra.mxu0 %vm4517_vm6, %v5637_v11 }
 0x3c3   : > { %5407 = vmatprep.mubr.msk.bf16.mxu0 %vm4517_vm6, %v5638_v16 }
 0x3ca   : > { %5408 = vmatmul.mubr.msk.bf16.gmra.mxu0 %vm4517_vm6, %v5639_v34 }
 0x462   : > { %v5217_v59 = vpop.f32.mrf.mxu0 }
 0x464   : > { %v5218_v50 = vpop.f32.mrf.mxu0 }
 0x465   : > { %v5219_v26 = vadd.f32 %v5218_v50, %v5217_v59 }
 0x466   : > { %v5220_v28 = vpop.f32.mrf.mxu0 }
 0x468   : > { %v5221_v36 = vpop.f32.mrf.mxu0 }
 0x469   : > { %v5222_v58 = vadd.f32 %v5221_v36, %v5220_v28 }
 0x46a   : > { %v5223_v17 = vpop.f32.mrf.mxu0 }
 0x46c   : > { %v5224_v56 = vpop.f32.mrf.mxu0 }
 0x46d   : > { %v5225_v44 = vadd.f32 %v5224_v56, %v5223_v17 }
 0x46e   : > { %v5226_v29 = vpop.f32.mrf.mxu0 }
 0x470   : > { %v5227_v5 = vpop.f32.mrf.mxu0 }
 0x471   : > { %v5228_v27 = vadd.f32 %v5227_v5, %v5226_v29 }
 0x472   : > { %v5229_v21 = vpop.f32.mrf.mxu0 }
 0x474   : > { %v5230_v57 = vpop.f32.mrf.mxu0 }
 0x475   : > { %v5231_v46 = vadd.f32 %v5230_v57, %v5229_v21 }
 0x476   : > { %v5232_v6 = vpop.f32.mrf.mxu0 }
 0x478   : > { %v5233_v62 = vpop.f32.mrf.mxu0 }
 0x479   : > { %v5234_v38 = vadd.f32 %v5233_v62, %v5232_v6 }
 0x47a   : > { %v5235_v37 = vpop.f32.mrf.mxu0 }
 0x47c   : > { %v5236_v18 = vpop.f32.mrf.mxu0 }
 0x47d   : > { %v5237_v61 = vadd.f32 %v5236_v18, %v5235_v37 }
 0x47e   : > { %v5238_v15 = vpop.f32.mrf.mxu0 }
 0x480   : > { %v5239_v31 = vpop.f32.mrf.mxu0 }
 0x481   : > { %v5240_v60 = vadd.f32 %v5239_v31, %v5238_v15 }
 0x482   : > { %v5405_v47 = vpop.f32.mrf.mxu0 }
 0x483   : > { %v4642_v14 = vadd.f32 %v5405_v47, %v5225_v44 }
 0x484   : > { %v4633_v35 = vpop.f32.mrf.mxu0 }
 0x485   : > { %4666 = vst [vmem:[%s325_s16 + $0x10] sm:$0xff] %v4642_v14  ;;  %v4634_v63 = vadd.f32 %v5219_v26, %v4633_v35 }
 0x486   : > { %v5406_v43 = vpop.f32.mrf.mxu0 }
 0x487   : > { %4664 = vst [vmem:[%s325_s16] sm:$0xff] %v4634_v63  ;;  %v4645_v7 = vadd.f32 %v5406_v43, %v5228_v27 }
 0x488   : > { %v4636_v0 = vpop.f32.mrf.mxu0 }
 0x489   : > { %4667 = vst [vmem:[%s325_s16 + $0x18] sm:$0xff] %v4645_v7  ;;  %v4637_v52 = vadd.f32 %v5222_v58, %v4636_v0 }
 0x48a   : > { %v5409_v20 = vpop.f32.mrf.mxu0 }
 0x48b   : > { %4665 = vst [vmem:[%s325_s16 + $0x8] sm:$0xff] %v4637_v52  ;;  %v4658_v13 = vadd.f32 %v5409_v20, %v5237_v61 }
 0x48c   : > { %v4649_v9 = vpop.f32.mrf.mxu0 }
 0x48d   : > { %4670 = vst [vmem:[%s325_s16 + $0x30] sm:$0xff] %v4658_v13  ;;  %v4650_v4 = vadd.f32 %v5231_v46, %v4649_v9 }
 0x48e   : > { %v5410_v45 = vpop.f32.mrf.mxu0 }
 0x48f   : > { %4668 = vst [vmem:[%s325_s16 + $0x20] sm:$0xff] %v4650_v4  ;;  %v4661_v40 = vadd.f32 %v5410_v45, %v5240_v60 }
 0x490   : > { %v4652_v32 = vpop.f32.mrf.mxu0 }
 0x491   : > { %4671 = vst [vmem:[%s325_s16 + $0x38] sm:$0xff] %v4661_v40  ;;  %v4653_v10 = vadd.f32 %v5234_v38, %v4652_v32 }
 0x493   : > { %4669 = vst [vmem:[%s325_s16 + $0x28] sm:$0xff] %v4653_v10 }
 0x494   : > { %5673 = shalt.err (!%p5670_p3)
}
 0x495   : > { %s5674_s29 = scalar_lea.hbm %s7673_s22, 1024  ;;  %s5678_s17 = scalar_lea.hbm %s7728_s9, 2048 }
 0x496   : > { %p5675_p4 = scmp.ne.s32.totalorder %s7673_s22, %s5674_s29  ;;  %p5679_p9 = scmp.lt.s32.totalorder %s7673_s22, %s7728_s9 }
 0x497   : > { %p5680_p10 = scmp.lt.s32.totalorder %s5678_s17, %s5674_s29 }
 0x498   : > { %p5676_p7 = pnand %p5675_p4, %p5816_p5 }
 0x499   : > { %p5681_p11 = por %p5680_p10, %p5679_p9 }
 0x49a   : > { %p5677_p8 = pneg %p5676_p7 }
 0x49c   : > { %p5682_p12 = pnand %p5681_p11, %p5677_p8 }
 0x49e   : > { %5685 = shalt.err (!%p5682_p12)
}
 0x49f   : > { %s5726_s23 = smov 128   ;;  %s5727_s24 = smov 8  }
 0x4a0   : > { %5413 = dma.vmem_to_hbm [thread:$0]  (%p5816_p5), %s7675_s26, 1024, %s7673_s22, %s7679_s13, %s5726_s23, %s5726_s23, %s5727_s24  }
 0x4a1 PF: > { %p5419_p13 = scmp.ge.s32.totalorder %s5720_s12, 2  ;;  %s4701_s27 = sand.u32 1, %s5708_s30  }
 0x4a2   : > { %s4702_s25 = scalar_lea.sflag [#allocation4], %s4701_s27 }
 0x4a3   : > { %p5416_p0 = pnand %p5419_p13, %p5820_p6 }
 0x4a5   : > { %p5417_p1 = pneg %p5416_p0 }
 0x4a7   : > { %5703 = dma.done.wait (%p5417_p1), %s4702_s25, 1024  }
 0x4a8   : > { %5705 = vsyncadd (%p5417_p1), %s4702_s25, 4294966272  ;;  %p19_p2 = scmp.ge.s32.totalorder %s5803_s15, 4   ;;  %s7842_s30 = smov %s5712_s10 }
 0x4a9   : > { %s7843_s10 = smov %s5716_s11  ;;  %s7844_s11 = smov %s5814_s18 }
 0x4aa   : > { %s7845_s12 = smov %s5803_s15  ;;  %21 = sbr.rel (!%p19_p2) target bundleno = 3 (0x3), region = 91 }
 0x4af   :  { %4707 = vsyncpa [#allocation4], 1 }
 0x4b0   :  { %4709 = vsyncpa [#allocation4 + $0x1], 1 }

</bundles_post_ra>
